<compile_context>
chip_gen: v7x
topology: tpu7x:2x2x1
jax: 0.10.0
libtpu: 0.0.40
codegen_flags: <defaults>
</compile_context>

<pallas_src>
import math

import jax
import jax.numpy as jnp
from jax import lax
from jax.experimental import pallas as pl
from jax.experimental.pallas import tpu as pltpu

NUM_TRAIN_TIMESTEPS = 1000


# ----------------------------------------------------------------------------
# Fused kernel: DDPM add_noise -> conditioned denoiser -> MSE partial sum
# One grid step handles one (batch b, L-tile l) block; everything stays in
# VMEM/registers and only a (1,1,1,1) squared-error partial goes back to HBM.
# ----------------------------------------------------------------------------
def ldm_step_kernel(sa_ref, soma_ref,                       # scalar prefetch (B,) f32
                    lat_ref, nz_ref, te_ref, k_ref, vt_ref, bias_ref,
                    w_in_ref, b_in_ref, w_mid_ref, b_mid_ref,
                    w_out_ref, b_out_ref,
                    loss_ref):
    b = pl.program_id(0)
    sa = sa_ref[b]                                          # sqrt(alpha_cumprod[t_b])
    soma = soma_ref[b]                                      # sqrt(1 - alpha_cumprod[t_b])

    lat = lat_ref[0]                                        # (C, TL) f32
    nz = nz_ref[0]                                          # (C, TL) f32

    # DDPM add_noise, kept VMEM-resident (never written to HBM).
    noisy = sa * lat + soma * nz                            # (C, TL) f32

    # ---- simplified conditioned denoiser, channel-major (feature, length) ----
    # Input projection (1x1 conv over channels) on the MXU in bf16.
    noisy_bf = noisy.astype(jnp.bfloat16)
    h = jnp.dot(w_in_ref[...], noisy_bf,
                preferred_element_type=jnp.float32)         # (H_pad, TL)
    # Bias + precomputed time embedding (FiLM-lite add), broadcast over L tile.
    h = h + b_in_ref[...] + te_ref[0]

    # Cross-attention over text tokens; 1/sqrt(H) already folded into K.
    h_bf = h.astype(jnp.bfloat16)                           # single bf16 copy of h
    scores = jnp.dot(k_ref[0], h_bf,
                     preferred_element_type=jnp.float32)    # (T_pad, TL)
    scores = scores + bias_ref[...]                         # -1e30 at padded tokens
    scores = scores - jnp.max(scores, axis=0, keepdims=True)
    p = jnp.exp(scores)
    denom = jnp.sum(p, axis=0, keepdims=True)
    p_bf = (p * pl.reciprocal(denom, approx=True)).astype(jnp.bfloat16)
    ctx = jnp.dot(vt_ref[0], p_bf,
                  preferred_element_type=jnp.float32)       # (H_pad, TL)
    h = h + ctx

    # MLP with SiLU (f32 elementwise, bf16 MXU operands).
    h2 = jnp.dot(w_mid_ref[...], h.astype(jnp.bfloat16),
                 preferred_element_type=jnp.float32) + b_mid_ref[...]
    h2 = h2 * jax.nn.sigmoid(h2)

    # Output projection back to channel layout (C, TL).
    pred = jnp.dot(w_out_ref[...], h2.astype(jnp.bfloat16),
                   preferred_element_type=jnp.float32) + b_out_ref[...]

    # epsilon-prediction MSE partial sum (target == noise).
    d = pred - nz
    loss_ref[...] = jnp.reshape(jnp.sum(d * d), (1, 1, 1, 1))


# ----------------------------------------------------------------------------
# Wrapper helpers
# ----------------------------------------------------------------------------
def _round_up(x, m):
    return ((x + m - 1) // m) * m


def _pad_axis(x, axis, target):
    pad = target - x.shape[axis]
    if pad <= 0:
        return x
    widths = [(0, 0)] * x.ndim
    widths[axis] = (0, pad)
    return jnp.pad(x, widths)


def _pick_tile_l(L, max_tl=512):
    # Largest multiple of 128 that divides L and is <= max_tl.
    assert L % 128 == 0, "latent length must be a multiple of 128"
    tl = min(L, max_tl)
    while L % tl != 0:
        tl -= 128
    return tl


def make_scheduler_tables():
    # stable-diffusion-2-1 DDPM scheduler: scaled_linear betas.
    betas = jnp.linspace(0.00085 ** 0.5, 0.012 ** 0.5,
                         NUM_TRAIN_TIMESTEPS, dtype=jnp.float32) ** 2
    alphas_cumprod = jnp.cumprod(1.0 - betas)
    return jnp.sqrt(alphas_cumprod), jnp.sqrt(1.0 - alphas_cumprod)


# ----------------------------------------------------------------------------
# Wrapper: gathers scheduler scalars, precomputes time embedding + K/V, pads
# feature dims to MXU-native sizes, and launches the single fused pallas_call.
# ----------------------------------------------------------------------------
def fused_ldm_step(latents, noise, timesteps, encoder_hidden_states, params,
                   max_tile_l=512):
    B, C, L = latents.shape
    T, D = encoder_hidden_states.shape[1], encoder_hidden_states.shape[2]
    H = params["w_in"].shape[1]

    H_pad = _round_up(max(H, 128), 128)
    T_pad = _round_up(max(T, 128), 128)
    TL = _pick_tile_l(L, max_tile_l)
    num_l = L // TL

    latents = latents.astype(jnp.float32)
    noise = noise.astype(jnp.float32)

    # Per-example scheduler scalars (gathered in XLA, passed via SMEM prefetch).
    sqrt_acp, sqrt_one_minus_acp = make_scheduler_tables()
    sa_b = sqrt_acp[timesteps].astype(jnp.float32)                  # (B,)
    soma_b = sqrt_one_minus_acp[timesteps].astype(jnp.float32)      # (B,)

    # Sinusoidal time embedding -> linear -> SiLU, precomputed in XLA (tiny).
    half = H // 2
    idx = jnp.arange(half, dtype=jnp.float32)
    freqs = jnp.exp(-math.log(10000.0) * idx / half)
    arg = timesteps.astype(jnp.float32)[:, None] * freqs[None, :]
    sincos = jnp.concatenate([jnp.sin(arg), jnp.cos(arg)], axis=1)  # (B, H)
    te = sincos @ params["w_t"] + params["b_t"]
    te = te * jax.nn.sigmoid(te)
    te_c = _pad_axis(te.astype(jnp.float32)[:, :, None], 1, H_pad)  # (B, H_pad, 1)

    # K/V precomputed once per batch element (not per L tile); scale folded in.
    ehs = encoder_hidden_states.astype(jnp.float32)
    scale = 1.0 / math.sqrt(H)
    k = jnp.einsum('btd,dh->bth', ehs, params["w_k"]) * scale       # (B, T, H)
    v = jnp.einsum('btd,dh->bth', ehs, params["w_v"])               # (B, T, H)
    k = _pad_axis(_pad_axis(k, 1, T_pad), 2, H_pad).astype(jnp.bfloat16)
    vt = _pad_axis(_pad_axis(jnp.swapaxes(v, 1, 2), 1, H_pad),
                   2, T_pad).astype(jnp.bfloat16)                   # (B, H_pad, T_pad)

    # Additive softmax mask for padded key positions.
    attn_bias = jnp.where(jnp.arange(T_pad) < T, 0.0, -1e30)
    attn_bias = attn_bias.astype(jnp.float32).reshape(T_pad, 1)

    # Pre-transposed / zero-padded weights; bf16 matmul operands, f32 biases.
    bf16 = jnp.bfloat16
    w_in_t = _pad_axis(params["w_in"].T, 0, H_pad).astype(bf16)              # (H_pad, C)
    b_in_c = _pad_axis(params["b_in"].reshape(H, 1), 0, H_pad).astype(jnp.float32)
    w_mid_t = _pad_axis(_pad_axis(params["w_mid"].T, 0, H_pad), 1, H_pad).astype(bf16)
    b_mid_c = _pad_axis(params["b_mid"].reshape(H, 1), 0, H_pad).astype(jnp.float32)
    w_out_t = _pad_axis(params["w_out"].T, 1, H_pad).astype(bf16)            # (C, H_pad)
    b_out_c = params["b_out"].astype(jnp.float32)                            # (C, 1)

    def const_spec(shape):
        return pl.BlockSpec(shape, lambda b, l, sa, soma, _n=len(shape): (0,) * _n)

    grid_spec = pltpu.PrefetchScalarGridSpec(
        num_scalar_prefetch=2,
        grid=(B, num_l),
        in_specs=[
            pl.BlockSpec((1, C, TL), lambda b, l, sa, soma: (b, 0, l)),       # latents
            pl.BlockSpec((1, C, TL), lambda b, l, sa, soma: (b, 0, l)),       # noise
            pl.BlockSpec((1, H_pad, 1), lambda b, l, sa, soma: (b, 0, 0)),    # time emb
            pl.BlockSpec((1, T_pad, H_pad), lambda b, l, sa, soma: (b, 0, 0)),  # K
            pl.BlockSpec((1, H_pad, T_pad), lambda b, l, sa, soma: (b, 0, 0)),  # V^T
            const_spec((T_pad, 1)),                                           # attn bias
            const_spec((H_pad, C)), const_spec((H_pad, 1)),                   # w_in_t, b_in
            const_spec((H_pad, H_pad)), const_spec((H_pad, 1)),               # w_mid_t, b_mid
            const_spec((C, H_pad)), const_spec((C, 1)),                       # w_out_t, b_out
        ],
        out_specs=pl.BlockSpec((1, 1, 1, 1), lambda b, l, sa, soma: (b, l, 0, 0)),
    )

    # Advisory cost estimate for XLA scheduling.
    per_blk = (3 * C * TL                        # add_noise
               + 2 * H_pad * C * TL              # input projection
               + 2 * T_pad * H_pad * TL          # scores
               + 6 * T_pad * TL                  # softmax elementwise
               + 2 * H_pad * T_pad * TL          # context
               + 2 * H_pad * H_pad * TL + 4 * H_pad * TL   # MLP + SiLU
               + 2 * C * H_pad * TL + C * TL     # output projection + bias
               + 3 * C * TL)                     # MSE
    cost = pl.CostEstimate(
        flops=B * num_l * per_blk,
        transcendentals=B * num_l * (T_pad * TL + H_pad * TL + TL),
        bytes_accessed=(B * num_l * (2 * C * TL * 4 + 4)
                        + B * (H_pad * 4 + 2 * T_pad * H_pad * 2)
                        + 2 * (H_pad * C + H_pad * H_pad + C * H_pad)
                        + 4 * (2 * H_pad + C + T_pad)),
    )

    partials = pl.pallas_call(
        ldm_step_kernel,
        out_shape=jax.ShapeDtypeStruct((B, num_l, 1, 1), jnp.float32),
        grid_spec=grid_spec,
        compiler_params=pltpu.CompilerParams(
            dimension_semantics=("parallel", "parallel"),
            vmem_limit_bytes=48 * 1024 * 1024),
        cost_estimate=cost,
    )(sa_b, soma_b, latents, noise, te_c, k, vt, attn_bias,
      w_in_t, b_in_c, w_mid_t, b_mid_c, w_out_t, b_out_c)

    loss = jnp.sum(partials) / jnp.float32(B * C * L)
    return loss


# ----------------------------------------------------------------------------
# Parameter setup (plain-JAX glue)
# ----------------------------------------------------------------------------
def init_params(key, C, H, D):
    ks = jax.random.split(key, 6)

    def lin(k, fan_in, shape):
        return jax.random.normal(k, shape, jnp.float32) / jnp.sqrt(jnp.float32(fan_in))

    return {
        "w_in": lin(ks[0], C, (C, H)),
        "b_in": jnp.zeros((1, H), jnp.float32),
        "w_t": lin(ks[1], H, (H, H)),
        "b_t": jnp.zeros((1, H), jnp.float32),
        "w_k": lin(ks[2], D, (D, H)),
        "w_v": lin(ks[3], D, (D, H)),
        "w_mid": lin(ks[4], H, (H, H)),
        "b_mid": jnp.zeros((1, H), jnp.float32),
        "w_out": lin(ks[5], H, (H, C)),
        "b_out": jnp.zeros((C, 1), jnp.float32),
    }


def ldm_forward(latents, encoder_hidden_states, params, key,
                validation_mode=False):
    """Mirrors LDM.forward: returns (loss, loss_dict)."""
    latents = latents.astype(jnp.float32)
    bsz = latents.shape[0]
    k_t, k_n = jax.random.split(key)

    if validation_mode:
        timesteps = jnp.full((bsz,), NUM_TRAIN_TIMESTEPS // 2, dtype=jnp.int32)
    else:
        timesteps = jax.random.randint(k_t, (bsz,), 0, NUM_TRAIN_TIMESTEPS,
                                       dtype=jnp.int32)
    noise = jax.random.normal(k_n, latents.shape, dtype=jnp.float32)

    # prediction_type == 'epsilon' -> target = noise, handled inside the
    # fused kernel (add_noise -> denoiser -> MSE vs. noise).
    loss = fused_ldm_step(latents, noise, timesteps,
                          encoder_hidden_states, params)
    return loss, {"mse_loss": loss}


if __name__ == "__main__":
    B, C, L = 2, 4, 1024     # batch, latent channels, latent length (L tiled -> grid (2,2))
    T, D, H = 8, 32, 32      # text seq len, text dim, hidden dim (padded to 128 in-kernel)

    root = jax.random.PRNGKey(0)
    k_lat, k_emb, k_par, k_fwd = jax.random.split(root, 4)

    latents = jax.random.normal(k_lat, (B, C, L), dtype=jnp.float32)
    # stands in for text_encoder(prompt)['last_hidden_state']
    encoder_hidden_states = jax.random.normal(k_emb, (B, T, D), dtype=jnp.float32)
    params = init_params(k_par, C, H, D)

    loss, loss_dict = ldm_forward(latents, encoder_hidden_states, params, k_fwd,
                                  validation_mode=False)
    jax.block_until_ready(loss)
    assert loss.shape == () and bool(jnp.isfinite(loss))
    print("KERNEL_OK")
</pallas_src>

<mosaic_0001>
module attributes {stable_mosaic.version = 11 : i64} {
  func.func @ldm_step_kernel(%arg0: i32, %arg1: i32, %arg2: memref<2xf32, #tpu.memory_space<smem>>, %arg3: memref<2xf32, #tpu.memory_space<smem>>, %arg4: memref<1x4x512xf32, #tpu.memory_space<vmem>>, %arg5: memref<1x4x512xf32, #tpu.memory_space<vmem>>, %arg6: memref<1x128x1xf32, #tpu.memory_space<vmem>>, %arg7: memref<1x128x128xbf16, #tpu.memory_space<vmem>>, %arg8: memref<1x128x128xbf16, #tpu.memory_space<vmem>>, %arg9: memref<128x1xf32, #tpu.memory_space<vmem>>, %arg10: memref<128x4xbf16, #tpu.memory_space<vmem>>, %arg11: memref<128x1xf32, #tpu.memory_space<vmem>>, %arg12: memref<128x128xbf16, #tpu.memory_space<vmem>>, %arg13: memref<128x1xf32, #tpu.memory_space<vmem>>, %arg14: memref<4x128xbf16, #tpu.memory_space<vmem>>, %arg15: memref<4x1xf32, #tpu.memory_space<vmem>>, %arg16: memref<1x1x1x1xf32, #tpu.memory_space<vmem>>) attributes {dimension_semantics = [#tpu.dimension_semantics<parallel>, #tpu.dimension_semantics<parallel>], iteration_bounds = array<i64: 2, 2>, scalar_prefetch = 2 : i64, scratch_operands = 0 : i64, tpu.core_type = #tpu.core_type<tc>, window_params = [{transform_indices = @transform_0, window_bounds = array<i64: 1, 4, 512>}, {transform_indices = @transform_1, window_bounds = array<i64: 1, 4, 512>}, {transform_indices = @transform_2, window_bounds = array<i64: 1, 128, 1>}, {transform_indices = @transform_3, window_bounds = array<i64: 1, 128, 128>}, {transform_indices = @transform_4, window_bounds = array<i64: 1, 128, 128>}, {pipeline_mode = #tpu.pipeline_mode<synchronous>, transform_indices = @transform_5, window_bounds = array<i64: 128, 1>}, {pipeline_mode = #tpu.pipeline_mode<synchronous>, transform_indices = @transform_6, window_bounds = array<i64: 128, 4>}, {pipeline_mode = #tpu.pipeline_mode<synchronous>, transform_indices = @transform_7, window_bounds = array<i64: 128, 1>}, {pipeline_mode = #tpu.pipeline_mode<synchronous>, transform_indices = @transform_8, window_bounds = array<i64: 128, 128>}, {pipeline_mode = #tpu.pipeline_mode<synchronous>, transform_indices = @transform_9, window_bounds = array<i64: 128, 1>}, {pipeline_mode = #tpu.pipeline_mode<synchronous>, transform_indices = @transform_10, window_bounds = array<i64: 4, 128>}, {pipeline_mode = #tpu.pipeline_mode<synchronous>, transform_indices = @transform_11, window_bounds = array<i64: 4, 1>}, {transform_indices = @transform_12, window_bounds = array<i64: 1, 1, 1, 1>}]} {
    %0 = arith.index_cast %arg0 : i32 to index
    %1 = memref.load %arg2[%0] : memref<2xf32, #tpu.memory_space<smem>>
    %2 = arith.index_cast %arg0 : i32 to index
    %3 = memref.load %arg3[%2] : memref<2xf32, #tpu.memory_space<smem>>
    %c0 = arith.constant 0 : index
    %c0_0 = arith.constant 0 : index
    %c0_1 = arith.constant 0 : index
    %4 = vector.load %arg4[%c0, %c0_0, %c0_1] : memref<1x4x512xf32, #tpu.memory_space<vmem>>, vector<1x4x512xf32>
    %5 = vector.shape_cast %4 : vector<1x4x512xf32> to vector<4x512xf32>
    %c0_2 = arith.constant 0 : index
    %c0_3 = arith.constant 0 : index
    %c0_4 = arith.constant 0 : index
    %6 = vector.load %arg5[%c0_2, %c0_3, %c0_4] : memref<1x4x512xf32, #tpu.memory_space<vmem>>, vector<1x4x512xf32>
    %7 = vector.shape_cast %6 : vector<1x4x512xf32> to vector<4x512xf32>
    %8 = vector.broadcast %1 : f32 to vector<4x512xf32>
    %9 = arith.mulf %8, %5 : vector<4x512xf32>
    %10 = vector.broadcast %3 : f32 to vector<4x512xf32>
    %11 = arith.mulf %10, %7 : vector<4x512xf32>
    %12 = arith.addf %9, %11 : vector<4x512xf32>
    %13 = arith.truncf %12 : vector<4x512xf32> to vector<4x512xbf16>
    %c0_5 = arith.constant 0 : index
    %c0_6 = arith.constant 0 : index
    %14 = vector.load %arg10[%c0_5, %c0_6] : memref<128x4xbf16, #tpu.memory_space<vmem>>, vector<128x4xbf16>
    %cst = arith.constant dense<0.000000e+00> : vector<128x512xf32>
    %15 = tpu.matmul %14, %13, %cst {dimension_numbers = #tpu.dot_dimension_numbers<[1], [0], [0], [1], [0, 0, 1, 1], [], []>} : vector<128x4xbf16>, vector<4x512xbf16>, vector<128x512xf32> -> vector<128x512xf32>
    %c0_7 = arith.constant 0 : index
    %c0_8 = arith.constant 0 : index
    %16 = vector.load %arg11[%c0_7, %c0_8] : memref<128x1xf32, #tpu.memory_space<vmem>>, vector<128x1xf32>
    %17 = vector.broadcast %16 : vector<128x1xf32> to vector<128x512xf32>
    %18 = arith.addf %15, %17 : vector<128x512xf32>
    %c0_9 = arith.constant 0 : index
    %c0_10 = arith.constant 0 : index
    %c0_11 = arith.constant 0 : index
    %19 = vector.load %arg6[%c0_9, %c0_10, %c0_11] : memref<1x128x1xf32, #tpu.memory_space<vmem>>, vector<1x128x1xf32>
    %20 = vector.shape_cast %19 : vector<1x128x1xf32> to vector<128x1xf32>
    %21 = vector.broadcast %20 : vector<128x1xf32> to vector<128x512xf32>
    %22 = arith.addf %18, %21 : vector<128x512xf32>
    %23 = arith.truncf %22 : vector<128x512xf32> to vector<128x512xbf16>
    %c0_12 = arith.constant 0 : index
    %c0_13 = arith.constant 0 : index
    %c0_14 = arith.constant 0 : index
    %24 = vector.load %arg7[%c0_12, %c0_13, %c0_14] : memref<1x128x128xbf16, #tpu.memory_space<vmem>>, vector<1x128x128xbf16>
    %25 = vector.shape_cast %24 : vector<1x128x128xbf16> to vector<128x128xbf16>
    %cst_15 = arith.constant dense<0.000000e+00> : vector<128x512xf32>
    %26 = tpu.matmul %25, %23, %cst_15 {dimension_numbers = #tpu.dot_dimension_numbers<[1], [0], [0], [1], [0, 0, 1, 1], [], []>} : vector<128x128xbf16>, vector<128x512xbf16>, vector<128x512xf32> -> vector<128x512xf32>
    %c0_16 = arith.constant 0 : index
    %c0_17 = arith.constant 0 : index
    %27 = vector.load %arg9[%c0_16, %c0_17] : memref<128x1xf32, #tpu.memory_space<vmem>>, vector<128x1xf32>
    %28 = vector.broadcast %27 : vector<128x1xf32> to vector<128x512xf32>
    %29 = arith.addf %26, %28 : vector<128x512xf32>
    %cst_18 = arith.constant dense<0xFF800000> : vector<512xf32>
    %30 = vector.multi_reduction <maximumf>, %29, %cst_18 [0] : vector<128x512xf32> to vector<512xf32>
    %31 = vector.shape_cast %30 : vector<512xf32> to vector<1x512xf32>
    %32 = vector.broadcast %31 : vector<1x512xf32> to vector<128x512xf32>
    %33 = arith.subf %29, %32 : vector<128x512xf32>
    %34 = math.exp %33 : vector<128x512xf32>
    %cst_19 = arith.constant dense<0.000000e+00> : vector<512xf32>
    %35 = vector.multi_reduction <add>, %34, %cst_19 [0] : vector<128x512xf32> to vector<512xf32>
    %36 = vector.shape_cast %35 : vector<512xf32> to vector<1x512xf32>
    %37 = tpu.reciprocal %36 {approx = true} : vector<1x512xf32> -> vector<1x512xf32>
    %38 = vector.broadcast %37 : vector<1x512xf32> to vector<128x512xf32>
    %39 = arith.mulf %34, %38 : vector<128x512xf32>
    %40 = arith.truncf %39 : vector<128x512xf32> to vector<128x512xbf16>
    %c0_20 = arith.constant 0 : index
    %c0_21 = arith.constant 0 : index
    %c0_22 = arith.constant 0 : index
    %41 = vector.load %arg8[%c0_20, %c0_21, %c0_22] : memref<1x128x128xbf16, #tpu.memory_space<vmem>>, vector<1x128x128xbf16>
    %42 = vector.shape_cast %41 : vector<1x128x128xbf16> to vector<128x128xbf16>
    %cst_23 = arith.constant dense<0.000000e+00> : vector<128x512xf32>
    %43 = tpu.matmul %42, %40, %cst_23 {dimension_numbers = #tpu.dot_dimension_numbers<[1], [0], [0], [1], [0, 0, 1, 1], [], []>} : vector<128x128xbf16>, vector<128x512xbf16>, vector<128x512xf32> -> vector<128x512xf32>
    %44 = arith.addf %22, %43 : vector<128x512xf32>
    %c0_24 = arith.constant 0 : index
    %c0_25 = arith.constant 0 : index
    %45 = vector.load %arg12[%c0_24, %c0_25] : memref<128x128xbf16, #tpu.memory_space<vmem>>, vector<128x128xbf16>
    %46 = arith.truncf %44 : vector<128x512xf32> to vector<128x512xbf16>
    %cst_26 = arith.constant dense<0.000000e+00> : vector<128x512xf32>
    %47 = tpu.matmul %45, %46, %cst_26 {dimension_numbers = #tpu.dot_dimension_numbers<[1], [0], [0], [1], [0, 0, 1, 1], [], []>} : vector<128x128xbf16>, vector<128x512xbf16>, vector<128x512xf32> -> vector<128x512xf32>
    %c0_27 = arith.constant 0 : index
    %c0_28 = arith.constant 0 : index
    %48 = vector.load %arg13[%c0_27, %c0_28] : memref<128x1xf32, #tpu.memory_space<vmem>>, vector<128x1xf32>
    %49 = vector.broadcast %48 : vector<128x1xf32> to vector<128x512xf32>
    %50 = arith.addf %47, %49 : vector<128x512xf32>
    %51 = arith.negf %50 : vector<128x512xf32>
    %52 = math.exp %51 : vector<128x512xf32>
    %cst_29 = arith.constant 1.000000e+00 : f32
    %53 = vector.broadcast %cst_29 : f32 to vector<128x512xf32>
    %54 = arith.addf %53, %52 : vector<128x512xf32>
    %55 = arith.divf %53, %54 : vector<128x512xf32>
    %56 = arith.mulf %50, %55 : vector<128x512xf32>
    %c0_30 = arith.constant 0 : index
    %c0_31 = arith.constant 0 : index
    %57 = vector.load %arg14[%c0_30, %c0_31] : memref<4x128xbf16, #tpu.memory_space<vmem>>, vector<4x128xbf16>
    %58 = arith.truncf %56 : vector<128x512xf32> to vector<128x512xbf16>
    %cst_32 = arith.constant dense<0.000000e+00> : vector<4x512xf32>
    %59 = tpu.matmul %57, %58, %cst_32 {dimension_numbers = #tpu.dot_dimension_numbers<[1], [0], [0], [1], [0, 0, 1, 1], [], []>} : vector<4x128xbf16>, vector<128x512xbf16>, vector<4x512xf32> -> vector<4x512xf32>
    %c0_33 = arith.constant 0 : index
    %c0_34 = arith.constant 0 : index
    %60 = vector.load %arg15[%c0_33, %c0_34] : memref<4x1xf32, #tpu.memory_space<vmem>>, vector<4x1xf32>
    %61 = vector.broadcast %60 : vector<4x1xf32> to vector<4x512xf32>
    %62 = arith.addf %59, %61 : vector<4x512xf32>
    %63 = arith.subf %62, %7 : vector<4x512xf32>
    %64 = arith.mulf %63, %63 : vector<4x512xf32>
    %65 = vector.shape_cast %64 : vector<4x512xf32> to vector<1x4x512xf32>
    %cst_35 = arith.constant dense<0.000000e+00> : vector<1xf32>
    %66 = vector.multi_reduction <add>, %65, %cst_35 [1, 2] : vector<1x4x512xf32> to vector<1xf32>
    %67 = vector.shape_cast %66 : vector<1xf32> to vector<1x1x1xf32>
    %68 = vector.extract %67[0, 0, 0] : f32 from vector<1x1x1xf32>
    %69 = vector.broadcast %68 : f32 to vector<1x1x1x1xf32>
    %c0_36 = arith.constant 0 : index
    %c0_37 = arith.constant 0 : index
    %c0_38 = arith.constant 0 : index
    %c0_39 = arith.constant 0 : index
    %70 = vector.load %arg16[%c0_36, %c0_37, %c0_38, %c0_39] : memref<1x1x1x1xf32, #tpu.memory_space<vmem>>, vector<1x1x1x1xf32>
    tpu.vector_store %arg16[%c0_36, %c0_37, %c0_38, %c0_39], %69 {strides = array<i32>} : memref<1x1x1x1xf32, #tpu.memory_space<vmem>>, vector<1x1x1x1xf32>,
    return
  }
  func.func @transform_0(%arg0: i32, %arg1: i32, %arg2: memref<2xf32, #tpu.memory_space<smem>>, %arg3: memref<2xf32, #tpu.memory_space<smem>>) -> (i32, i32, i32) {
    %c0_i32 = arith.constant 0 : i32
    %c0_i32_0 = arith.constant 0 : i32
    return %arg0, %c0_i32, %arg1 : i32, i32, i32
  }
  func.func @transform_1(%arg0: i32, %arg1: i32, %arg2: memref<2xf32, #tpu.memory_space<smem>>, %arg3: memref<2xf32, #tpu.memory_space<smem>>) -> (i32, i32, i32) {
    %c0_i32 = arith.constant 0 : i32
    %c0_i32_0 = arith.constant 0 : i32
    return %arg0, %c0_i32, %arg1 : i32, i32, i32
  }
  func.func @transform_2(%arg0: i32, %arg1: i32, %arg2: memref<2xf32, #tpu.memory_space<smem>>, %arg3: memref<2xf32, #tpu.memory_space<smem>>) -> (i32, i32, i32) {
    %c0_i32 = arith.constant 0 : i32
    %c0_i32_0 = arith.constant 0 : i32
    %c0_i32_1 = arith.constant 0 : i32
    return %arg0, %c0_i32, %c0_i32_0 : i32, i32, i32
  }
  func.func @transform_3(%arg0: i32, %arg1: i32, %arg2: memref<2xf32, #tpu.memory_space<smem>>, %arg3: memref<2xf32, #tpu.memory_space<smem>>) -> (i32, i32, i32) {
    %c0_i32 = arith.constant 0 : i32
    %c0_i32_0 = arith.constant 0 : i32
    %c0_i32_1 = arith.constant 0 : i32
    return %arg0, %c0_i32, %c0_i32_0 : i32, i32, i32
  }
  func.func @transform_4(%arg0: i32, %arg1: i32, %arg2: memref<2xf32, #tpu.memory_space<smem>>, %arg3: memref<2xf32, #tpu.memory_space<smem>>) -> (i32, i32, i32) {
    %c0_i32 = arith.constant 0 : i32
    %c0_i32_0 = arith.constant 0 : i32
    %c0_i32_1 = arith.constant 0 : i32
    return %arg0, %c0_i32, %c0_i32_0 : i32, i32, i32
  }
  func.func @transform_5(%arg0: i32, %arg1: i32, %arg2: memref<2xf32, #tpu.memory_space<smem>>, %arg3: memref<2xf32, #tpu.memory_space<smem>>) -> (i32, i32) {
    %c0_i32 = arith.constant 0 : i32
    %c0_i32_0 = arith.constant 0 : i32
    %c0_i32_1 = arith.constant 0 : i32
    return %c0_i32, %c0_i32_0 : i32, i32
  }
  func.func @transform_6(%arg0: i32, %arg1: i32, %arg2: memref<2xf32, #tpu.memory_space<smem>>, %arg3: memref<2xf32, #tpu.memory_space<smem>>) -> (i32, i32) {
    %c0_i32 = arith.constant 0 : i32
    %c0_i32_0 = arith.constant 0 : i32
    %c0_i32_1 = arith.constant 0 : i32
    return %c0_i32, %c0_i32_0 : i32, i32
  }
  func.func @transform_7(%arg0: i32, %arg1: i32, %arg2: memref<2xf32, #tpu.memory_space<smem>>, %arg3: memref<2xf32, #tpu.memory_space<smem>>) -> (i32, i32) {
    %c0_i32 = arith.constant 0 : i32
    %c0_i32_0 = arith.constant 0 : i32
    %c0_i32_1 = arith.constant 0 : i32
    return %c0_i32, %c0_i32_0 : i32, i32
  }
  func.func @transform_8(%arg0: i32, %arg1: i32, %arg2: memref<2xf32, #tpu.memory_space<smem>>, %arg3: memref<2xf32, #tpu.memory_space<smem>>) -> (i32, i32) {
    %c0_i32 = arith.constant 0 : i32
    %c0_i32_0 = arith.constant 0 : i32
    %c0_i32_1 = arith.constant 0 : i32
    return %c0_i32, %c0_i32_0 : i32, i32
  }
  func.func @transform_9(%arg0: i32, %arg1: i32, %arg2: memref<2xf32, #tpu.memory_space<smem>>, %arg3: memref<2xf32, #tpu.memory_space<smem>>) -> (i32, i32) {
    %c0_i32 = arith.constant 0 : i32
    %c0_i32_0 = arith.constant 0 : i32
    %c0_i32_1 = arith.constant 0 : i32
    return %c0_i32, %c0_i32_0 : i32, i32
  }
  func.func @transform_10(%arg0: i32, %arg1: i32, %arg2: memref<2xf32, #tpu.memory_space<smem>>, %arg3: memref<2xf32, #tpu.memory_space<smem>>) -> (i32, i32) {
    %c0_i32 = arith.constant 0 : i32
    %c0_i32_0 = arith.constant 0 : i32
    %c0_i32_1 = arith.constant 0 : i32
    return %c0_i32, %c0_i32_0 : i32, i32
  }
  func.func @transform_11(%arg0: i32, %arg1: i32, %arg2: memref<2xf32, #tpu.memory_space<smem>>, %arg3: memref<2xf32, #tpu.memory_space<smem>>) -> (i32, i32) {
    %c0_i32 = arith.constant 0 : i32
    %c0_i32_0 = arith.constant 0 : i32
    %c0_i32_1 = arith.constant 0 : i32
    return %c0_i32, %c0_i32_0 : i32, i32
  }
  func.func @transform_12(%arg0: i32, %arg1: i32, %arg2: memref<2xf32, #tpu.memory_space<smem>>, %arg3: memref<2xf32, #tpu.memory_space<smem>>) -> (i32, i32, i32, i32) {
    %c0_i32 = arith.constant 0 : i32
    %c0_i32_0 = arith.constant 0 : i32
    %c0_i32_1 = arith.constant 0 : i32
    return %arg0, %arg1, %c0_i32, %c0_i32_0 : i32, i32, i32, i32
  }
}

</mosaic_0001>

<bundles_post_ra>
// kernel: tpu_custom_call.1
= control target key start
LH: loop header
LB: loop body
LE: loop exit
PB: predicated region body
PF: predicated region fallthrough
CT: control target
= control target key end

     0   :  { %s6360_s0 = inlined_call_operand.vmem [shape: f32[2], index: 0, kind: input, shape index: {}]   ;;  %s6361_s2 = inlined_call_operand.vmem [shape: f32[2,4,1024], index: 2, kind: input, shape index: {}]   ;;  %s6362_s3 = inlined_call_operand.vmem [shape: f32[2,4,1024], index: 3, kind: input, shape index: {}]   ;;  %s6363_s4 = inlined_call_operand.vmem [shape: f32[2,128,1], index: 4, kind: input, shape index: {}]   ;;  %s6364_s5 = inlined_call_operand.vmem [shape: bf16[2,128,128], index: 5, kind: input, shape index: {}]   ;;  %s6365_s6 = inlined_call_operand.vmem [shape: bf16[2,128,128], index: 6, kind: input, shape index: {}]   ;;  %s6366_s7 = inlined_call_operand.vmem [shape: f32[128,1], index: 7, kind: input, shape index: {}]   ;;  %s6367_s8 = inlined_call_operand.vmem [shape: bf16[128,4], index: 8, kind: input, shape index: {}]   ;;  %s6368_s9 = inlined_call_operand.vmem [shape: f32[128,1], index: 9, kind: input, shape index: {}]   ;;  %s6369_s10 = inlined_call_operand.vmem [shape: bf16[128,128], index: 10, kind: input, shape index: {}]   ;;  %s6370_s11 = inlined_call_operand.vmem [shape: f32[128,1], index: 11, kind: input, shape index: {}]   ;;  %s6371_s12 = inlined_call_operand.vmem [shape: bf16[4,128], index: 12, kind: input, shape index: {}]   ;;  %s6372_s13 = inlined_call_operand.vmem [shape: f32[4,1], index: 13, kind: input, shape index: {}]   ;;  %s6373_s14 = inlined_call_operand.vmem [shape: f32[2,2,1,1], index: 14, kind: output, shape index: {}]   ;;  %s6374_s1 = inlined_call_operand.vmem [shape: f32[2], index: 1, kind: input, shape index: {}]  }
   0x1   :  { %s19_s15 = sshll.u32 %s6360_s0, 4  ;;  %s23_s18 = sshll.u32 %s6374_s1, 4  ;;  %s20_s15 = int_to_ptr.vmem [resolvable:$true] %s19_s15  ;;  %s24_s18 = int_to_ptr.vmem [resolvable:$true] %s23_s18 }
   0x2   :  { %s4156_s19 = scalar_lea.vmem %s20_s15, 16  ;;  %p4161_p1 = scmp.lt.s32.totalorder %s20_s15, %s20_s15 }
   0x3   :  { %p4157_p0 = scmp.ne.s32.totalorder %s20_s15, %s4156_s19  ;;  %p4162_p2 = scmp.lt.s32.totalorder %s4156_s19, %s4156_s19 }
   0x5   :  { %p4163_p3 = por %p4162_p2, %p4161_p1 }
   0x7   :  { %p4164_p4 = pnand %p4163_p3, %p4157_p0 }
   0x9   :  { %4167 = shalt.err (!%p4164_p4)  }
   0xa   :  { %s4222_s20 = smov [#allocation3]   ;;  %s4168_s21 = scalar_lea.vmem %s24_s18, 16 }
   0xb   :  { %22 = dma.vmem_to_smem %s20_s15, 16, %s4222_s20, [#allocation2] }
   0xc   :  { %p4169_p5 = scmp.ne.s32.totalorder %s24_s18, %s4168_s21  ;;  %p4173_p6 = scmp.lt.s32.totalorder %s24_s18, %s24_s18 }
   0xd   :  { %p4174_p7 = scmp.lt.s32.totalorder %s4168_s21, %s4168_s21 }
   0xf   :  { %p4175_p8 = por %p4174_p7, %p4173_p6 }
  0x11   :  { %p4176_p9 = pnand %p4175_p8, %p4169_p5 }
  0x13   :  { %4179 = shalt.err (!%p4176_p9)  }
  0x14   :  { %s4223_s0 = smov [#allocation4]  }
  0x15   :  { %26 = dma.vmem_to_smem %s24_s18, 16, %s4223_s0, [#allocation2] }
  0x16   :  { %4200 = dma.done.wait [#allocation2], 32 }
  0x17   :  { %4201 = vsyncadd [#allocation2], 4294967264 }
  0x18   :  { %28 = sfence }
  0x19   :  { %s4306_s1 = smov 0   ;;  %s4308_s22 = smov 0  }
  0x1a   :  { %s4310_s23 = smov 0   ;;  %s4312_s24 = smov 0  }
  0x1b   :  { %s4314_s25 = smov 0  }
  0x1c LB: > { %6511 = sst [smem:[#allocation6_spill]] %s4212_s23  ;;  %s43_s26 = sadd.s32 1, %s4212_s23  ;;  %s4220_s25 = sphi %s4314_s25, %s34_s25   ;;  %s4216_s24 = sphi %s4312_s24, %s6787_s24   ;;  %s4212_s23 = sphi %s4310_s23, %s6786_s23   ;;  %s4208_s22 = sphi %s4308_s22, %s6785_s22   ;;  %s4204_s1 = sphi %s4306_s1, %s6784_s1  }
  0x1d   : > { %6512 = sst [smem:[#allocation7_spill]] %s4216_s24  ;;  %s46_s27 = sadd.s32 1, %s4216_s24 }
  0x1e   : > { %6513 = sst [smem:[#allocation8_spill]] %s4220_s25  ;;  %p44_p10 = scmp.ge.s32.totalorder %s43_s26, 2 }
  0x1f   : > { %p3548_p11 = scmp.ge.s32.totalorder %s4220_s25, 1  ;;  %p442_p12 = scmp.lt.s32.totalorder %s4220_s25, 5 }
  0x20   : > { %s6789_s26 = smov (%p44_p10, %s43_s26), 0  ;;  %s6791_s27 = smov (!%p44_p10, %s46_s27), %s4216_s24 }
  0x21   : > { %6514 = sst [smem:[#allocation9_spill]] %s6789_s26  ;;  %p443_p13 = pnand %p3548_p11, %p442_p12 }
  0x22   : > { %p48_p0 = scmp.ge.s32.totalorder %s6791_s27, 2 }
  0x23   : > { %446 = sbr.rel (%p443_p13) target bundleno = 1856 (0x740), region = 68 }
  0x24   : > { %s6793_s27 = smov (%p48_p0, %s6791_s27), 0 }
  0x25   : > { %6515 = sst [smem:[#allocation10_spill]] %s6793_s27 }
  0x2a   : > { %v597_v0 = vld [vmem:[%s6368_s9] sm:$0xff]  ;;  %p515_p1 = scmp.lt.s32.totalorder %s4208_s22, 1  ;;  %s3549_s30 = sshll.u32 %s4204_s1, 2  ;;  %v6378_v1 = vmov 0   ;;  %v598_v2 = vld [vmem:[%s6368_s9 + $0x8] sm:$0xff]  ;;  %v599_v4 = vld [vmem:[%s6368_s9 + $0x10] sm:$0xff] }
  0x2b   : > { %3726 = vset.pattern.permute.xlu0 %v6378_v1  ;;  %3727 = vset.pattern.permute.xlu1 %v6378_v1  ;;  %p517_p2 = scmp.lt.s32.totalorder %s3549_s30, 7  ;;  %s557_s15 = sld [smem:[#allocation3 + %s4208_s22]]  ;;  %v600_v14 = vld [vmem:[%s6368_s9 + $0x18] sm:$0xff]  ;;  %v601_v20 = vld [vmem:[%s6368_s9 + $0x20] sm:$0xff]  ;;  %vm758_vm0 = vcmask 1041408   ;;  %v602_v31 = vld [vmem:[%s6368_s9 + $0x28] sm:$0xff] }
  0x2c   : > { %615 = vperm.xlu0 %3726, %v597_v0   ;;  %s4349_s16 = scalar_select %p515_p1, %s4208_s22, 1  ;;  %803 = vmatprep.mubr.bf16.mxu0 %v6378_v1  ;;  %v3728_v32 = vld [vmem:[%s6367_s8] sm:$0xff]   ;;  %vm733_vm1 = vcmask 31744   ;;  %v603_v33 = vld [vmem:[%s6368_s9 + $0x30] sm:$0xff]  ;;  %v604_v36 = vld [vmem:[%s6368_s9 + $0x38] sm:$0xff]  ;;  %vm3390_vm2 = vcmask 1043456  }
  0x2d   : > { %s6795_s30 = smov (!%p517_p2, %s3549_s30), 7  ;;  %916 = vmatprep.mubr.bf16.mxu1 %v6378_v1  ;;  %s558_s26 = sld [smem:[#allocation4 + %s4208_s22]]  ;;  %v3729_v37 = vld [vmem:[%s6367_s8 + $0x8] sm:$0xff]   ;;  %v605_v38 = vld [vmem:[%s6368_s9 + $0x40] sm:$0xff]  ;;  %v3730_v42 = vld [vmem:[%s6367_s8 + $0x10] sm:$0xff]   ;;  %vm3408_vm3 = vcmask 0  }
  0x2e   : > { %s3678_s19 = sshll.u32 %s4349_s16, 7  ;;  %s3550_s20 = sshll.u32 %s4349_s16, 3  ;;  %v606_v41 = vld [vmem:[%s6368_s9 + $0x48] sm:$0xff]  ;;  %v607_v43 = vld [vmem:[%s6368_s9 + $0x50] sm:$0xff]  ;;  %v608_v46 = vld [vmem:[%s6368_s9 + $0x58] sm:$0xff] }
  0x2f   : > { %s4361_s28 = scalar_lea.vmem %s6363_s4, %s3678_s19  ;;  %s520_s29 = sadd.s32 %s3550_s20, %s6795_s30  ;;  %v3731_v47 = vld [vmem:[%s6367_s8 + $0x18] sm:$0xff]   ;;  %v609_v48 = vld [vmem:[%s6368_s9 + $0x60] sm:$0xff]  ;;  %v610_v51 = vld [vmem:[%s6368_s9 + $0x68] sm:$0xff] }
  0x30   : > { %620 = vperm.xlu0 %3726, %v598_v2   ;;  %v997_v3 = vld [vmem:[%s4361_s28] sm:$0xff]  ;;  %s3551_s27 = sshll.u32 %s520_s29, 2  ;;  %v998_v5 = vld [vmem:[%s4361_s28 + $0x8] sm:$0xff]  ;;  %v999_v11 = vld [vmem:[%s4361_s28 + $0x10] sm:$0xff]  ;;  %p551_p3 = scmp.lt.s32.totalorder %s4204_s1, 1 }
  0x31   : > { %1015 = vperm.xlu1 %3727, %v997_v3   ;;  %s522_s25 = scalar_lea.vmem %s6361_s2, %s3551_s27  ;;  %s4374_s0 = scalar_lea.vmem %s6362_s3, %s3551_s27  ;;  %v563_v7 = vstv %s557_s15  ;;  %v1000_v21 = vld [vmem:[%s4361_s28 + $0x18] sm:$0xff]  ;;  %v1001_v30 = vld [vmem:[%s4361_s28 + $0x20] sm:$0xff]  ;;  %v1002_v34 = vld [vmem:[%s4361_s28 + $0x28] sm:$0xff] }
  0x32   : > { %v559_v6 = vld [vmem:[%s522_s25] sm:$0xff]  ;;  %v560_v8 = vld [vmem:[%s522_s25 + $0x8] sm:$0xff]  ;;  %v1003_v35 = vld [vmem:[%s4361_s28 + $0x30] sm:$0xff]  ;;  %s3679_s27 = sshll.u32 %s4349_s16, 6  ;;  %s6797_s1 = smov (!%p551_p3, %s4204_s1), 1 }
  0x33   : > { %v561_v9 = vld [vmem:[%s4374_s0] sm:$0xff]  ;;  %v562_v10 = vld [vmem:[%s4374_s0 + $0x8] sm:$0xff]  ;;  %v564_v12 = vmul.f32 %v563_v7, %v559_v6  ;;  %v565_v13 = vmul.f32 %v563_v7, %v560_v8  ;;  %v566_v15 = vstv %s558_s26  ;;  %v1004_v39 = vld [vmem:[%s4361_s28 + $0x38] sm:$0xff]  ;;  %s4593_s20 = scalar_lea.vmem %s6364_s5, %s3679_s27  ;;  %s5232_s18 = scalar_lea.vmem %s6365_s6, %s3679_s27 }
  0x34   : > { %625 = vperm.xlu0 %3726, %v599_v4   ;;  %v567_v16 = vmul.f32 %v566_v15, %v561_v9  ;;  %v568_v17 = vmul.f32 %v566_v15, %v562_v10  ;;  %v1005_v40 = vld [vmem:[%s4361_s28 + $0x40] sm:$0xff]  ;;  %v1006_v44 = vld [vmem:[%s4361_s28 + $0x48] sm:$0xff]  ;;  %v1007_v45 = vld [vmem:[%s4361_s28 + $0x50] sm:$0xff] }
  0x35   : > { %1020 = vperm.xlu1 %3727, %v998_v5   ;;  %v1008_v49 = vld [vmem:[%s4361_s28 + $0x58] sm:$0xff]  ;;  %v1009_v50 = vld [vmem:[%s4361_s28 + $0x60] sm:$0xff]  ;;  %v611_v53 = vld [vmem:[%s6368_s9 + $0x70] sm:$0xff] }
  0x36   : > { %v569_v18 = vadd.f32 %v567_v16, %v564_v12  ;;  %v570_v19 = vadd.f32 %v568_v17, %v565_v13  ;;  %v3732_v52 = vld [vmem:[%s6367_s8 + $0x20] sm:$0xff]   ;;  %v1010_v54 = vld [vmem:[%s4361_s28 + $0x68] sm:$0xff]  ;;  %v1011_v55 = vld [vmem:[%s4361_s28 + $0x70] sm:$0xff] }
  0x37   : > { %v612_v56 = vld [vmem:[%s6368_s9 + $0x78] sm:$0xff]  ;;  %v3733_v57 = vld [vmem:[%s6367_s8 + $0x28] sm:$0xff]   ;;  %v1205_v58 = vld [vmem:[%s6366_s7] sm:$0xff] }
  0x38   : > { %1025 = vperm.xlu0 %3726, %v999_v11   ;;  %v573_v22 = vcombine.high %v569_v18, %v569_v18  ;;  %v574_v23 = vcombine.high %v570_v19, %v570_v19  ;;  %v577_v24 = vpack.c.bf16 %v569_v18, %v569_v18  ;;  %v579_v25 = vpack.c.bf16 %v570_v19, %v570_v19  ;;  %v1012_v59 = vld [vmem:[%s4361_s28 + $0x78] sm:$0xff]  ;;  %v1207_v60 = vld [vmem:[%s6366_s7 + $0x10] sm:$0xff]  ;;  %v1206_v61 = vld [vmem:[%s6366_s7 + $0x8] sm:$0xff] }
  0x39   : > { %630 = vperm.xlu1 %3727, %v600_v14   ;;  %v3734_v62 = vld [vmem:[%s6367_s8 + $0x30] sm:$0xff]   ;;  %v1209_v63 = vld [vmem:[%s6366_s7 + $0x20] sm:$0xff]  ;;  %v1208_v0 = vld [vmem:[%s6366_s7 + $0x18] sm:$0xff] }
  0x3a   : > { %v578_v26 = vpack.c.bf16 %v573_v22, %v573_v22  ;;  %v580_v27 = vpack.c.bf16 %v574_v23, %v574_v23  ;;  %v760_v28 = vsel %vm758_vm0, %v577_v24, 0  ;;  %v766_v29 = vsel %vm758_vm0, %v579_v25, 0  ;;  %v1211_v2 = vld [vmem:[%s6366_s7 + $0x30] sm:$0xff]  ;;  %v1210_v3 = vld [vmem:[%s6366_s7 + $0x28] sm:$0xff]  ;;  %v3735_v4 = vld [vmem:[%s6367_s8 + $0x38] sm:$0xff]  }
  0x3b   : > { %v1213_v5 = vld [vmem:[%s6366_s7 + $0x40] sm:$0xff]  ;;  %v1212_v6 = vld [vmem:[%s6366_s7 + $0x38] sm:$0xff]  ;;  %v1215_v7 = vld [vmem:[%s6366_s7 + $0x50] sm:$0xff] }
  0x3c   : > { %635 = vperm.xlu0 %3726, %v601_v20   ;;  %3570 = vmatprep.subr.msk.bf16.mxu0 %vm758_vm0, %v578_v26  ;;  %v1214_v8 = vld [vmem:[%s6366_s7 + $0x48] sm:$0xff]  ;;  %v1217_v9 = vld [vmem:[%s6366_s7 + $0x60] sm:$0xff]  ;;  %v1216_v10 = vld [vmem:[%s6366_s7 + $0x58] sm:$0xff] }
  0x3d   : > { %1030 = vperm.xlu1 %3727, %v1000_v21   ;;  %3579 = vmatprep.subr.msk.bf16.mxu1 %vm758_vm0, %v580_v27  ;;  %v1219_v11 = vld [vmem:[%s6366_s7 + $0x70] sm:$0xff]  ;;  %v1218_v12 = vld [vmem:[%s6366_s7 + $0x68] sm:$0xff]  ;;  %v2437_v13 = vld [vmem:[%s6370_s11] sm:$0xff] }
  0x3e   : > { %772 = vmatpush1.bf16.msra.mxu0 %v760_v28  ;;  %885 = vmatpush1.bf16.msra.mxu1 %v766_v29  ;;  %v1220_v14 = vld [vmem:[%s6366_s7 + $0x78] sm:$0xff]  ;;  %v2439_v15 = vld [vmem:[%s6370_s11 + $0x10] sm:$0xff]  ;;  %v2438_v16 = vld [vmem:[%s6370_s11 + $0x8] sm:$0xff] }
  0x3f   : > { %v2441_v17 = vld [vmem:[%s6370_s11 + $0x20] sm:$0xff]  ;;  %v2440_v18 = vld [vmem:[%s6370_s11 + $0x18] sm:$0xff]  ;;  %v2443_v19 = vld [vmem:[%s6370_s11 + $0x30] sm:$0xff] }
  0x40   : > { %1035 = vperm.xlu0 %3726, %v1001_v30   ;;  %v2442_v20 = vld [vmem:[%s6370_s11 + $0x28] sm:$0xff]  ;;  %v2445_v21 = vld [vmem:[%s6370_s11 + $0x40] sm:$0xff]  ;;  %v2444_v22 = vld [vmem:[%s6370_s11 + $0x38] sm:$0xff] }
  0x41   : > { %640 = vperm.xlu1 %3727, %v602_v31   ;;  %3571 = vmatmul.mubr.msk.bf16.vlgmr.msra.gmra.mrb[0].mxu0 %vm733_vm1, %v3728_v32  ;;  %v2447_v23 = vld [vmem:[%s6370_s11 + $0x50] sm:$0xff]  ;;  %v2446_v24 = vld [vmem:[%s6370_s11 + $0x48] sm:$0xff]  ;;  %v2449_v25 = vld [vmem:[%s6370_s11 + $0x60] sm:$0xff] }
  0x42   : > { %3580 = vmatmul.mubr.msk.bf16.vlgmr.msra.gmra.mrb[0].mxu1 %vm733_vm1, %v3728_v32  ;;  %813 = vmatprep.mubr.bf16.mxu0 %v6378_v1  ;;  %v2448_v26 = vld [vmem:[%s6370_s11 + $0x58] sm:$0xff]  ;;  %v2451_v27 = vld [vmem:[%s6370_s11 + $0x70] sm:$0xff]  ;;  %v2450_v28 = vld [vmem:[%s6370_s11 + $0x68] sm:$0xff] }
  0x43   : > { %926 = vmatprep.mubr.bf16.mxu1 %v6378_v1  ;;  %v3288_v29 = vld [vmem:[%s6372_s13] sm:$0xf]  ;;  %v2452_v30 = vld [vmem:[%s6370_s11 + $0x78] sm:$0xff] }
  0x44   : > { %645 = vperm.xlu0 %3726, %v603_v33  }
  0x45   : > { %1040 = vperm.xlu1 %3727, %v1002_v34  }
  0x48   : > { %1045 = vperm.xlu0 %3726, %v1003_v35  }
  0x49   : > { %650 = vperm.xlu1 %3727, %v604_v36   ;;  %3572 = vmatmul.mubr.msk.bf16.gmra.mrb[4].mxu0 %vm733_vm1, %v3729_v37 }
  0x4a   : > { %3581 = vmatmul.mubr.msk.bf16.gmra.mrb[4].mxu1 %vm733_vm1, %v3729_v37  ;;  %823 = vmatprep.mubr.bf16.mxu0 %v6378_v1 }
  0x4b   : > { %936 = vmatprep.mubr.bf16.mxu1 %v6378_v1 }
  0x4c   : > { %655 = vperm.xlu0 %3726, %v605_v38  }
  0x4d   : > { %1050 = vperm.xlu1 %3727, %v1004_v39  }
  0x50   : > { %1055 = vperm.xlu0 %3726, %v1005_v40  }
  0x51   : > { %660 = vperm.xlu1 %3727, %v606_v41   ;;  %3573 = vmatmul.mubr.msk.bf16.gmra.mrb[8].mxu0 %vm733_vm1, %v3730_v42 }
  0x52   : > { %3582 = vmatmul.mubr.msk.bf16.gmra.mrb[8].mxu1 %vm733_vm1, %v3730_v42  ;;  %833 = vmatprep.mubr.bf16.mxu0 %v6378_v1 }
  0x53   : > { %946 = vmatprep.mubr.bf16.mxu1 %v6378_v1 }
  0x54   : > { %665 = vperm.xlu0 %3726, %v607_v43  }
  0x55   : > { %1060 = vperm.xlu1 %3727, %v1006_v44  }
  0x58   : > { %1065 = vperm.xlu0 %3726, %v1007_v45  }
  0x59   : > { %670 = vperm.xlu1 %3727, %v608_v46   ;;  %3574 = vmatmul.mubr.msk.bf16.gmra.mrb[12].mxu0 %vm733_vm1, %v3731_v47 }
  0x5a   : > { %3583 = vmatmul.mubr.msk.bf16.gmra.mrb[12].mxu1 %vm733_vm1, %v3731_v47  ;;  %843 = vmatprep.mubr.bf16.mxu0 %v6378_v1 }
  0x5b   : > { %956 = vmatprep.mubr.bf16.mxu1 %v6378_v1 }
  0x5c   : > { %675 = vperm.xlu0 %3726, %v609_v48  }
  0x5d   : > { %1070 = vperm.xlu1 %3727, %v1008_v49  }
  0x60   : > { %1075 = vperm.xlu0 %3726, %v1009_v50  }
  0x61   : > { %680 = vperm.xlu1 %3727, %v610_v51   ;;  %3575 = vmatmul.mubr.msk.bf16.gmra.mrb[16].mxu0 %vm733_vm1, %v3732_v52 }
  0x62   : > { %3584 = vmatmul.mubr.msk.bf16.gmra.mrb[16].mxu1 %vm733_vm1, %v3732_v52  ;;  %853 = vmatprep.mubr.bf16.mxu0 %v6378_v1 }
  0x63   : > { %966 = vmatprep.mubr.bf16.mxu1 %v6378_v1 }
  0x64   : > { %685 = vperm.xlu0 %3726, %v611_v53  }
  0x65   : > { %1080 = vperm.xlu1 %3727, %v1010_v54  }
  0x68   : > { %1085 = vperm.xlu0 %3726, %v1011_v55  }
  0x69   : > { %690 = vperm.xlu1 %3727, %v612_v56   ;;  %3576 = vmatmul.mubr.msk.bf16.gmra.mrb[20].mxu0 %vm733_vm1, %v3733_v57 }
  0x6a   : > { %3585 = vmatmul.mubr.msk.bf16.gmra.mrb[20].mxu1 %vm733_vm1, %v3733_v57  ;;  %863 = vmatprep.mubr.bf16.mxu0 %v6378_v1 }
  0x6b   : > { %976 = vmatprep.mubr.bf16.mxu1 %v6378_v1 }
  0x6c   : > { %1223 = vperm.xlu0 %3726, %v1205_v58  }
  0x6d   : > { %1090 = vperm.xlu1 %3727, %v1012_v59  }
  0x70   : > { %1233 = vperm.xlu0 %3726, %v1207_v60  }
  0x71   : > { %1228 = vperm.xlu1 %3727, %v1206_v61   ;;  %3577 = vmatmul.mubr.msk.bf16.gmra.mrb[24].mxu0 %vm733_vm1, %v3734_v62 }
  0x72   : > { %3586 = vmatmul.mubr.msk.bf16.gmra.mrb[24].mxu1 %vm733_vm1, %v3734_v62  ;;  %873 = vmatprep.mubr.bf16.mxu0 %v6378_v1 }
  0x73   : > { %986 = vmatprep.mubr.bf16.mxu1 %v6378_v1 }
  0x74   : > { %1243 = vperm.xlu0 %3726, %v1209_v63  }
  0x75   : > { %1238 = vperm.xlu1 %3727, %v1208_v0  }
  0x78   : > { %1253 = vperm.xlu0 %3726, %v1211_v2  }
  0x79   : > { %1248 = vperm.xlu1 %3727, %v1210_v3   ;;  %3578 = vmatmul.mubr.msk.bf16.gmra.mrb[28].mxu0 %vm733_vm1, %v3735_v4 }
  0x7a   : > { %3587 = vmatmul.mubr.msk.bf16.gmra.mrb[28].mxu1 %vm733_vm1, %v3735_v4  ;;  %1381 = vmatprep.mubr.bf16.mxu0 %v6378_v1 }
  0x7b   : > { %1494 = vmatprep.mubr.bf16.mxu1 %v6378_v1 }
  0x7c   : > { %1263 = vperm.xlu0 %3726, %v1213_v5  }
  0x7d   : > { %1258 = vperm.xlu1 %3727, %v1212_v6  }
  0x80   : > { %1273 = vperm.xlu0 %3726, %v1215_v7  }
  0x81   : > { %1268 = vperm.xlu1 %3727, %v1214_v8  }
  0x84   : > { %1283 = vperm.xlu0 %3726, %v1217_v9  }
  0x85   : > { %1278 = vperm.xlu1 %3727, %v1216_v10  }
  0x88   : > { %1293 = vperm.xlu0 %3726, %v1219_v11  }
  0x89   : > { %1288 = vperm.xlu1 %3727, %v1218_v12  }
  0x8c   : > { %2455 = vperm.xlu0 %3726, %v2437_v13  }
  0x8d   : > { %1298 = vperm.xlu1 %3727, %v1220_v14  }
  0x90   : > { %2465 = vperm.xlu0 %3726, %v2439_v15  }
  0x91   : > { %2460 = vperm.xlu1 %3727, %v2438_v16  }
  0x94   : > { %2475 = vperm.xlu0 %3726, %v2441_v17  }
  0x95   : > { %2470 = vperm.xlu1 %3727, %v2440_v18  }
  0x98   : > { %2485 = vperm.xlu0 %3726, %v2443_v19  }
  0x99   : > { %2480 = vperm.xlu1 %3727, %v2442_v20  }
  0x9c   : > { %2495 = vperm.xlu0 %3726, %v2445_v21  }
  0x9d   : > { %2490 = vperm.xlu1 %3727, %v2444_v22  }
  0xa0   : > { %2505 = vperm.xlu0 %3726, %v2447_v23  }
  0xa1   : > { %2500 = vperm.xlu1 %3727, %v2446_v24  }
  0xa4   : > { %2515 = vperm.xlu0 %3726, %v2449_v25  }
  0xa5   : > { %2510 = vperm.xlu1 %3727, %v2448_v26  }
  0xa8   : > { %2525 = vperm.xlu0 %3726, %v2451_v27  }
  0xa9   : > { %2520 = vperm.xlu1 %3727, %v2450_v28  }
  0xab   : > { %v616_v31 = vpop.permute.xlu0 %615 }
  0xac   : > { %3291 = vperm.xlu0 %3726, %v3288_v29  }
  0xad   : > { %2530 = vperm.xlu1 %3727, %v2452_v30  }
  0xaf   : > { %v621_v33 = vpop.permute.xlu0 %620 }
  0xb0   : > { %v1016_v32 = vpop.permute.xlu1 %1015 }
  0xb3   : > { %v626_v35 = vpop.permute.xlu0 %625 }
  0xb4   : > { %v1021_v34 = vpop.permute.xlu1 %1020 }
  0xb7   : > { %v4595_v37 = vpop.permute.xlu0 %1025 }
  0xb8   : > { %v631_v36 = vpop.permute.xlu1 %630 }
  0xbb   : > { %v4599_v39 = vpop.permute.xlu0 %635 }
  0xbc   : > { %v4597_v38 = vpop.permute.xlu1 %1030 }
  0xbf   : > { %v4603_v41 = vpop.permute.xlu0 %1035 }
  0xc0   : > { %v4601_v40 = vpop.permute.xlu1 %640 }
  0xc3   : > { %v4607_v43 = vpop.permute.xlu0 %645 }
  0xc4   : > { %v4605_v42 = vpop.permute.xlu1 %1040 }
  0xc7   : > { %v4611_v45 = vpop.permute.xlu0 %1045 }
  0xc8   : > { %v4609_v44 = vpop.permute.xlu1 %650 }
  0xcb   : > { %v4635_v12 = vpop.permute.xlu0 %655 }
  0xcc   : > { %v4613_v60 = vpop.permute.xlu1 %1050 }
  0xd0   : > { %v4641_v16 = vpop.permute.xlu1 %660 }
 0x114   : > { %v805_v46 = vpop.f32.mrb[0].mxu0 }
 0x115   : > { %v918_v47 = vpop.f32.mrb[0].mxu1  ;;  %v807_v48 = vpop.f32.mrb[1].mxu0  ;;  %v806_v54 = vadd.f32 %v805_v46, %v616_v31 }
 0x116   : > { %v920_v49 = vpop.f32.mrb[1].mxu1  ;;  %v808_v50 = vadd.f32 %v807_v48, %v616_v31  ;;  %v809_v52 = vpop.f32.mrb[2].mxu0  ;;  %v919_v55 = vadd.f32 %v918_v47, %v616_v31 }
 0x117   : > { %v921_v51 = vadd.f32 %v920_v49, %v616_v31  ;;  %v922_v53 = vpop.f32.mrb[2].mxu1  ;;  %v810_v56 = vadd.f32 %v809_v52, %v621_v33  ;;  %v811_v58 = vpop.f32.mrb[3].mxu0  ;;  %v4627_v6 = vadd.f32 %v1016_v32, %v806_v54 }
 0x118   : > { %v923_v57 = vadd.f32 %v922_v53, %v621_v33  ;;  %v924_v59 = vpop.f32.mrb[3].mxu1  ;;  %v812_v61 = vadd.f32 %v811_v58, %v621_v33  ;;  %v4619_v2 = vadd.f32 %v1016_v32, %v808_v50  ;;  %v4629_v7 = vadd.f32 %v1016_v32, %v919_v55  ;;  %v4667_v49 = vpop.permute.xlu0 %1055 }
 0x119   : > { %v925_v62 = vadd.f32 %v924_v59, %v621_v33  ;;  %v4615_v63 = vadd.f32 %v1021_v34, %v810_v56  ;;  %v4621_v3 = vadd.f32 %v1016_v32, %v921_v51  ;;  %6522 = vst [vmem:[#allocation17_spill] sm:$0xff] %v4627_v6  ;;  %v4673_v53 = vpop.permute.xlu1 %1060 }
 0x11a   : > { %v4617_v0 = vadd.f32 %v1021_v34, %v923_v57  ;;  %6518 = vst [vmem:[#allocation13_spill] sm:$0xff] %v4619_v2  ;;  %v4623_v4 = vadd.f32 %v1021_v34, %v812_v61  ;;  %6523 = vst [vmem:[#allocation18_spill] sm:$0xff] %v4629_v7 }
 0x11b   : > { %6516 = vst [vmem:[#allocation11_spill] sm:$0xff] %v4615_v63  ;;  %6519 = vst [vmem:[#allocation14_spill] sm:$0xff] %v4621_v3  ;;  %v4625_v5 = vadd.f32 %v1021_v34, %v925_v62  ;;  %v1157_v13 = vpack.c.bf16 %v4615_v63, %v4627_v6 }
 0x11c   : > { %6517 = vst [vmem:[#allocation12_spill] sm:$0xff] %v4617_v0  ;;  %6520 = vst [vmem:[#allocation15_spill] sm:$0xff] %v4623_v4  ;;  %v815_v8 = vpop.f32.mrb[4].mxu0  ;;  %v1158_v10 = vpack.c.bf16 %v4623_v4, %v4619_v2  ;;  %v1159_v14 = vpack.c.bf16 %v4617_v0, %v4629_v7 }
 0x11d   : > { %6521 = vst [vmem:[#allocation16_spill] sm:$0xff] %v4625_v5  ;;  %v928_v9 = vpop.f32.mrb[4].mxu1  ;;  %v1160_v11 = vpack.c.bf16 %v4625_v5, %v4621_v3  ;;  %v817_v15 = vpop.f32.mrb[5].mxu0  ;;  %v816_v22 = vadd.f32 %v815_v8, %v626_v35 }
 0x11e   : > { %v930_v17 = vpop.f32.mrb[5].mxu1  ;;  %1349 = vmatprep.subr.bf16.mxu0 %v1158_v10  ;;  %v818_v18 = vadd.f32 %v817_v15, %v626_v35  ;;  %v819_v20 = vpop.f32.mrb[6].mxu0  ;;  %v929_v23 = vadd.f32 %v928_v9, %v626_v35 }
 0x11f   : > { %1462 = vmatprep.subr.bf16.mxu1 %v1160_v11  ;;  %v931_v19 = vadd.f32 %v930_v17, %v626_v35  ;;  %v932_v21 = vpop.f32.mrb[6].mxu1  ;;  %1350 = vmatpush1.bf16.msra.mxu0 %v1157_v13  ;;  %v820_v24 = vadd.f32 %v819_v20, %v631_v36  ;;  %v821_v26 = vpop.f32.mrb[7].mxu0 }
 0x120   : > { %1463 = vmatpush1.bf16.msra.mxu1 %v1159_v14  ;;  %v933_v25 = vadd.f32 %v932_v21, %v631_v36  ;;  %v934_v27 = vpop.f32.mrb[7].mxu1  ;;  %v822_v28 = vadd.f32 %v821_v26, %v631_v36  ;;  %v4650_v32 = vadd.f32 %v4595_v37, %v818_v18  ;;  %v4665_v46 = vadd.f32 %v4595_v37, %v929_v23  ;;  %v4693_v17 = vpop.permute.xlu0 %665 }
 0x121   : > { %v935_v29 = vadd.f32 %v934_v27, %v631_v36  ;;  %v4644_v30 = vadd.f32 %v4597_v38, %v820_v24  ;;  %v4653_v33 = vadd.f32 %v4595_v37, %v931_v19  ;;  %v4662_v36 = vadd.f32 %v4595_v37, %v816_v22  ;;  %v4713_v24 = vpop.permute.xlu1 %670 }
 0x122   : > { %v4647_v31 = vadd.f32 %v4597_v38, %v933_v25  ;;  %6526 = vst [vmem:[#allocation21_spill] sm:$0xff] %v4650_v32  ;;  %v4656_v34 = vadd.f32 %v4597_v38, %v822_v28  ;;  %6531 = vst [vmem:[#allocation26_spill] sm:$0xff] %v4665_v46 }
 0x123   : > { %6524 = vst [vmem:[#allocation19_spill] sm:$0xff] %v4644_v30  ;;  %6527 = vst [vmem:[#allocation22_spill] sm:$0xff] %v4653_v33  ;;  %v4659_v35 = vadd.f32 %v4597_v38, %v935_v29  ;;  %v1161_v38 = vpack.c.bf16 %v4644_v30, %v4662_v36 }
 0x124   : > { %6525 = vst [vmem:[#allocation20_spill] sm:$0xff] %v4647_v31  ;;  %6528 = vst [vmem:[#allocation23_spill] sm:$0xff] %v4656_v34  ;;  %v825_v47 = vpop.f32.mrb[8].mxu0  ;;  %v1162_v51 = vpack.c.bf16 %v4656_v34, %v4650_v32  ;;  %v1163_v37 = vpack.c.bf16 %v4647_v31, %v4665_v46 }
 0x125   : > { %6529 = vst [vmem:[#allocation24_spill] sm:$0xff] %v4659_v35  ;;  %6530 = vst [vmem:[#allocation25_spill] sm:$0xff] %v4662_v36  ;;  %v938_v48 = vpop.f32.mrb[8].mxu1  ;;  %v827_v50 = vpop.f32.mrb[9].mxu0  ;;  %v1164_v52 = vpack.c.bf16 %v4659_v35, %v4653_v33  ;;  %v826_v55 = vadd.f32 %v825_v47, %v4599_v39 }
 0x126   : > { %v940_v54 = vpop.f32.mrb[9].mxu1  ;;  %v828_v56 = vadd.f32 %v827_v50, %v4599_v39  ;;  %v829_v58 = vpop.f32.mrb[10].mxu0  ;;  %1351 = vmatprep.subr.bf16.mxu0 %v1162_v51  ;;  %v939_v61 = vadd.f32 %v938_v48, %v4599_v39 }
 0x127   : > { %v941_v57 = vadd.f32 %v940_v54, %v4599_v39  ;;  %v942_v59 = vpop.f32.mrb[10].mxu1  ;;  %1464 = vmatprep.subr.bf16.mxu1 %v1164_v52  ;;  %v830_v62 = vadd.f32 %v829_v58, %v4601_v40  ;;  %v831_v9 = vpop.f32.mrb[11].mxu0  ;;  %1352 = vmatpush1.bf16.msra.mxu0 %v1161_v38 }
 0x128   : > { %v943_v8 = vadd.f32 %v942_v59, %v4601_v40  ;;  %v944_v10 = vpop.f32.mrb[11].mxu1  ;;  %1465 = vmatpush1.bf16.msra.mxu1 %v1163_v37  ;;  %v832_v11 = vadd.f32 %v831_v9, %v4601_v40  ;;  %v4696_v39 = vadd.f32 %v4603_v41, %v828_v56  ;;  %v4711_v21 = vadd.f32 %v4603_v41, %v939_v61  ;;  %v4737_v61 = vpop.permute.xlu0 %1065 }
 0x129   : > { %v945_v13 = vadd.f32 %v944_v10, %v4601_v40  ;;  %v4688_v14 = vadd.f32 %v4605_v42, %v830_v62  ;;  %v4699_v18 = vadd.f32 %v4603_v41, %v941_v57  ;;  %v4708_v40 = vadd.f32 %v4603_v41, %v826_v55  ;;  %v4739_v62 = vpop.permute.xlu1 %1070 }
 0x12a   : > { %v4691_v15 = vadd.f32 %v4605_v42, %v943_v8  ;;  %6534 = vst [vmem:[#allocation29_spill] sm:$0xff] %v4696_v39  ;;  %v4702_v19 = vadd.f32 %v4605_v42, %v832_v11  ;;  %6539 = vst [vmem:[#allocation34_spill] sm:$0xff] %v4711_v21 }
 0x12b   : > { %6532 = vst [vmem:[#allocation27_spill] sm:$0xff] %v4688_v14  ;;  %6535 = vst [vmem:[#allocation30_spill] sm:$0xff] %v4699_v18  ;;  %v4705_v20 = vadd.f32 %v4605_v42, %v945_v13  ;;  %v1165_v42 = vpack.c.bf16 %v4688_v14, %v4708_v40 }
 0x12c   : > { %6533 = vst [vmem:[#allocation28_spill] sm:$0xff] %v4691_v15  ;;  %6536 = vst [vmem:[#allocation31_spill] sm:$0xff] %v4702_v19  ;;  %v835_v22 = vpop.f32.mrb[12].mxu0  ;;  %v1166_v26 = vpack.c.bf16 %v4702_v19, %v4696_v39  ;;  %v1167_v28 = vpack.c.bf16 %v4691_v15, %v4711_v21 }
 0x12d   : > { %6537 = vst [vmem:[#allocation32_spill] sm:$0xff] %v4705_v20  ;;  %6538 = vst [vmem:[#allocation33_spill] sm:$0xff] %v4708_v40  ;;  %v948_v23 = vpop.f32.mrb[12].mxu1  ;;  %v837_v25 = vpop.f32.mrb[13].mxu0  ;;  %v1168_v27 = vpack.c.bf16 %v4705_v20, %v4699_v18  ;;  %v836_v51 = vadd.f32 %v835_v22, %v4607_v43 }
 0x12e   : > { %v838_v41 = vadd.f32 %v837_v25, %v4607_v43  ;;  %v950_v29 = vpop.f32.mrb[13].mxu1  ;;  %v839_v48 = vpop.f32.mrb[14].mxu0  ;;  %1353 = vmatprep.subr.bf16.mxu0 %v1166_v26  ;;  %v949_v55 = vadd.f32 %v948_v23, %v4607_v43 }
 0x12f   : > { %v951_v47 = vadd.f32 %v950_v29, %v4607_v43  ;;  %v952_v50 = vpop.f32.mrb[14].mxu1  ;;  %1466 = vmatprep.subr.bf16.mxu1 %v1168_v27  ;;  %v840_v52 = vadd.f32 %v839_v48, %v4609_v44  ;;  %v841_v37 = vpop.f32.mrb[15].mxu0  ;;  %1354 = vmatpush1.bf16.msra.mxu0 %v1165_v42  ;;  %v4754_v10 = vadd.f32 %v4611_v45, %v836_v51 }
 0x130   : > { %v953_v38 = vadd.f32 %v952_v50, %v4609_v44  ;;  %v954_v54 = vpop.f32.mrb[15].mxu1  ;;  %1467 = vmatpush1.bf16.msra.mxu1 %v1167_v28  ;;  %v842_v56 = vadd.f32 %v841_v37, %v4609_v44  ;;  %v4732_v58 = vadd.f32 %v4611_v45, %v838_v41  ;;  %v4757_v22 = vadd.f32 %v4611_v45, %v949_v55 }
 0x131   : > { %v955_v57 = vadd.f32 %v954_v54, %v4609_v44  ;;  %v4735_v59 = vadd.f32 %v4613_v60, %v840_v52  ;;  %v4742_v8 = vadd.f32 %v4611_v45, %v951_v47  ;;  %6546 = vst [vmem:[#allocation41_spill] sm:$0xff] %v4754_v10 }
 0x132   : > { %6540 = vst [vmem:[#allocation35_spill] sm:$0xff] %v4732_v58  ;;  %v4745_v9 = vadd.f32 %v4613_v60, %v953_v38  ;;  %v4748_v43 = vadd.f32 %v4613_v60, %v842_v56  ;;  %6547 = vst [vmem:[#allocation42_spill] sm:$0xff] %v4757_v22 }
 0x133   : > { %6541 = vst [vmem:[#allocation36_spill] sm:$0xff] %v4735_v59  ;;  %6542 = vst [vmem:[#allocation37_spill] sm:$0xff] %v4742_v8  ;;  %v4751_v44 = vadd.f32 %v4613_v60, %v955_v57  ;;  %v1169_v60 = vpack.c.bf16 %v4735_v59, %v4754_v10 }
 0x134   : > { %6543 = vst [vmem:[#allocation38_spill] sm:$0xff] %v4745_v9  ;;  %6544 = vst [vmem:[#allocation39_spill] sm:$0xff] %v4748_v43  ;;  %v845_v11 = vpop.f32.mrb[16].mxu0  ;;  %v1170_v26 = vpack.c.bf16 %v4748_v43, %v4732_v58  ;;  %v1171_v45 = vpack.c.bf16 %v4745_v9, %v4757_v22 }
 0x135   : > { %6545 = vst [vmem:[#allocation40_spill] sm:$0xff] %v4751_v44  ;;  %v958_v13 = vpop.f32.mrb[16].mxu1  ;;  %v847_v23 = vpop.f32.mrb[17].mxu0  ;;  %v1172_v27 = vpack.c.bf16 %v4751_v44, %v4742_v8  ;;  %v846_v47 = vadd.f32 %v845_v11, %v4635_v12 }
 0x136   : > { %v960_v25 = vpop.f32.mrb[17].mxu1  ;;  %v848_v42 = vadd.f32 %v847_v23, %v4635_v12  ;;  %v849_v41 = vpop.f32.mrb[18].mxu0  ;;  %1355 = vmatprep.subr.bf16.mxu0 %v1170_v26  ;;  %v959_v38 = vadd.f32 %v958_v13, %v4635_v12 }
 0x137   : > { %v961_v28 = vadd.f32 %v960_v25, %v4635_v12  ;;  %v962_v29 = vpop.f32.mrb[18].mxu1  ;;  %v850_v48 = vadd.f32 %v849_v41, %v4641_v16  ;;  %v851_v51 = vpop.f32.mrb[19].mxu0  ;;  %1468 = vmatprep.subr.bf16.mxu1 %v1172_v27  ;;  %1356 = vmatpush1.bf16.msra.mxu0 %v1169_v60  ;;  %v4794_v25 = vadd.f32 %v4667_v49, %v846_v47 }
 0x138   : > { %v963_v50 = vadd.f32 %v962_v29, %v4641_v16  ;;  %v964_v52 = vpop.f32.mrb[19].mxu1  ;;  %v852_v37 = vadd.f32 %v851_v51, %v4641_v16  ;;  %v4776_v55 = vadd.f32 %v4667_v49, %v848_v42  ;;  %1469 = vmatpush1.bf16.msra.mxu1 %v1171_v45  ;;  %v681_v23 = vpop.permute.xlu1 %680  ;;  %v4797_v26 = vadd.f32 %v4667_v49, %v959_v38 }
 0x139   : > { %v965_v54 = vadd.f32 %v964_v52, %v4641_v16  ;;  %v4779_v56 = vadd.f32 %v4673_v53, %v850_v48  ;;  %v4782_v57 = vadd.f32 %v4667_v49, %v961_v28  ;;  %v676_v16 = vpop.permute.xlu0 %675  ;;  %6554 = vst [vmem:[#allocation49_spill] sm:$0xff] %v4794_v25 }
 0x13a   : > { %6548 = vst [vmem:[#allocation43_spill] sm:$0xff] %v4776_v55  ;;  %v4785_v11 = vadd.f32 %v4673_v53, %v963_v50  ;;  %v4788_v12 = vadd.f32 %v4673_v53, %v852_v37  ;;  %6555 = vst [vmem:[#allocation50_spill] sm:$0xff] %v4797_v26 }
 0x13b   : > { %6549 = vst [vmem:[#allocation44_spill] sm:$0xff] %v4779_v56  ;;  %6550 = vst [vmem:[#allocation45_spill] sm:$0xff] %v4782_v57  ;;  %v4791_v13 = vadd.f32 %v4673_v53, %v965_v54  ;;  %v1173_v53 = vpack.c.bf16 %v4779_v56, %v4794_v25 }
 0x13c   : > { %6551 = vst [vmem:[#allocation46_spill] sm:$0xff] %v4785_v11  ;;  %6552 = vst [vmem:[#allocation47_spill] sm:$0xff] %v4788_v12  ;;  %v855_v27 = vpop.f32.mrb[20].mxu0  ;;  %v1174_v42 = vpack.c.bf16 %v4788_v12, %v4776_v55  ;;  %v1175_v45 = vpack.c.bf16 %v4785_v11, %v4797_v26 }
 0x13d   : > { %6553 = vst [vmem:[#allocation48_spill] sm:$0xff] %v4791_v13  ;;  %v968_v60 = vpop.f32.mrb[20].mxu1  ;;  %v1176_v28 = vpack.c.bf16 %v4791_v13, %v4782_v57  ;;  %v857_v41 = vpop.f32.mrb[21].mxu0  ;;  %v856_v51 = vadd.f32 %v855_v27, %v4693_v17 }
 0x13e   : > { %v970_v29 = vpop.f32.mrb[21].mxu1  ;;  %v858_v47 = vadd.f32 %v857_v41, %v4693_v17  ;;  %v859_v48 = vpop.f32.mrb[22].mxu0  ;;  %1357 = vmatprep.subr.bf16.mxu0 %v1174_v42  ;;  %v969_v1 = vadd.f32 %v968_v60, %v4693_v17 }
 0x13f   : > { %v971_v49 = vadd.f32 %v970_v29, %v4693_v17  ;;  %v972_v50 = vpop.f32.mrb[22].mxu1  ;;  %1470 = vmatprep.subr.bf16.mxu1 %v1176_v28  ;;  %v860_v52 = vadd.f32 %v859_v48, %v4713_v24  ;;  %v861_v37 = vpop.f32.mrb[23].mxu0  ;;  %1358 = vmatpush1.bf16.msra.mxu0 %v1173_v53 }
 0x140   : > { %v973_v38 = vadd.f32 %v972_v50, %v4713_v24  ;;  %v974_v54 = vpop.f32.mrb[23].mxu1  ;;  %v862_v13 = vadd.f32 %v861_v37, %v4713_v24  ;;  %1471 = vmatpush1.bf16.msra.mxu1 %v1175_v45  ;;  %v4816_v29 = vadd.f32 %v4737_v61, %v858_v47  ;;  %v1081_v60 = vpop.permute.xlu1 %1080  ;;  %v4834_v45 = vadd.f32 %v4737_v61, %v856_v51 }
 0x141   : > { %v975_v41 = vadd.f32 %v974_v54, %v4713_v24  ;;  %v4819_v42 = vadd.f32 %v4739_v62, %v860_v52  ;;  %v4822_v27 = vadd.f32 %v4737_v61, %v971_v49  ;;  %v1076_v24 = vpop.permute.xlu0 %1075  ;;  %v4837_v47 = vadd.f32 %v4737_v61, %v969_v1 }
 0x142   : > { %6556 = vst [vmem:[#allocation51_spill] sm:$0xff] %v4816_v29  ;;  %v4825_v28 = vadd.f32 %v4739_v62, %v973_v38  ;;  %v4828_v53 = vadd.f32 %v4739_v62, %v862_v13  ;;  %6562 = vst [vmem:[#allocation57_spill] sm:$0xff] %v4834_v45 }
 0x143   : > { %6557 = vst [vmem:[#allocation52_spill] sm:$0xff] %v4819_v42  ;;  %6558 = vst [vmem:[#allocation53_spill] sm:$0xff] %v4822_v27  ;;  %v4831_v17 = vadd.f32 %v4739_v62, %v975_v41  ;;  %v1177_v62 = vpack.c.bf16 %v4819_v42, %v4834_v45 }
 0x144   : > { %6559 = vst [vmem:[#allocation54_spill] sm:$0xff] %v4825_v28  ;;  %6560 = vst [vmem:[#allocation55_spill] sm:$0xff] %v4828_v53  ;;  %v865_v48 = vpop.f32.mrb[24].mxu0  ;;  %v1178_v50 = vpack.c.bf16 %v4828_v53, %v4816_v29  ;;  %v1179_v51 = vpack.c.bf16 %v4825_v28, %v4837_v47 }
 0x145   : > { %6561 = vst [vmem:[#allocation56_spill] sm:$0xff] %v4831_v17  ;;  %6563 = vst [vmem:[#allocation58_spill] sm:$0xff] %v4837_v47  ;;  %v978_v49 = vpop.f32.mrb[24].mxu1  ;;  %v1180_v13 = vpack.c.bf16 %v4831_v17, %v4822_v27  ;;  %v867_v52 = vpop.f32.mrb[25].mxu0  ;;  %v866_v41 = vadd.f32 %v865_v48, %v676_v16 }
 0x146   : > { %v980_v38 = vpop.f32.mrb[25].mxu1  ;;  %v868_v37 = vadd.f32 %v867_v52, %v676_v16  ;;  %v869_v1 = vpop.f32.mrb[26].mxu0  ;;  %1359 = vmatprep.subr.bf16.mxu0 %v1178_v50  ;;  %v979_v17 = vadd.f32 %v978_v49, %v676_v16 }
 0x147   : > { %v981_v54 = vadd.f32 %v980_v38, %v676_v16  ;;  %v982_v61 = vpop.f32.mrb[26].mxu1  ;;  %1472 = vmatprep.subr.bf16.mxu1 %v1180_v13  ;;  %v870_v57 = vadd.f32 %v869_v1, %v681_v23  ;;  %v871_v26 = vpop.f32.mrb[27].mxu0  ;;  %1360 = vmatpush1.bf16.msra.mxu0 %v1177_v62  ;;  %v4859_v1 = vadd.f32 %v1076_v24, %v866_v41 }
 0x148   : > { %v983_v11 = vadd.f32 %v982_v61, %v681_v23  ;;  %v984_v53 = vpop.f32.mrb[27].mxu1  ;;  %v872_v27 = vadd.f32 %v871_v26, %v681_v23  ;;  %1473 = vmatpush1.bf16.msra.mxu1 %v1179_v51  ;;  %v4847_v44 = vadd.f32 %v1076_v24, %v868_v37  ;;  %v691_v52 = vpop.permute.xlu1 %690  ;;  %v4861_v16 = vadd.f32 %v1076_v24, %v979_v17 }
 0x149   : > { %v985_v29 = vadd.f32 %v984_v53, %v681_v23  ;;  %v4849_v8 = vadd.f32 %v1081_v60, %v870_v57  ;;  %v4851_v38 = vadd.f32 %v1076_v24, %v981_v54  ;;  %v686_v13 = vpop.permute.xlu0 %685  ;;  %6570 = vst [vmem:[#allocation65_spill] sm:$0xff] %v4859_v1 }
 0x14a   : > { %6564 = vst [vmem:[#allocation59_spill] sm:$0xff] %v4847_v44  ;;  %v4853_v28 = vadd.f32 %v1081_v60, %v983_v11  ;;  %v4855_v50 = vadd.f32 %v1081_v60, %v872_v27  ;;  %6571 = vst [vmem:[#allocation66_spill] sm:$0xff] %v4861_v16 }
 0x14b   : > { %6565 = vst [vmem:[#allocation60_spill] sm:$0xff] %v4849_v8  ;;  %6566 = vst [vmem:[#allocation61_spill] sm:$0xff] %v4851_v38  ;;  %v4857_v48 = vadd.f32 %v1081_v60, %v985_v29  ;;  %v1181_v11 = vpack.c.bf16 %v4849_v8, %v4859_v1 }
 0x14c   : > { %6567 = vst [vmem:[#allocation62_spill] sm:$0xff] %v4853_v28  ;;  %6568 = vst [vmem:[#allocation63_spill] sm:$0xff] %v4855_v50  ;;  %v875_v23 = vpop.f32.mrb[28].mxu0  ;;  %v1182_v57 = vpack.c.bf16 %v4855_v50, %v4847_v44  ;;  %v1183_v29 = vpack.c.bf16 %v4853_v28, %v4861_v16 }
 0x14d   : > { %6569 = vst [vmem:[#allocation64_spill] sm:$0xff] %v4857_v48  ;;  %v988_v26 = vpop.f32.mrb[28].mxu1  ;;  %v1184_v53 = vpack.c.bf16 %v4857_v48, %v4851_v38  ;;  %v877_v27 = vpop.f32.mrb[29].mxu0  ;;  %v876_v51 = vadd.f32 %v875_v23, %v686_v13 }
 0x14e   : > { %v990_v49 = vpop.f32.mrb[29].mxu1  ;;  %v878_v60 = vadd.f32 %v877_v27, %v686_v13  ;;  %v879_v17 = vpop.f32.mrb[30].mxu0  ;;  %1361 = vmatprep.subr.bf16.mxu0 %v1182_v57  ;;  %v989_v37 = vadd.f32 %v988_v26, %v686_v13 }
 0x14f   : > { %v991_v62 = vadd.f32 %v990_v49, %v686_v13  ;;  %v992_v24 = vpop.f32.mrb[30].mxu1  ;;  %1474 = vmatprep.subr.bf16.mxu1 %v1184_v53  ;;  %v880_v54 = vadd.f32 %v879_v17, %v691_v52  ;;  %v881_v41 = vpop.f32.mrb[31].mxu0  ;;  %1362 = vmatpush1.bf16.msra.mxu0 %v1181_v11  ;;  %v3741_v17 = vld [vmem:[%s4593_s20 + $0x28] sm:$0xff]  }
 0x150   : > { %v993_v61 = vadd.f32 %v992_v24, %v691_v52  ;;  %v994_v48 = vpop.f32.mrb[31].mxu1  ;;  %v1091_v38 = vpop.permute.xlu1 %1090  ;;  %v882_v47 = vadd.f32 %v881_v41, %v691_v52  ;;  %1475 = vmatpush1.bf16.msra.mxu1 %v1183_v29  ;;  %v3738_v29 = vld [vmem:[%s4593_s20 + $0x10] sm:$0xff]  }
 0x151   : > { %v995_v50 = vadd.f32 %v994_v48, %v691_v52  ;;  %v1086_v44 = vpop.permute.xlu0 %1085  ;;  %v4871_v28 = vadd.f32 %v1091_v38, %v880_v54  ;;  %v3742_v24 = vld [vmem:[%s4593_s20 + $0x30] sm:$0xff]  }
 0x152   : > { %v4873_v27 = vadd.f32 %v1091_v38, %v993_v61  ;;  %v4875_v49 = vadd.f32 %v1086_v44, %v878_v60  ;;  %v4877_v57 = vadd.f32 %v1086_v44, %v991_v62  ;;  %v4879_v13 = vadd.f32 %v1091_v38, %v882_v47  ;;  %v3739_v60 = vld [vmem:[%s4593_s20 + $0x18] sm:$0xff]   ;;  %v3740_v62 = vld [vmem:[%s4593_s20 + $0x20] sm:$0xff]  }
 0x153   : > { %6572 = vst [vmem:[#allocation67_spill] sm:$0xff] %v4871_v28  ;;  %v4881_v23 = vadd.f32 %v1091_v38, %v995_v50  ;;  %v4883_v26 = vadd.f32 %v1086_v44, %v876_v51  ;;  %v4885_v53 = vadd.f32 %v1086_v44, %v989_v37  ;;  %v3736_v38 = vld [vmem:[%s4593_s20] sm:$0xff]   ;;  %v6580_v44 = vmov 0   ;;  %v3737_v50 = vld [vmem:[%s4593_s20 + $0x8] sm:$0xff]   ;;  %v3743_v51 = vld [vmem:[%s4593_s20 + $0x38] sm:$0xff]  }
 0x154   : > { %6573 = vst [vmem:[#allocation68_spill] sm:$0xff] %v4873_v27  ;;  %6574 = vst [vmem:[#allocation69_spill] sm:$0xff] %v4875_v49  ;;  %v1186_v52 = vpack.c.bf16 %v4879_v13, %v4875_v49  ;;  %v1229_v54 = vpop.permute.xlu1 %1228 }
 0x155   : > { %6575 = vst [vmem:[#allocation70_spill] sm:$0xff] %v4877_v57  ;;  %6576 = vst [vmem:[#allocation71_spill] sm:$0xff] %v4879_v13  ;;  %v1188_v48 = vpack.c.bf16 %v4881_v23, %v4877_v57  ;;  %v1185_v11 = vpack.c.bf16 %v4871_v28, %v4883_v26  ;;  %v1187_v47 = vpack.c.bf16 %v4873_v27, %v4885_v53  ;;  %v1224_v37 = vpop.permute.xlu0 %1223 }
 0x156   : > { %6577 = vst [vmem:[#allocation72_spill] sm:$0xff] %v4881_v23  ;;  %6578 = vst [vmem:[#allocation73_spill] sm:$0xff] %v4883_v26  ;;  %1363 = vmatprep.subr.bf16.mxu0 %v1186_v52 }
 0x157   : > { %6579 = vst [vmem:[#allocation74_spill] sm:$0xff] %v4885_v53  ;;  %1476 = vmatprep.subr.bf16.mxu1 %v1188_v48  ;;  %1364 = vmatpush1.bf16.msra.mxu0 %v1185_v11 }
 0x158   : > { %1477 = vmatpush1.bf16.msra.mxu1 %v1187_v47  ;;  %v1239_v27 = vpop.permute.xlu1 %1238 }
 0x15a   : > { %1382 = vmatmul.mubr.bf16.vlgmr.msra.gmra.mrb[32].mxu0 %v3736_v38 }
 0x15b   : > { %1495 = vmatmul.mubr.bf16.vlgmr.msra.gmra.mrb[32].mxu1 %v3736_v38  ;;  %1391 = vmatprep.mubr.bf16.mxu0 %v6580_v44 }
 0x15c   : > { %1504 = vmatprep.mubr.bf16.mxu1 %v6580_v44  ;;  %v1249_v22 = vpop.permute.xlu1 %1248 }
 0x160   : > { %v1259_v21 = vpop.permute.xlu1 %1258 }
 0x162   : > { %1392 = vmatmul.mubr.bf16.gmra.mrb[36].mxu0 %v3737_v50 }
 0x163   : > { %1505 = vmatmul.mubr.bf16.gmra.mrb[36].mxu1 %v3737_v50  ;;  %1401 = vmatprep.mubr.bf16.mxu0 %v6580_v44 }
 0x164   : > { %1514 = vmatprep.mubr.bf16.mxu1 %v6580_v44  ;;  %v1269_v46 = vpop.permute.xlu1 %1268 }
 0x168   : > { %v1279_v7 = vpop.permute.xlu1 %1278 }
 0x16a   : > { %1402 = vmatmul.mubr.bf16.gmra.mrb[40].mxu0 %v3738_v29 }
 0x16b   : > { %1515 = vmatmul.mubr.bf16.gmra.mrb[40].mxu1 %v3738_v29  ;;  %1411 = vmatprep.mubr.bf16.mxu0 %v6580_v44 }
 0x16c   : > { %1524 = vmatprep.mubr.bf16.mxu1 %v6580_v44  ;;  %v1289_v6 = vpop.permute.xlu1 %1288 }
 0x172   : > { %1412 = vmatmul.mubr.bf16.gmra.mrb[44].mxu0 %v3739_v60 }
 0x173   : > { %1525 = vmatmul.mubr.bf16.gmra.mrb[44].mxu1 %v3739_v60  ;;  %1421 = vmatprep.mubr.bf16.mxu0 %v6580_v44 }
 0x174   : > { %1534 = vmatprep.mubr.bf16.mxu1 %v6580_v44 }
 0x17a   : > { %1422 = vmatmul.mubr.bf16.gmra.mrb[48].mxu0 %v3740_v62 }
 0x17b   : > { %1535 = vmatmul.mubr.bf16.gmra.mrb[48].mxu1 %v3740_v62  ;;  %1431 = vmatprep.mubr.bf16.mxu0 %v6580_v44 }
 0x17c   : > { %1544 = vmatprep.mubr.bf16.mxu1 %v6580_v44 }
 0x182   : > { %1432 = vmatmul.mubr.bf16.gmra.mrb[52].mxu0 %v3741_v17 }
 0x183   : > { %1545 = vmatmul.mubr.bf16.gmra.mrb[52].mxu1 %v3741_v17  ;;  %1441 = vmatprep.mubr.bf16.mxu0 %v6580_v44 }
 0x184   : > { %1554 = vmatprep.mubr.bf16.mxu1 %v6580_v44 }
 0x18a   : > { %1442 = vmatmul.mubr.bf16.gmra.mrb[56].mxu0 %v3742_v24 }
 0x18b   : > { %1555 = vmatmul.mubr.bf16.gmra.mrb[56].mxu1 %v3742_v24  ;;  %1451 = vmatprep.mubr.bf16.mxu0 %v6580_v44 }
 0x18c   : > { %1564 = vmatprep.mubr.bf16.mxu1 %v6580_v44 }
 0x192   : > { %1452 = vmatmul.mubr.bf16.gmra.mrb[60].mxu0 %v3743_v51 }
 0x193   : > { %1565 = vmatmul.mubr.bf16.gmra.mrb[60].mxu1 %v3743_v51  ;;  %2131 = vmatprep.mubr.bf16.mxu0 %v6580_v44 }
 0x194   : > { %2244 = vmatprep.mubr.bf16.mxu1 %v6580_v44 }
 0x22d   : > { %v1383_v61 = vpop.f32.mrb[32].mxu0 }
 0x22e   : > { %v1496_v41 = vpop.f32.mrb[32].mxu1  ;;  %v1385_v52 = vpop.f32.mrb[33].mxu0  ;;  %v4919_v38 = vadd.f32 %v1383_v61, %v1224_v37 }
 0x22f   : > { %v1498_v48 = vpop.f32.mrb[33].mxu1  ;;  %v1387_v11 = vpop.f32.mrb[34].mxu0  ;;  %v4921_v50 = vadd.f32 %v1496_v41, %v1224_v37  ;;  %v4927_v24 = vadd.f32 %v1385_v52, %v1224_v37 }
 0x230   : > { %v1500_v47 = vpop.f32.mrb[34].mxu1  ;;  %v4923_v29 = vadd.f32 %v1387_v11, %v1229_v54  ;;  %v1389_v62 = vpop.f32.mrb[35].mxu0  ;;  %v4929_v51 = vadd.f32 %v1498_v48, %v1224_v37 }
 0x231   : > { %v4925_v60 = vadd.f32 %v1500_v47, %v1229_v54  ;;  %v1502_v17 = vpop.f32.mrb[35].mxu1  ;;  %v4931_v23 = vadd.f32 %v1389_v62, %v1229_v54  ;;  %v1234_v52 = vpop.permute.xlu0 %1233 }
 0x232   : > { %6581 = vst [vmem:[#allocation75_spill] sm:$0xff] %v4929_v51  ;;  %v4933_v57 = vadd.f32 %v1502_v17, %v1229_v54  ;;  %v1575_v61 = vmax.f32 %v4919_v38, %v4923_v29 }
 0x233   : > { %v1617_v41 = vmax.f32 %v4921_v50, %v4925_v60  ;;  %v1596_v11 = vmax.f32 %v4927_v24, %v4931_v23 }
 0x234   : > { %6582 = vst [vmem:[#allocation76_spill] sm:$0xff] %v4933_v57  ;;  %v1638_v47 = vmax.f32 %v4929_v51, %v4933_v57 }
 0x235   : > { %v1393_v37 = vpop.f32.mrb[36].mxu0 }
 0x236   : > { %v1506_v48 = vpop.f32.mrb[36].mxu1  ;;  %v4943_v62 = vadd.f32 %v1393_v37, %v1234_v52  ;;  %v1395_v17 = vpop.f32.mrb[37].mxu0 }
 0x237   : > { %v4945_v54 = vadd.f32 %v1506_v48, %v1234_v52  ;;  %v1508_v53 = vpop.f32.mrb[37].mxu1  ;;  %v4947_v16 = vadd.f32 %v1395_v17, %v1234_v52  ;;  %v1397_v49 = vpop.f32.mrb[38].mxu0 }
 0x238   : > { %v4949_v13 = vadd.f32 %v1508_v53, %v1234_v52  ;;  %v1510_v28 = vpop.f32.mrb[38].mxu1  ;;  %v1576_v26 = vmax.f32 %v1575_v61, %v4943_v62  ;;  %v4953_v1 = vadd.f32 %v1397_v49, %v1239_v27  ;;  %v1399_v37 = vpop.f32.mrb[39].mxu0 }
 0x239   : > { %v1618_v8 = vmax.f32 %v1617_v41, %v4945_v54  ;;  %v4955_v42 = vadd.f32 %v1510_v28, %v1239_v27  ;;  %v1512_v45 = vpop.f32.mrb[39].mxu1  ;;  %v1597_v48 = vmax.f32 %v1596_v11, %v4947_v16  ;;  %v4959_v17 = vadd.f32 %v1399_v37, %v1239_v27  ;;  %v1244_v28 = vpop.permute.xlu0 %1243 }
 0x23a   : > { %6583 = vst [vmem:[#allocation77_spill] sm:$0xff] %v4949_v13  ;;  %v1639_v9 = vmax.f32 %v1638_v47, %v4949_v13  ;;  %v4961_v53 = vadd.f32 %v1512_v45, %v1239_v27  ;;  %v1577_v52 = vmax.f32 %v1576_v26, %v4953_v1 }
 0x23b   : > { %v1619_v61 = vmax.f32 %v1618_v8, %v4955_v42  ;;  %v1598_v41 = vmax.f32 %v1597_v48, %v4959_v17 }
 0x23c   : > { %6584 = vst [vmem:[#allocation78_spill] sm:$0xff] %v4961_v53  ;;  %v1640_v49 = vmax.f32 %v1639_v9, %v4961_v53 }
 0x23d   : > { %v1403_v12 = vpop.f32.mrb[40].mxu0 }
 0x23e   : > { %v1516_v55 = vpop.f32.mrb[40].mxu1  ;;  %v4967_v20 = vadd.f32 %v1403_v12, %v1244_v28  ;;  %v1405_v47 = vpop.f32.mrb[41].mxu0 }
 0x23f   : > { %v4969_v11 = vadd.f32 %v1516_v55, %v1244_v28  ;;  %v1518_v37 = vpop.f32.mrb[41].mxu1  ;;  %v4971_v45 = vadd.f32 %v1405_v47, %v1244_v28  ;;  %v1407_v26 = vpop.f32.mrb[42].mxu0 }
 0x240   : > { %v4973_v27 = vadd.f32 %v1518_v37, %v1244_v28  ;;  %v1520_v8 = vpop.f32.mrb[42].mxu1  ;;  %v1578_v48 = vmax.f32 %v1577_v52, %v4967_v20  ;;  %v4977_v18 = vadd.f32 %v1407_v26, %v1249_v22  ;;  %v1409_v12 = vpop.f32.mrb[43].mxu0 }
 0x241   : > { %v1620_v9 = vmax.f32 %v1619_v61, %v4969_v11  ;;  %v4979_v56 = vadd.f32 %v1520_v8, %v1249_v22  ;;  %v1522_v25 = vpop.f32.mrb[43].mxu1  ;;  %v1599_v55 = vmax.f32 %v1598_v41, %v4971_v45  ;;  %v4983_v47 = vadd.f32 %v1409_v12, %v1249_v22  ;;  %v1254_v8 = vpop.permute.xlu0 %1253 }
 0x242   : > { %6585 = vst [vmem:[#allocation79_spill] sm:$0xff] %v4973_v27  ;;  %v1641_v15 = vmax.f32 %v1640_v49, %v4973_v27  ;;  %v4985_v28 = vadd.f32 %v1522_v25, %v1249_v22  ;;  %v1579_v37 = vmax.f32 %v1578_v48, %v4977_v18 }
 0x243   : > { %v1621_v52 = vmax.f32 %v1620_v9, %v4979_v56  ;;  %v1600_v61 = vmax.f32 %v1599_v55, %v4983_v47 }
 0x244   : > { %6586 = vst [vmem:[#allocation80_spill] sm:$0xff] %v4985_v28  ;;  %v1642_v26 = vmax.f32 %v1641_v15, %v4985_v28  ;;  %v1299_v28 = vpop.permute.xlu1 %1298 }
 0x245   : > { %v1413_v43 = vpop.f32.mrb[44].mxu0 }
 0x246   : > { %v1526_v58 = vpop.f32.mrb[44].mxu1  ;;  %v4991_v35 = vadd.f32 %v1413_v43, %v1254_v8  ;;  %v1415_v49 = vpop.f32.mrb[45].mxu0 }
 0x247   : > { %v4993_v41 = vadd.f32 %v1526_v58, %v1254_v8  ;;  %v1528_v12 = vpop.f32.mrb[45].mxu1  ;;  %v4995_v22 = vadd.f32 %v1415_v49, %v1254_v8  ;;  %v1417_v48 = vpop.f32.mrb[46].mxu0 }
 0x248   : > { %v4997_v25 = vadd.f32 %v1528_v12, %v1254_v8  ;;  %v1530_v9 = vpop.f32.mrb[46].mxu1  ;;  %v1580_v55 = vmax.f32 %v1579_v37, %v4991_v35  ;;  %v5001_v33 = vadd.f32 %v1417_v48, %v1259_v21  ;;  %v1419_v43 = vpop.f32.mrb[47].mxu0 }
 0x249   : > { %v1622_v15 = vmax.f32 %v1621_v52, %v4993_v41  ;;  %v5003_v59 = vadd.f32 %v1530_v9, %v1259_v21  ;;  %v1532_v10 = vpop.f32.mrb[47].mxu1  ;;  %v1601_v58 = vmax.f32 %v1600_v61, %v4995_v22  ;;  %v5007_v49 = vadd.f32 %v1419_v43, %v1259_v21  ;;  %v1264_v9 = vpop.permute.xlu0 %1263 }
 0x24a   : > { %6587 = vst [vmem:[#allocation81_spill] sm:$0xff] %v4997_v25  ;;  %v1643_v31 = vmax.f32 %v1642_v26, %v4997_v25  ;;  %v5009_v8 = vadd.f32 %v1532_v10, %v1259_v21  ;;  %v1581_v12 = vmax.f32 %v1580_v55, %v5001_v33 }
 0x24b   : > { %v1623_v37 = vmax.f32 %v1622_v15, %v5003_v59  ;;  %v1602_v52 = vmax.f32 %v1601_v58, %v5007_v49 }
 0x24c   : > { %6588 = vst [vmem:[#allocation82_spill] sm:$0xff] %v5009_v8  ;;  %v1644_v48 = vmax.f32 %v1643_v31, %v5009_v8 }
 0x24d   : > { %v1423_v19 = vpop.f32.mrb[48].mxu0 }
 0x24e   : > { %v1536_v39 = vpop.f32.mrb[48].mxu1  ;;  %v5015_v5 = vadd.f32 %v1423_v19, %v1264_v9  ;;  %v1425_v26 = vpop.f32.mrb[49].mxu0 }
 0x24f   : > { %v5017_v61 = vadd.f32 %v1536_v39, %v1264_v9  ;;  %v1538_v43 = vpop.f32.mrb[49].mxu1  ;;  %v5019_v21 = vadd.f32 %v1425_v26, %v1264_v9  ;;  %v1427_v55 = vpop.f32.mrb[50].mxu0 }
 0x250   : > { %v5021_v10 = vadd.f32 %v1538_v43, %v1264_v9  ;;  %v1540_v15 = vpop.f32.mrb[50].mxu1  ;;  %v1582_v58 = vmax.f32 %v1581_v12, %v5015_v5  ;;  %v5025_v3 = vadd.f32 %v1427_v55, %v1269_v46  ;;  %v1429_v19 = vpop.f32.mrb[51].mxu0 }
 0x251   : > { %6589 = vst [vmem:[#allocation83_spill] sm:$0xff] %v5019_v21  ;;  %v1624_v31 = vmax.f32 %v1623_v37, %v5017_v61  ;;  %v5027_v14 = vadd.f32 %v1540_v15, %v1269_v46  ;;  %v1542_v40 = vpop.f32.mrb[51].mxu1  ;;  %v1603_v39 = vmax.f32 %v1602_v52, %v5019_v21  ;;  %v5031_v26 = vadd.f32 %v1429_v19, %v1269_v46  ;;  %v1274_v15 = vpop.permute.xlu0 %1273 }
 0x252   : > { %6590 = vst [vmem:[#allocation84_spill] sm:$0xff] %v5021_v10  ;;  %v1645_v0 = vmax.f32 %v1644_v48, %v5021_v10  ;;  %v5033_v9 = vadd.f32 %v1542_v40, %v1269_v46  ;;  %v1583_v43 = vmax.f32 %v1582_v58, %v5025_v3 }
 0x253   : > { %6591 = vst [vmem:[#allocation85_spill] sm:$0xff] %v5031_v26  ;;  %v1625_v12 = vmax.f32 %v1624_v31, %v5027_v14  ;;  %v1604_v37 = vmax.f32 %v1603_v39, %v5031_v26 }
 0x254   : > { %6592 = vst [vmem:[#allocation86_spill] sm:$0xff] %v5033_v9  ;;  %v1646_v55 = vmax.f32 %v1645_v0, %v5033_v9 }
 0x255   : > { %v1433_v34 = vpop.f32.mrb[52].mxu0 }
 0x256   : > { %v1546_v32 = vpop.f32.mrb[52].mxu1  ;;  %v5039_v30 = vadd.f32 %v1433_v34, %v1274_v15  ;;  %v1435_v48 = vpop.f32.mrb[53].mxu0 }
 0x257   : > { %v5041_v52 = vadd.f32 %v1546_v32, %v1274_v15  ;;  %v1548_v19 = vpop.f32.mrb[53].mxu1  ;;  %v5043_v46 = vadd.f32 %v1435_v48, %v1274_v15  ;;  %v1437_v58 = vpop.f32.mrb[54].mxu0 }
 0x258   : > { %v5045_v40 = vadd.f32 %v1548_v19, %v1274_v15  ;;  %v1550_v31 = vpop.f32.mrb[54].mxu1  ;;  %v1584_v39 = vmax.f32 %v1583_v43, %v5039_v30  ;;  %v5049_v36 = vadd.f32 %v1437_v58, %v1279_v7  ;;  %v1439_v34 = vpop.f32.mrb[55].mxu0 }
 0x259   : > { %6593 = vst [vmem:[#allocation87_spill] sm:$0xff] %v5043_v46  ;;  %v1626_v0 = vmax.f32 %v1625_v12, %v5041_v52  ;;  %v5051_v4 = vadd.f32 %v1550_v31, %v1279_v7  ;;  %v1552_v2 = vpop.f32.mrb[55].mxu1  ;;  %v1605_v32 = vmax.f32 %v1604_v37, %v5043_v46  ;;  %v5055_v48 = vadd.f32 %v1439_v34, %v1279_v7  ;;  %v1284_v31 = vpop.permute.xlu0 %1283 }
 0x25a   : > { %6594 = vst [vmem:[#allocation88_spill] sm:$0xff] %v5045_v40  ;;  %v1647_v63 = vmax.f32 %v1646_v55, %v5045_v40  ;;  %v5057_v15 = vadd.f32 %v1552_v2, %v1279_v7  ;;  %v1585_v19 = vmax.f32 %v1584_v39, %v5049_v36 }
 0x25b   : > { %6595 = vst [vmem:[#allocation89_spill] sm:$0xff] %v5055_v48  ;;  %v1627_v43 = vmax.f32 %v1626_v0, %v5051_v4  ;;  %v1606_v12 = vmax.f32 %v1605_v32, %v5055_v48 }
 0x25c   : > { %6596 = vst [vmem:[#allocation90_spill] sm:$0xff] %v5057_v15  ;;  %v1648_v58 = vmax.f32 %v1647_v63, %v5057_v15 }
 0x25d   : > { %v1443_v44 = vpop.f32.mrb[56].mxu0 }
 0x25e   : > { %v1556_v9 = vpop.f32.mrb[56].mxu1  ;;  %v5063_v10 = vadd.f32 %v1443_v44, %v1284_v31  ;;  %v1445_v55 = vpop.f32.mrb[57].mxu0 }
 0x25f   : > { %v5065_v37 = vadd.f32 %v1556_v9, %v1284_v31  ;;  %v1558_v34 = vpop.f32.mrb[57].mxu1  ;;  %v5067_v2 = vadd.f32 %v1445_v55, %v1284_v31  ;;  %v1447_v39 = vpop.f32.mrb[58].mxu0 }
 0x260   : > { %v5069_v7 = vadd.f32 %v1558_v34, %v1284_v31  ;;  %v1560_v0 = vpop.f32.mrb[58].mxu1  ;;  %v1586_v32 = vmax.f32 %v1585_v19, %v5063_v10  ;;  %v5073_v15 = vadd.f32 %v1447_v39, %v1289_v6  ;;  %v1449_v44 = vpop.f32.mrb[59].mxu0 }
 0x261   : > { %6597 = vst [vmem:[#allocation91_spill] sm:$0xff] %v5067_v2  ;;  %v1628_v63 = vmax.f32 %v1627_v43, %v5065_v37  ;;  %v5075_v40 = vadd.f32 %v1560_v0, %v1289_v6  ;;  %v1562_v8 = vpop.f32.mrb[59].mxu1  ;;  %v1607_v9 = vmax.f32 %v1606_v12, %v5067_v2  ;;  %v5079_v55 = vadd.f32 %v1449_v44, %v1289_v6  ;;  %v1294_v0 = vpop.permute.xlu0 %1293 }
 0x262   : > { %6598 = vst [vmem:[#allocation92_spill] sm:$0xff] %v5069_v7  ;;  %v1649_v25 = vmax.f32 %v1648_v58, %v5069_v7  ;;  %v5081_v31 = vadd.f32 %v1562_v8, %v1289_v6  ;;  %v1587_v34 = vmax.f32 %v1586_v32, %v5073_v15 }
 0x263   : > { %6599 = vst [vmem:[#allocation93_spill] sm:$0xff] %v5079_v55  ;;  %v1629_v19 = vmax.f32 %v1628_v63, %v5075_v40  ;;  %v1608_v43 = vmax.f32 %v1607_v9, %v5079_v55 }
 0x264   : > { %6600 = vst [vmem:[#allocation94_spill] sm:$0xff] %v5081_v31  ;;  %v1650_v39 = vmax.f32 %v1649_v25, %v5081_v31 }
 0x265   : > { %v1453_v27 = vpop.f32.mrb[60].mxu0 }
 0x266   : > { %v1566_v53 = vpop.f32.mrb[60].mxu1  ;;  %v5087_v13 = vadd.f32 %v1453_v27, %v1294_v0  ;;  %v1455_v58 = vpop.f32.mrb[61].mxu0 }
 0x267   : > { %v5089_v12 = vadd.f32 %v1566_v53, %v1294_v0  ;;  %v1568_v44 = vpop.f32.mrb[61].mxu1  ;;  %v5091_v6 = vadd.f32 %v1455_v58, %v1294_v0  ;;  %v1457_v32 = vpop.f32.mrb[62].mxu0 }
 0x268   : > { %v5093_v8 = vadd.f32 %v1568_v44, %v1294_v0  ;;  %v1570_v63 = vpop.f32.mrb[62].mxu1  ;;  %v1588_v9 = vmax.f32 %v1587_v34, %v5087_v13  ;;  %v5097_v31 = vadd.f32 %v1457_v32, %v1299_v28  ;;  %v1459_v27 = vpop.f32.mrb[63].mxu0 }
 0x269   : > { %6601 = vst [vmem:[#allocation95_spill] sm:$0xff] %v5091_v6  ;;  %v1630_v25 = vmax.f32 %v1629_v19, %v5089_v12  ;;  %v5099_v7 = vadd.f32 %v1570_v63, %v1299_v28  ;;  %v1572_v57 = vpop.f32.mrb[63].mxu1  ;;  %v1609_v53 = vmax.f32 %v1608_v43, %v5091_v6  ;;  %v5103_v58 = vadd.f32 %v1459_v27, %v1299_v28 }
 0x26a   : > { %6602 = vst [vmem:[#allocation96_spill] sm:$0xff] %v5093_v8  ;;  %v1651_v51 = vmax.f32 %v1650_v39, %v5093_v8  ;;  %v5105_v0 = vadd.f32 %v1572_v57, %v1299_v28  ;;  %v1589_v44 = vmax.f32 %v1588_v9, %v5097_v31 }
 0x26b   : > { %v1631_v34 = vmax.f32 %v1630_v25, %v5099_v7  ;;  %v1610_v19 = vmax.f32 %v1609_v53, %v5103_v58 }
 0x26c   : > { %v1652_v32 = vmax.f32 %v1651_v51, %v5105_v0  ;;  %v1590_v63 = vrot.slane %v1589_v44, 4 }
 0x26d   : > { %v1632_v55 = vrot.slane %v1631_v34, 4  ;;  %v1611_v46 = vrot.slane %v1610_v19, 4 }
 0x26e   : > { %v1591_v2 = vmax.f32 %v1589_v44, %v1590_v63  ;;  %v1653_v43 = vrot.slane %v1652_v32, 4 }
 0x26f   : > { %v1633_v48 = vmax.f32 %v1631_v34, %v1632_v55  ;;  %v1612_v57 = vmax.f32 %v1610_v19, %v1611_v46 }
 0x270   : > { %v1592_v6 = vrot.slane %v1591_v2, 2  ;;  %v1654_v28 = vmax.f32 %v1652_v32, %v1653_v43 }
 0x271   : > { %v1634_v39 = vrot.slane %v1633_v48, 2  ;;  %v1613_v53 = vrot.slane %v1612_v57, 2 }
 0x272   : > { %v1593_v27 = vmax.f32 %v1591_v2, %v1592_v6  ;;  %v1655_v51 = vrot.slane %v1654_v28, 2 }
 0x273   : > { %v1635_v8 = vmax.f32 %v1633_v48, %v1634_v39  ;;  %v1614_v34 = vmax.f32 %v1612_v57, %v1613_v53 }
 0x274   : > { %v1594_v26 = vrot.slane %v1593_v27, 1 }
 0x275   : > { %v1636_v9 = vrot.slane %v1635_v8, 1  ;;  %v1615_v63 = vrot.slane %v1614_v34, 1 }
 0x276   : > { %v5111_v21 = vmax.f32 %v1593_v27, %v1594_v26 }
 0x277   : > { %v5113_v25 = vmax.f32 %v1635_v8, %v1636_v9 }
 0x278   : > { %v1659_v44 = vsub.f32 %v4919_v38, %v5111_v21  ;;  %v1663_v55 = vsub.f32 %v4923_v29, %v5111_v21  ;;  %v1667_v2 = vsub.f32 %v4943_v62, %v5111_v21  ;;  %v1671_v46 = vsub.f32 %v4953_v1, %v5111_v21 }
 0x279   : > { %v1675_v26 = vsub.f32 %v4967_v20, %v5111_v21  ;;  %v1679_v48 = vsub.f32 %v4977_v18, %v5111_v21  ;;  %v1683_v6 = vsub.f32 %v4991_v35, %v5111_v21  ;;  %v1687_v38 = vsub.f32 %v5001_v33, %v5111_v21 }
 0x27a   : > { %v1691_v29 = vsub.f32 %v5015_v5, %v5111_v21  ;;  %v1695_v62 = vsub.f32 %v5025_v3, %v5111_v21  ;;  %v1699_v1 = vsub.f32 %v5039_v30, %v5111_v21  ;;  %v1703_v20 = vsub.f32 %v5049_v36, %v5111_v21 }
 0x27b   : > { %v1707_v18 = vsub.f32 %v5063_v10, %v5111_v21  ;;  %v1711_v35 = vsub.f32 %v5073_v15, %v5111_v21  ;;  %v1715_v33 = vsub.f32 %v5087_v13, %v5111_v21  ;;  %v1719_v5 = vsub.f32 %v5097_v31, %v5111_v21 }
 0x27c   : > { %v1723_v8 = vmul.f32 1.442695, %v1659_v44  ;;  %v1731_v3 = vmul.f32 1.442695, %v1663_v55  ;;  %v1661_v30 = vsub.f32 %v4921_v50, %v5113_v25  ;;  %v1739_v19 = vmul.f32 1.442695, %v1667_v2 }
 0x27d   : > { %v1665_v36 = vsub.f32 %v4925_v60, %v5113_v25  ;;  %v1747_v10 = vmul.f32 1.442695, %v1671_v46  ;;  %v1755_v15 = vmul.f32 1.442695, %v1675_v26  ;;  %v1763_v32 = vmul.f32 1.442695, %v1679_v48 }
 0x27e   : > { %3762 = vpow2.f32 %v1723_v8  ;;  %v5151_v13 = vmax.f32 %v1654_v28, %v1655_v51  ;;  %v1771_v21 = vmul.f32 1.442695, %v1683_v6  ;;  %v1669_v31 = vsub.f32 %v4945_v54, %v5113_v25 }
 0x27f   : > { %3764 = vpow2.f32 %v1731_v3  ;;  %v1673_v50 = vsub.f32 %v4955_v42, %v5113_v25  ;;  %v1779_v43 = vmul.f32 1.442695, %v1687_v38  ;;  %v1677_v60 = vsub.f32 %v4969_v11, %v5113_v25 }
 0x280   : > { %3766 = vpow2.f32 %v1739_v19  ;;  %v1681_v39 = vsub.f32 %v4979_v56, %v5113_v25  ;;  %v1685_v27 = vsub.f32 %v4993_v41, %v5113_v25  ;;  %v1689_v57 = vsub.f32 %v5003_v59, %v5113_v25 }
 0x281   : > { %3768 = vpow2.f32 %v1747_v10  ;;  %v1693_v54 = vsub.f32 %v5017_v61, %v5113_v25  ;;  %v1697_v42 = vsub.f32 %v5027_v14, %v5113_v25  ;;  %v1787_v28 = vmul.f32 1.442695, %v1691_v29 }
 0x282   : > { %v1701_v11 = vsub.f32 %v5041_v52, %v5113_v25  ;;  %v1705_v9 = vsub.f32 %v5051_v4, %v5113_v25  ;;  %v1709_v53 = vsub.f32 %v5065_v37, %v5113_v25  ;;  %3770 = vpow2.f32 %v1755_v15 }
 0x283   : > { %v1713_v51 = vsub.f32 %v5075_v40, %v5113_v25  ;;  %v1717_v44 = vsub.f32 %v5089_v12, %v5113_v25  ;;  %3772 = vpow2.f32 %v1763_v32  ;;  %v1795_v2 = vmul.f32 1.442695, %v1695_v62  ;;  %v6614_v12 = vld [vmem:[#allocation76_spill] sm:$0xff]  ;;  %v6628_v40 = vld [vmem:[#allocation94_spill] sm:$0xff] }
 0x284   : > { %3774 = vpow2.f32 %v1771_v21  ;;  %v1803_v46 = vmul.f32 1.442695, %v1699_v1  ;;  %v5181_v26 = vmax.f32 %v1614_v34, %v1615_v63  ;;  %v1657_v48 = vrot.slane %v5151_v13, 1 }
 0x285   : > { %3776 = vpow2.f32 %v1779_v43  ;;  %v1811_v38 = vmul.f32 1.442695, %v1703_v20  ;;  %v1819_v29 = vmul.f32 1.442695, %v1707_v18  ;;  %v1827_v8 = vmul.f32 1.442695, %v1711_v35 }
 0x286   : > { %3778 = vpow2.f32 %v1787_v28  ;;  %v1835_v19 = vmul.f32 1.442695, %v1715_v33  ;;  %v1843_v10 = vmul.f32 1.442695, %v1719_v5  ;;  %v1727_v15 = vmul.f32 1.442695, %v1661_v30 }
 0x287   : > { %3780 = vpow2.f32 %v1795_v2  ;;  %v1735_v1 = vmul.f32 1.442695, %v1665_v36  ;;  %v1743_v34 = vmul.f32 1.442695, %v1669_v31  ;;  %v1751_v63 = vmul.f32 1.442695, %v1673_v50 }
 0x288   : > { %v5184_v6 = vpop.eup %3762  ;;  %3782 = vpow2.f32 %v1803_v46  ;;  %v1759_v21 = vmul.f32 1.442695, %v1677_v60  ;;  %v1660_v20 = vsub.f32 %v4927_v24, %v5181_v26  ;;  %v1664_v35 = vsub.f32 %v4931_v23, %v5181_v26  ;;  %v6604_v60 = vld [vmem:[#allocation85_spill] sm:$0xff]  ;;  %v6605_v2 = vld [vmem:[#allocation87_spill] sm:$0xff]  ;;  %v6629_v36 = vld [vmem:[#allocation96_spill] sm:$0xff] }
 0x289   : > { %v5186_v3 = vpop.eup %3764  ;;  %3784 = vpow2.f32 %v1811_v38  ;;  %v1668_v33 = vsub.f32 %v4947_v16, %v5181_v26  ;;  %v1672_v30 = vsub.f32 %v4959_v17, %v5181_v26  ;;  %v6603_v17 = vld [vmem:[#allocation83_spill] sm:$0xff]  ;;  %v6608_v46 = vld [vmem:[#allocation93_spill] sm:$0xff]  ;;  %v1767_v23 = vmul.f32 1.442695, %v1681_v39 }
 0x28a   : > { %v1851_v62 = vadd.f32 %v5186_v3, %v5184_v6  ;;  %v5190_v32 = vpop.eup %3766  ;;  %3786 = vpow2.f32 %v1819_v29  ;;  %v5257_v43 = vmax.f32 %v5151_v13, %v1657_v48  ;;  %v1791_v39 = vmul.f32 1.442695, %v1693_v54 }
 0x28b   : > { %v5199_v5 = vpop.eup %3768  ;;  %3788 = vpow2.f32 %v1727_v15  ;;  %v6606_v15 = vld [vmem:[#allocation89_spill] sm:$0xff]  ;;  %v1799_v41 = vmul.f32 1.442695, %v1697_v42  ;;  %v1807_v59 = vmul.f32 1.442695, %v1701_v11 }
 0x28c   : > { %v1852_v18 = vadd.f32 %v5190_v32, %v1851_v62  ;;  %v5212_v50 = vpop.eup %3770  ;;  %3790 = vpow2.f32 %v1735_v1  ;;  %v1783_v62 = vmul.f32 1.442695, %v1689_v57  ;;  %v1815_v13 = vmul.f32 1.442695, %v1705_v9 }
 0x28d   : > { %v5220_v38 = vpop.eup %3772  ;;  %3792 = vpow2.f32 %v1827_v8  ;;  %v1823_v61 = vmul.f32 1.442695, %v1709_v53  ;;  %v1831_v54 = vmul.f32 1.442695, %v1713_v51  ;;  %v1839_v52 = vmul.f32 1.442695, %v1717_v44 }
 0x28e   : > { %v1853_v31 = vadd.f32 %v5199_v5, %v1852_v18  ;;  %v6607_v18 = vld [vmem:[#allocation91_spill] sm:$0xff]  ;;  %v5234_v28 = vpop.eup %3774  ;;  %3794 = vpow2.f32 %v1743_v34  ;;  %v1775_v34 = vmul.f32 1.442695, %v1685_v27  ;;  %v1725_v4 = vmul.f32 1.442695, %v1660_v20  ;;  %v6616_v20 = vld [vmem:[#allocation78_spill] sm:$0xff] }
 0x28f   : > { %v5242_v16 = vpop.eup %3776  ;;  %3796 = vpow2.f32 %v1835_v19  ;;  %v1733_v11 = vmul.f32 1.442695, %v1664_v35  ;;  %v1741_v37 = vmul.f32 1.442695, %v1668_v33  ;;  %v1749_v48 = vmul.f32 1.442695, %v1672_v30 }
 0x290   : > { %v1854_v29 = vadd.f32 %v5212_v50, %v1853_v31  ;;  %v6609_v31 = vld [vmem:[#allocation95_spill] sm:$0xff]  ;;  %v5248_v24 = vpop.eup %3778  ;;  %3798 = vpow2.f32 %v1751_v63  ;;  %v6615_v63 = vld [vmem:[#allocation77_spill] sm:$0xff]  ;;  %v6621_v35 = vld [vmem:[#allocation82_spill] sm:$0xff] }
 0x291   : > { %v5259_v19 = vpop.eup %3780  ;;  %3800 = vpow2.f32 %v1843_v10  ;;  %v6612_v10 = vld [vmem:[#allocation75_spill] sm:$0xff] }
 0x292   : > { %v1855_v1 = vadd.f32 %v5220_v38, %v1854_v29  ;;  %v5268_v27 = vpop.eup %3782  ;;  %3802 = vpow2.f32 %v1759_v21  ;;  %v6617_v29 = vld [vmem:[#allocation79_spill] sm:$0xff]  ;;  %v6626_v21 = vld [vmem:[#allocation90_spill] sm:$0xff] }
 0x293   : > { %6610 = vst [vmem:[#allocation83_spill] sm:$0xff] %v5268_v27  ;;  %v5279_v57 = vpop.eup %3784  ;;  %3804 = vpow2.f32 %v1767_v23 }
 0x294   : > { %v1856_v56 = vadd.f32 %v5234_v28, %v1855_v1  ;;  %v5288_v42 = vpop.eup %3786  ;;  %3806 = vpow2.f32 %v1775_v34  ;;  %v6619_v34 = vld [vmem:[#allocation80_spill] sm:$0xff] }
 0x295   : > { %v5290_v9 = vpop.eup %3788  ;;  %3808 = vpow2.f32 %v1783_v62  ;;  %v6622_v62 = vld [vmem:[#allocation84_spill] sm:$0xff] }
 0x296   : > { %v1857_v14 = vadd.f32 %v5242_v16, %v1856_v56  ;;  %6611 = vst [vmem:[#allocation85_spill] sm:$0xff] %v5290_v9  ;;  %v5295_v51 = vpop.eup %3790  ;;  %3810 = vpow2.f32 %v1791_v39  ;;  %v6620_v39 = vld [vmem:[#allocation81_spill] sm:$0xff]  ;;  %v6624_v56 = vld [vmem:[#allocation86_spill] sm:$0xff] }
 0x297   : > { %6613 = vst [vmem:[#allocation87_spill] sm:$0xff] %v5295_v51  ;;  %v5303_v33 = vpop.eup %3792  ;;  %3812 = vpow2.f32 %v1799_v41  ;;  %v1893_v30 = vadd.f32 %v5295_v51, %v5290_v9  ;;  %v6631_v9 = vsub.f32 %v4971_v45, %v5181_v26 }
 0x298   : > { %v1858_v53 = vadd.f32 %v5248_v24, %v1857_v14  ;;  %v5310_v1 = vpop.eup %3794  ;;  %3814 = vpow2.f32 %v1807_v59  ;;  %v6625_v14 = vld [vmem:[#allocation88_spill] sm:$0xff] }
 0x299   : > { %6618 = vst [vmem:[#allocation89_spill] sm:$0xff] %v5310_v1  ;;  %3816 = vpow2.f32 %v1815_v13  ;;  %v1894_v44 = vadd.f32 %v5310_v1, %v1893_v30  ;;  %v6627_v30 = vld [vmem:[#allocation92_spill] sm:$0xff]  ;;  %v1757_v1 = vmul.f32 1.442695, %v6631_v9 }
 0x29a   : > { %v1859_v23 = vadd.f32 %v5259_v19, %v1858_v53  ;;  %v5318_v53 = vpop.eup %3796  ;;  %3818 = vpow2.f32 %v1823_v61 }
 0x29b   : > { %v5324_v59 = vpop.eup %3798  ;;  %3820 = vpow2.f32 %v1725_v4  ;;  %v6630_v4 = vsub.f32 %v5099_v7, %v5113_v25  ;;  %v6633_v7 = vsub.f32 %v4983_v47, %v5181_v26 }
 0x29c   : > { %v1860_v41 = vadd.f32 %v5268_v27, %v1859_v23  ;;  %6623 = vst [vmem:[#allocation91_spill] sm:$0xff] %v5324_v59  ;;  %v5332_v51 = vpop.eup %3800  ;;  %v1895_v23 = vadd.f32 %v5324_v59, %v1894_v44  ;;  %3822 = vpow2.f32 %v1733_v11 }
 0x29d   : > { %v5338_v61 = vpop.eup %3802  ;;  %3824 = vpow2.f32 %v1831_v54  ;;  %v1765_v25 = vmul.f32 1.442695, %v6633_v7 }
 0x29e   : > { %v1861_v13 = vadd.f32 %v5279_v57, %v1860_v41  ;;  %v5346_v27 = vpop.eup %3804  ;;  %v1847_v41 = vmul.f32 1.442695, %v6630_v4  ;;  %v1896_v11 = vadd.f32 %v5338_v61, %v1895_v23  ;;  %3826 = vpow2.f32 %v1741_v37 }
 0x29f   : > { %v5353_v8 = vpop.eup %3806  ;;  %3828 = vpow2.f32 %v1839_v52  ;;  %v6634_v37 = vsub.f32 %v4995_v22, %v5181_v26 }
 0x2a0   : > { %v1862_v44 = vadd.f32 %v5288_v42, %v1861_v13  ;;  %v5358_v59 = vpop.eup %3808  ;;  %v1897_v54 = vadd.f32 %v5346_v27, %v1896_v11  ;;  %3830 = vpow2.f32 %v1749_v48  ;;  %v6636_v48 = vsub.f32 %v6603_v17, %v5181_v26 }
 0x2a1   : > { %6632 = vst [vmem:[#allocation93_spill] sm:$0xff] %v5358_v59  ;;  %v5365_v13 = vpop.eup %3810  ;;  %v1773_v23 = vmul.f32 1.442695, %v6634_v37  ;;  %3832 = vpow2.f32 %v1847_v41  ;;  %v6637_v41 = vsub.f32 %v6604_v60, %v5181_v26  ;;  %v6641_v60 = vsub.f32 %v6607_v18, %v5181_v26 }
 0x2a2   : > { %v1863_v55 = vadd.f32 %v5303_v33, %v1862_v44  ;;  %v5370_v45 = vpop.eup %3812  ;;  %v1898_v52 = vadd.f32 %v5353_v8, %v1897_v54  ;;  %v6635_v44 = vsub.f32 %v5007_v49, %v5181_v26  ;;  %3834 = vpow2.f32 %v1757_v1 }
 0x2a3   : > { %v5377_v47 = vpop.eup %3814  ;;  %v1789_v11 = vmul.f32 1.442695, %v6636_v48  ;;  %3836 = vpow2.f32 %v1765_v25  ;;  %v1797_v54 = vmul.f32 1.442695, %v6637_v41  ;;  %v6638_v1 = vsub.f32 %v6605_v2, %v5181_v26 }
 0x2a4   : > { %v1864_v9 = vadd.f32 %v5318_v53, %v1863_v55  ;;  %v1781_v4 = vmul.f32 1.442695, %v6635_v44  ;;  %v5382_v22 = vpop.eup %3816  ;;  %v1899_v55 = vadd.f32 %v5358_v59, %v1898_v52  ;;  %3838 = vpow2.f32 %v1773_v23 }
 0x2a5   : > { %v5389_v49 = vpop.eup %3818  ;;  %v1805_v37 = vmul.f32 1.442695, %v6638_v1  ;;  %v6639_v25 = vsub.f32 %v6606_v15, %v5181_v26  ;;  %v1821_v23 = vmul.f32 1.442695, %v6641_v60  ;;  %v6642_v2 = vsub.f32 %v6612_v10, %v5257_v43 }
 0x2a6   : > { %v1865_v7 = vadd.f32 %v5332_v51, %v1864_v9  ;;  %v5394_v17 = vpop.eup %3820  ;;  %v1900_v48 = vadd.f32 %v5365_v13, %v1899_v55  ;;  %3840 = vpow2.f32 %v1781_v4  ;;  %v6643_v18 = vsub.f32 %v6608_v46, %v5181_v26 }
 0x2a7   : > { %v1813_v9 = vmul.f32 1.442695, %v6639_v25  ;;  %v5400_v52 = vpop.eup %3822  ;;  %3842 = vpow2.f32 %v1789_v11  ;;  %v1729_v41 = vmul.f32 1.442695, %v6642_v2  ;;  %v6644_v10 = vsub.f32 %v6614_v12, %v5257_v43 }
 0x2a8   : > { %v1866_v44 = vrot.slane %v1865_v7, 4  ;;  %6640 = vst [vmem:[#allocation95_spill] sm:$0xff] %v5400_v52  ;;  %v5408_v1 = vpop.eup %3824  ;;  %v1901_v4 = vadd.f32 %v5370_v45, %v1900_v48  ;;  %3844 = vpow2.f32 %v1797_v54  ;;  %v1872_v15 = vadd.f32 %v5400_v52, %v5394_v17 }
 0x2a9   : > { %v5413_v55 = vpop.eup %3826  ;;  %3846 = vpow2.f32 %v1805_v37  ;;  %v1829_v11 = vmul.f32 1.442695, %v6643_v18  ;;  %v1737_v25 = vmul.f32 1.442695, %v6644_v10  ;;  %v6645_v37 = vsub.f32 %v6609_v31, %v5181_v26 }
 0x2aa   : > { %v1867_v59 = vadd.f32 %v1866_v44, %v1865_v7  ;;  %v5421_v60 = vpop.eup %3828  ;;  %v1902_v44 = vadd.f32 %v5377_v47, %v1901_v4  ;;  %3848 = vpow2.f32 %v1813_v9  ;;  %v1873_v54 = vadd.f32 %v5413_v55, %v1872_v15 }
 0x2ab   : > { %v5425_v48 = vpop.eup %3830  ;;  %3850 = vpow2.f32 %v1821_v23  ;;  %v1837_v46 = vmul.f32 1.442695, %v6645_v37  ;;  %v6646_v2 = vsub.f32 %v6615_v63, %v5257_v43  ;;  %v6647_v23 = vsub.f32 %v6616_v20, %v5257_v43 }
 0x2ac   : > { %v1868_v7 = vrot.slane %v1867_v59, 2  ;;  %v5433_v18 = vpop.eup %3832  ;;  %v1903_v52 = vadd.f32 %v5382_v22, %v1902_v44  ;;  %v1874_v9 = vadd.f32 %v5425_v48, %v1873_v54  ;;  %3852 = vpow2.f32 %v1729_v41 }
 0x2ad   : > { %v1745_v12 = vmul.f32 1.442695, %v6646_v2  ;;  %v5437_v4 = vpop.eup %3834  ;;  %3854 = vpow2.f32 %v1737_v25  ;;  %v1753_v31 = vmul.f32 1.442695, %v6647_v23  ;;  %v6648_v41 = vsub.f32 %v5103_v58, %v5181_v26 }
 0x2ae   : > { %v1869_v10 = vadd.f32 %v1868_v7, %v1867_v59  ;;  %v5442_v15 = vpop.eup %3836  ;;  %v1904_v63 = vadd.f32 %v5389_v49, %v1903_v52  ;;  %3856 = vpow2.f32 %v1829_v11  ;;  %v1875_v59 = vadd.f32 %v5437_v4, %v1874_v9 }
 0x2af   : > { %v5446_v7 = vpop.eup %3838  ;;  %v1845_v44 = vmul.f32 1.442695, %v6648_v41  ;;  %3858 = vpow2.f32 %v1745_v12  ;;  %v6649_v25 = vsub.f32 %v6617_v29, %v5257_v43  ;;  %v6650_v58 = vsub.f32 %v6619_v34, %v5257_v43 }
 0x2b0   : > { %v1870_v37 = vrot.slane %v1869_v10, 1  ;;  %v5454_v54 = vpop.eup %3840  ;;  %v1905_v23 = vadd.f32 %v5408_v1, %v1904_v63  ;;  %3860 = vpow2.f32 %v1837_v46  ;;  %v1876_v52 = vadd.f32 %v5442_v15, %v1875_v59 }
 0x2b1   : > { %v1761_v20 = vmul.f32 1.442695, %v6649_v25  ;;  %v5458_v11 = vpop.eup %3842  ;;  %3862 = vpow2.f32 %v1753_v31  ;;  %v1769_v26 = vmul.f32 1.442695, %v6650_v58  ;;  %v6652_v31 = vsub.f32 %v6621_v35, %v5257_v43 }
 0x2b2   : > { %v1871_v2 = vadd.f32 %v1870_v37, %v1869_v10  ;;  %v5463_v12 = vpop.eup %3844  ;;  %v1906_v29 = vadd.f32 %v5421_v60, %v1905_v23  ;;  %v1877_v9 = vadd.f32 %v5446_v7, %v1876_v52  ;;  %v6651_v10 = vsub.f32 %v6620_v39, %v5257_v43 }
 0x2b3   : > { %v5470_v37 = vpop.eup %3846  ;;  %v1785_v63 = vmul.f32 1.442695, %v6652_v31  ;;  %v6653_v25 = vsub.f32 %v6622_v62, %v5257_v43  ;;  %v6656_v62 = vsub.f32 %v6626_v21, %v5257_v43 }
 0x2b4   : > { %3864 = vrcp.f32 %v1871_v2  ;;  %v1777_v46 = vmul.f32 1.442695, %v6651_v10  ;;  %v5475_v34 = vpop.eup %3848  ;;  %v1907_v59 = vadd.f32 %v5433_v18, %v1906_v29  ;;  %v1878_v41 = vadd.f32 %v5454_v54, %v1877_v9 }
 0x2b5   : > { %3866 = vpow2.f32 %v1761_v20  ;;  %v1793_v2 = vmul.f32 1.442695, %v6653_v25  ;;  %v5482_v39 = vpop.eup %3850  ;;  %v6654_v20 = vsub.f32 %v6624_v56, %v5257_v43  ;;  %v6657_v56 = vsub.f32 %v6627_v30, %v5257_v43 }
 0x2b6   : > { %3868 = vpow2.f32 %v1845_v44  ;;  %v5487_v35 = vpop.eup %3852  ;;  %v1908_v52 = vrot.slane %v1907_v59, 4  ;;  %v1879_v58 = vadd.f32 %v5458_v11, %v1878_v41  ;;  %v6655_v44 = vsub.f32 %v6625_v14, %v5257_v43 }
 0x2b7   : > { %3870 = vpow2.f32 %v1769_v26  ;;  %v1801_v23 = vmul.f32 1.442695, %v6654_v20  ;;  %v5493_v9 = vpop.eup %3854  ;;  %v1817_v26 = vmul.f32 1.442695, %v6656_v62  ;;  %v1825_v10 = vmul.f32 1.442695, %v6657_v56 }
 0x2b8   : > { %3872 = vpow2.f32 %v1777_v46  ;;  %v1809_v29 = vmul.f32 1.442695, %v6655_v44  ;;  %v5501_v31 = vpop.eup %3856  ;;  %v1909_v25 = vadd.f32 %v1908_v52, %v1907_v59  ;;  %v1880_v46 = vadd.f32 %v5463_v12, %v1879_v58 }
 0x2b9   : > { %3874 = vpow2.f32 %v1785_v63  ;;  %v1914_v14 = vadd.f32 %v5493_v9, %v5487_v35  ;;  %v5506_v41 = vpop.eup %3858  ;;  %v6659_v59 = vsub.f32 %v6628_v40, %v5257_v43  ;;  %v6660_v52 = vsub.f32 %v6629_v36, %v5257_v43 }
 0x2ba   : > { %3876 = vpow2.f32 %v1793_v2  ;;  %v5508_v63 = vpop.eup %3860  ;;  %v1910_v21 = vrot.slane %v1909_v25, 2  ;;  %v1881_v20 = vadd.f32 %v5470_v37, %v1880_v46 }
 0x2bb   : > { %3878 = vpow2.f32 %v1801_v23  ;;  %v1915_v30 = vadd.f32 %v5506_v41, %v1914_v14  ;;  %v5512_v44 = vpop.eup %3862  ;;  %v1833_v2 = vmul.f32 1.442695, %v6659_v59  ;;  %v1841_v58 = vmul.f32 1.442695, %v6660_v52 }
 0x2bc   : > { %3880 = vpow2.f32 %v1809_v29  ;;  %6658 = vst [vmem:[#allocation75_spill] sm:$0xff] %v5512_v44  ;;  %v1911_v62 = vadd.f32 %v1910_v21, %v1909_v25  ;;  %v1882_v56 = vadd.f32 %v5475_v34, %v1881_v20 }
 0x2bd   : > { %3882 = vpow2.f32 %v1817_v26  ;;  %v1916_v29 = vadd.f32 %v5512_v44, %v1915_v30  ;;  %v6665_v44 = vld [vmem:[#allocation83_spill] sm:$0xff] }
 0x2be   : > { %v3865_v23 = vpop.eup %3864  ;;  %3884 = vpow2.f32 %v1825_v10  ;;  %v1912_v21 = vrot.slane %v1911_v62, 1  ;;  %v1883_v10 = vadd.f32 %v5482_v39, %v1882_v56 }
 0x2bf   : > { %v5522_v46 = vpop.eup %3866  ;;  %v5525_v14 = vmul.f32 %v3865_v23, %v5184_v6  ;;  %v5528_v26 = vmul.f32 %v3865_v23, %v5186_v3  ;;  %v5531_v40 = vmul.f32 %v3865_v23, %v5190_v32  ;;  %v5534_v36 = vmul.f32 %v3865_v23, %v5199_v5 }
 0x2c0   : > { %6661 = vst [vmem:[#allocation76_spill] sm:$0xff] %v5522_v46  ;;  %v5536_v25 = vpop.eup %3868  ;;  %v1917_v20 = vadd.f32 %v5522_v46, %v1916_v29  ;;  %v5541_v30 = vmul.f32 %v3865_v23, %v5212_v50  ;;  %v5550_v5 = vmul.f32 %v3865_v23, %v5220_v38  ;;  %v5553_v59 = vmul.f32 %v3865_v23, %v5234_v28 }
 0x2c1   : > { %v5543_v6 = vpop.eup %3870  ;;  %v1913_v56 = vadd.f32 %v1912_v21, %v1911_v62  ;;  %v1884_v50 = vadd.f32 %v5501_v31, %v1883_v10  ;;  %v5560_v46 = vmul.f32 %v3865_v23, %v5242_v16  ;;  %v5567_v38 = vmul.f32 %v3865_v23, %v5248_v24 }
 0x2c2   : > { %6662 = vst [vmem:[#allocation77_spill] sm:$0xff] %v5553_v59  ;;  %v5555_v52 = vpop.eup %3872  ;;  %v1918_v29 = vadd.f32 %v5543_v6, %v1917_v20  ;;  %v5570_v28 = vmul.f32 %v3865_v23, %v5259_v19  ;;  %v5573_v62 = vmul.f32 %v3865_v23, %v6665_v44  ;;  %v5586_v19 = vmul.f32 %v3865_v23, %v5279_v57 }
 0x2c3   : > { %v5562_v3 = vpop.eup %3874  ;;  %6663 = vst [vmem:[#allocation78_spill] sm:$0xff] %v5567_v38  ;;  %3886 = vrcp.f32 %v1913_v56  ;;  %v1885_v16 = vadd.f32 %v5508_v63, %v1884_v50  ;;  %v5589_v44 = vmul.f32 %v3865_v23, %v5288_v42  ;;  %v5592_v56 = vmul.f32 %v3865_v23, %v5303_v33 }
 0x2c4   : > { %6664 = vst [vmem:[#allocation79_spill] sm:$0xff] %v5570_v28  ;;  %6666 = vst [vmem:[#allocation80_spill] sm:$0xff] %v5573_v62  ;;  %v5575_v21 = vpop.eup %3876  ;;  %v1919_v10 = vadd.f32 %v5555_v52, %v1918_v29  ;;  %v5599_v59 = vmul.f32 %v3865_v23, %v5318_v53  ;;  %v5602_v24 = vmul.f32 %v3865_v23, %v5332_v51  ;;  %3888 = vpow2.f32 %v1833_v2  ;;  %v6673_v62 = vld [vmem:[#allocation87_spill] sm:$0xff] }
 0x2c5   : > { %v5581_v32 = vpop.eup %3878  ;;  %6667 = vst [vmem:[#allocation81_spill] sm:$0xff] %v5586_v19  ;;  %6668 = vst [vmem:[#allocation82_spill] sm:$0xff] %v5589_v44  ;;  %v1886_v29 = vadd.f32 %v5536_v25, %v1885_v16  ;;  %v6671_v42 = vsub.f32 %v5105_v0, %v5257_v43  ;;  %3890 = vpow2.f32 %v1841_v58  ;;  %v6672_v44 = vld [vmem:[#allocation85_spill] sm:$0xff]  ;;  %v6675_v58 = vld [vmem:[#allocation91_spill] sm:$0xff] }
 0x2c6   : > { %6669 = vst [vmem:[#allocation84_spill] sm:$0xff] %v5592_v56  ;;  %v5594_v50 = vpop.eup %3880  ;;  %v1920_v20 = vadd.f32 %v5562_v3, %v1919_v10  ;;  %6670 = vst [vmem:[#allocation86_spill] sm:$0xff] %v5599_v59  ;;  %v6674_v19 = vld [vmem:[#allocation89_spill] sm:$0xff] }
 0x2c7   : > { %v5604_v57 = vpop.eup %3882  ;;  %v1849_v33 = vmul.f32 1.442695, %v6671_v42  ;;  %v1887_v53 = vrot.slane %v1886_v29, 4 }
 0x2c8   : > { %v5613_v10 = vpop.eup %3884  ;;  %v1921_v28 = vadd.f32 %v5575_v21, %v1920_v20 }
 0x2c9   : > { %v1888_v2 = vadd.f32 %v1887_v53, %v1886_v29  ;;  %3892 = vpow2.f32 %v1849_v33 }
 0x2ca   : > { %v1922_v23 = vadd.f32 %v5581_v32, %v1921_v28 }
 0x2cb   : > { %v1889_v0 = vrot.slane %v1888_v2, 2 }
 0x2cc   : > { %v1923_v43 = vadd.f32 %v5594_v50, %v1922_v23 }
 0x2cd   : > { %v3887_v42 = vpop.eup %3886  ;;  %v1890_v38 = vadd.f32 %v1889_v0, %v1888_v2  ;;  %v6676_v0 = vld [vmem:[#allocation93_spill] sm:$0xff] }
 0x2ce   : > { %v1924_v16 = vadd.f32 %v5604_v57, %v1923_v43  ;;  %v5622_v56 = vmul.f32 %v3887_v42, %v6672_v44  ;;  %v5625_v20 = vmul.f32 %v3887_v42, %v6673_v62  ;;  %v5628_v51 = vmul.f32 %v3887_v42, %v6674_v19  ;;  %v5640_v44 = vpop.eup %3888 }
 0x2cf   : > { %v5631_v29 = vmul.f32 %v3887_v42, %v6675_v58  ;;  %v1891_v28 = vrot.slane %v1890_v38, 1  ;;  %v5635_v53 = vmul.f32 %v3887_v42, %v5338_v61  ;;  %v5638_v2 = vmul.f32 %v3887_v42, %v5346_v27  ;;  %v5658_v59 = vpop.eup %3890 }
 0x2d0   : > { %v1925_v33 = vadd.f32 %v5613_v10, %v1924_v16  ;;  %v5647_v23 = vmul.f32 %v3887_v42, %v5353_v8  ;;  %v5650_v43 = vmul.f32 %v3887_v42, %v6676_v0  ;;  %v5656_v58 = vmul.f32 %v3887_v42, %v5365_v13 }
 0x2d1   : > { %v1892_v16 = vadd.f32 %v1891_v28, %v1890_v38  ;;  %v5663_v8 = vmul.f32 %v3887_v42, %v5370_v45  ;;  %v5666_v0 = vmul.f32 %v3887_v42, %v5377_v47  ;;  %v5669_v38 = vmul.f32 %v3887_v42, %v5382_v22 }
 0x2d2   : > { %v1926_v61 = vadd.f32 %v5640_v44, %v1925_v33  ;;  %6677 = vst [vmem:[#allocation88_spill] sm:$0xff] %v5656_v58  ;;  %v5673_v13 = vmul.f32 %v3887_v42, %v5389_v49  ;;  %v5676_v33 = vmul.f32 %v3887_v42, %v5408_v1  ;;  %v5685_v22 = vmul.f32 %v3887_v42, %v5421_v60  ;;  %v6682_v60 = vld [vmem:[#allocation95_spill] sm:$0xff] }
 0x2d3   : > { %6678 = vst [vmem:[#allocation90_spill] sm:$0xff] %v5663_v8  ;;  %6679 = vst [vmem:[#allocation92_spill] sm:$0xff] %v5666_v0  ;;  %3894 = vrcp.f32 %v1892_v16  ;;  %v5678_v27 = vpop.eup %3892  ;;  %v5688_v16 = vmul.f32 %v3887_v42, %v5433_v18 }
 0x2d4   : > { %6680 = vst [vmem:[#allocation94_spill] sm:$0xff] %v5669_v38  ;;  %v1927_v28 = vadd.f32 %v5658_v59, %v1926_v61  ;;  %6681 = vst [vmem:[#allocation96_spill] sm:$0xff] %v5685_v22 }
 0x2d6   : > { %v1928_v49 = vadd.f32 %v5678_v27, %v1927_v28 }
 0x2d8   : > { %v1929_v19 = vrot.slane %v1928_v49, 4 }
 0x2da   : > { %v1930_v62 = vadd.f32 %v1929_v19, %v1928_v49 }
 0x2dc   : > { %v1931_v45 = vrot.slane %v1930_v62, 2 }
 0x2dd   : > { %v3895_v58 = vpop.eup %3894 }
 0x2de   : > { %v1932_v8 = vadd.f32 %v1931_v45, %v1930_v62  ;;  %v1940_v47 = vmul.f32 %v3895_v58, %v5394_v17  ;;  %v1944_v0 = vmul.f32 %v3895_v58, %v6682_v60  ;;  %v1948_v18 = vmul.f32 %v3895_v58, %v5413_v55 }
 0x2df   : > { %v1952_v42 = vmul.f32 %v3895_v58, %v5425_v48  ;;  %v1956_v38 = vmul.f32 %v3895_v58, %v5437_v4  ;;  %v1960_v1 = vmul.f32 %v3895_v58, %v5442_v15  ;;  %v1964_v61 = vmul.f32 %v3895_v58, %v5446_v7 }
 0x2e0   : > { %v1933_v28 = vrot.slane %v1932_v8, 1  ;;  %v2004_v22 = vpack.c.bf16 %v1944_v0, %v1940_v47  ;;  %v1968_v49 = vmul.f32 %v3895_v58, %v5454_v54  ;;  %v1972_v62 = vmul.f32 %v3895_v58, %v5458_v11  ;;  %v6687_v47 = vld [vmem:[#allocation76_spill] sm:$0xff] }
 0x2e1   : > { %v2008_v19 = vpack.c.bf16 %v1952_v42, %v1948_v18  ;;  %v2012_v45 = vpack.c.bf16 %v1960_v1, %v1956_v38  ;;  %v1976_v60 = vmul.f32 %v3895_v58, %v5463_v12  ;;  %v1980_v55 = vmul.f32 %v3895_v58, %v5470_v37 }
 0x2e2   : > { %v1934_v17 = vadd.f32 %v1933_v28, %v1932_v8  ;;  %2099 = vmatprep.subr.bf16.mxu0 %v2004_v22  ;;  %v2016_v48 = vpack.c.bf16 %v1968_v49, %v1964_v61  ;;  %v1984_v4 = vmul.f32 %v3895_v58, %v5475_v34  ;;  %v1988_v15 = vmul.f32 %v3895_v58, %v5482_v39 }
 0x2e3   : > { %v1992_v7 = vmul.f32 %v3895_v58, %v5501_v31  ;;  %v6683_v54 = vpack.c.bf16 %v5528_v26, %v5525_v14  ;;  %v2020_v11 = vpack.c.bf16 %v1976_v60, %v1972_v62  ;;  %v1996_v8 = vmul.f32 %v3895_v58, %v5508_v63  ;;  %v6700_v60 = vld [vmem:[#allocation82_spill] sm:$0xff] }
 0x2e4   : > { %3896 = vrcp.f32 %v1934_v17  ;;  %v2000_v12 = vmul.f32 %v3895_v58, %v5536_v25  ;;  %v2024_v37 = vpack.c.bf16 %v1984_v4, %v1980_v55  ;;  %v6684_v34 = vpack.c.bf16 %v5534_v36, %v5531_v40  ;;  %v6686_v25 = vld [vmem:[#allocation75_spill] sm:$0xff] }
 0x2e5   : > { %2100 = vmatpush1.bf16.msra.mxu0 %v6683_v54  ;;  %v2028_v0 = vpack.c.bf16 %v1992_v7, %v1988_v15  ;;  %v6685_v39 = vpack.c.bf16 %v5550_v5, %v5541_v30  ;;  %v6688_v30 = vld [vmem:[#allocation77_spill] sm:$0xff]  ;;  %v6690_v49 = vpack.c.bf16 %v5625_v20, %v5622_v56  ;;  %v6698_v20 = vpack.c.bf16 %v5638_v2, %v5635_v53  ;;  %v6705_v53 = vld [vmem:[#allocation90_spill] sm:$0xff]  ;;  %v6706_v2 = vld [vmem:[#allocation88_spill] sm:$0xff] }
 0x2e6   : > { %2101 = vmatprep.subr.bf16.mxu0 %v2008_v19  ;;  %v2032_v38 = vpack.c.bf16 %v2000_v12, %v1996_v8  ;;  %v6689_v5 = vpack.c.bf16 %v5560_v46, %v6688_v30  ;;  %v6707_v15 = vpack.c.bf16 %v6705_v53, %v6706_v2  ;;  %v6708_v7 = vmov 0   ;;  %v3745_v54 = vld [vmem:[%s5232_s18 + $0x8] sm:$0xff]   ;;  %v6729_v2 = vld [vmem:[#allocation29_spill] sm:$0xff] }
 0x2e7   : > { %v6710_v8 = vld [vmem:[#allocation92_spill] sm:$0xff] }
 0x2e9   : > { %2102 = vmatpush1.bf16.msra.mxu0 %v6684_v34 }
 0x2ea   : > { %2103 = vmatprep.subr.bf16.mxu0 %v2012_v45  ;;  %v6696_v45 = vld [vmem:[#allocation80_spill] sm:$0xff] }
 0x2ed   : > { %2104 = vmatpush1.bf16.msra.mxu0 %v6685_v39 }
 0x2ee   : > { %2105 = vmatprep.subr.bf16.mxu0 %v2016_v48  ;;  %v3897_v31 = vpop.eup %3896  ;;  %v6703_v48 = vld [vmem:[#allocation86_spill] sm:$0xff] }
 0x2ef   : > { %v1942_v14 = vmul.f32 %v3897_v31, %v5487_v35  ;;  %v1946_v63 = vmul.f32 %v3897_v31, %v5493_v9  ;;  %v1950_v26 = vmul.f32 %v3897_v31, %v5506_v41  ;;  %v1954_v58 = vmul.f32 %v3897_v31, %v6686_v25 }
 0x2f0   : > { %v1958_v22 = vmul.f32 %v3897_v31, %v6687_v47  ;;  %v1962_v40 = vmul.f32 %v3897_v31, %v5543_v6  ;;  %v1966_v36 = vmul.f32 %v3897_v31, %v5555_v52  ;;  %v1970_v1 = vmul.f32 %v3897_v31, %v5562_v3  ;;  %v6717_v47 = vld [vmem:[#allocation13_spill] sm:$0xff] }
 0x2f1   : > { %2106 = vmatpush1.bf16.msra.mxu0 %v6689_v5  ;;  %v2006_v61 = vpack.c.bf16 %v1946_v63, %v1942_v14  ;;  %v2010_v35 = vpack.c.bf16 %v1954_v58, %v1950_v26  ;;  %v1974_v9 = vmul.f32 %v3897_v31, %v5575_v21  ;;  %v1978_v41 = vmul.f32 %v3897_v31, %v5581_v32  ;;  %v6691_v21 = vld [vmem:[#allocation79_spill] sm:$0xff]  ;;  %v6692_v32 = vld [vmem:[#allocation78_spill] sm:$0xff]  ;;  %v6715_v14 = vld [vmem:[#allocation17_spill] sm:$0xff] }
 0x2f2   : > { %2107 = vmatprep.subr.bf16.mxu0 %v2020_v11  ;;  %v2014_v18 = vpack.c.bf16 %v1962_v40, %v1958_v22  ;;  %v2018_v42 = vpack.c.bf16 %v1970_v1, %v1966_v36  ;;  %v1982_v28 = vmul.f32 %v3897_v31, %v5594_v50  ;;  %v1986_v6 = vmul.f32 %v3897_v31, %v5604_v57  ;;  %v6709_v11 = vld [vmem:[#allocation94_spill] sm:$0xff]  ;;  %v6716_v26 = vld [vmem:[#allocation11_spill] sm:$0xff] }
 0x2f3   : > { %2212 = vmatprep.subr.bf16.mxu1 %v2006_v61  ;;  %v2022_v52 = vpack.c.bf16 %v1978_v41, %v1974_v9  ;;  %v1990_v3 = vmul.f32 %v3897_v31, %v5613_v10  ;;  %v1994_v46 = vmul.f32 %v3897_v31, %v5640_v44  ;;  %v1998_v19 = vmul.f32 %v3897_v31, %v5658_v59  ;;  %v6695_v59 = vld [vmem:[#allocation81_spill] sm:$0xff]  ;;  %v6718_v40 = vld [vmem:[#allocation15_spill] sm:$0xff] }
 0x2f4   : > { %2213 = vmatpush1.bf16.msra.mxu1 %v6690_v49  ;;  %v6693_v62 = vpack.c.bf16 %v6691_v21, %v6692_v32  ;;  %v2026_v50 = vpack.c.bf16 %v1986_v6, %v1982_v28  ;;  %v2002_v57 = vmul.f32 %v3897_v31, %v5678_v27  ;;  %v6694_v44 = vpack.c.bf16 %v5631_v29, %v5628_v51  ;;  %v6699_v27 = vld [vmem:[#allocation84_spill] sm:$0xff]  ;;  %v3744_v51 = vld [vmem:[%s5232_s18] sm:$0xff]   ;;  %v6719_v9 = vld [vmem:[#allocation25_spill] sm:$0xff] }
 0x2f5   : > { %2214 = vmatprep.subr.bf16.mxu1 %v2010_v35  ;;  %v2030_v17 = vpack.c.bf16 %v1994_v46, %v1990_v3  ;;  %v6697_v56 = vpack.c.bf16 %v6695_v59, %v6696_v45  ;;  %v6701_v55 = vpack.c.bf16 %v6699_v27, %v6700_v60  ;;  %v6702_v29 = vpack.c.bf16 %v5650_v43, %v5647_v23  ;;  %v3746_v23 = vld [vmem:[%s5232_s18 + $0x10] sm:$0xff]   ;;  %v6713_v43 = vld [vmem:[#allocation96_spill] sm:$0xff]  ;;  %v6722_v3 = vld [vmem:[#allocation23_spill] sm:$0xff] }
 0x2f6   : > { %2108 = vmatpush1.bf16.msra.mxu0 %v6693_v62  ;;  %v2034_v10 = vpack.c.bf16 %v2002_v57, %v1998_v19  ;;  %v6704_v4 = vpack.c.bf16 %v5602_v24, %v6703_v48  ;;  %v6711_v12 = vpack.c.bf16 %v6709_v11, %v6710_v8  ;;  %v6712_v24 = vpack.c.bf16 %v5676_v33, %v5673_v13  ;;  %v3748_v13 = vld [vmem:[%s5232_s18 + $0x20] sm:$0xff]   ;;  %v3749_v33 = vld [vmem:[%s5232_s18 + $0x28] sm:$0xff]   ;;  %v6721_v6 = vld [vmem:[#allocation21_spill] sm:$0xff] }
 0x2f7   : > { %2109 = vmatprep.subr.bf16.mxu0 %v2024_v37  ;;  %v6714_v37 = vpack.c.bf16 %v5688_v16, %v6713_v43  ;;  %v3750_v16 = vld [vmem:[%s5232_s18 + $0x30] sm:$0xff]   ;;  %v6724_v59 = vld [vmem:[#allocation12_spill] sm:$0xff]  ;;  %v6726_v60 = vld [vmem:[#allocation27_spill] sm:$0xff] }
 0x2f8   : > { %2215 = vmatpush1.bf16.msra.mxu1 %v6694_v44 }
 0x2f9   : > { %2216 = vmatprep.subr.bf16.mxu1 %v2014_v18  ;;  %v6720_v18 = vld [vmem:[#allocation19_spill] sm:$0xff] }
 0x2fa   : > { %2110 = vmatpush1.bf16.msra.mxu0 %v6697_v56 }
 0x2fb   : > { %2111 = vmatprep.subr.bf16.mxu0 %v2028_v0  ;;  %v3747_v0 = vld [vmem:[%s5232_s18 + $0x18] sm:$0xff]  }
 0x2fc   : > { %2217 = vmatpush1.bf16.msra.mxu1 %v6698_v20  ;;  %v6725_v20 = vld [vmem:[#allocation33_spill] sm:$0xff] }
 0x2fd   : > { %2218 = vmatprep.subr.bf16.mxu1 %v2018_v42 }
 0x2fe   : > { %2112 = vmatpush1.bf16.msra.mxu0 %v6701_v55 }
 0x2ff   : > { %2113 = vmatprep.subr.bf16.mxu0 %v2032_v38  ;;  %v3751_v38 = vld [vmem:[%s5232_s18 + $0x38] sm:$0xff]  }
 0x300   : > { %2219 = vmatpush1.bf16.msra.mxu1 %v6702_v29  ;;  %v6727_v29 = vld [vmem:[#allocation14_spill] sm:$0xff] }
 0x301   : > { %2220 = vmatprep.subr.bf16.mxu1 %v2022_v52 }
 0x302   : > { %2114 = vmatpush1.bf16.msra.mxu0 %v6704_v4  ;;  %v6728_v4 = vld [vmem:[#allocation16_spill] sm:$0xff] }
 0x304   : > { %2221 = vmatpush1.bf16.msra.mxu1 %v6707_v15 }
 0x305   : > { %2132 = vmatmul.mubr.bf16.vlgmr.msra.gmra.mrb[64].mxu0 %v3744_v51  ;;  %2222 = vmatprep.subr.bf16.mxu1 %v2026_v50 }
 0x306   : > { %2141 = vmatprep.mubr.bf16.mxu0 %v6708_v7 }
 0x308   : > { %2223 = vmatpush1.bf16.msra.mxu1 %v6711_v12 }
 0x309   : > { %2224 = vmatprep.subr.bf16.mxu1 %v2030_v17 }
 0x30c   : > { %2225 = vmatpush1.bf16.msra.mxu1 %v6712_v24 }
 0x30d   : > { %2142 = vmatmul.mubr.bf16.gmra.mrb[68].mxu0 %v3745_v54  ;;  %2226 = vmatprep.subr.bf16.mxu1 %v2034_v10  ;;  %v6723_v10 = vld [vmem:[#allocation18_spill] sm:$0xff] }
 0x30e   : > { %2151 = vmatprep.mubr.bf16.mxu0 %v6708_v7 }
 0x310   : > { %2227 = vmatpush1.bf16.msra.mxu1 %v6714_v37 }
 0x313   : > { %2245 = vmatmul.mubr.bf16.vlgmr.msra.gmra.mrb[64].mxu1 %v3744_v51 }
 0x314   : > { %2254 = vmatprep.mubr.bf16.mxu1 %v6708_v7 }
 0x315   : > { %2152 = vmatmul.mubr.bf16.gmra.mrb[72].mxu0 %v3746_v23 }
 0x316   : > { %2161 = vmatprep.mubr.bf16.mxu0 %v6708_v7 }
 0x31b   : > { %2255 = vmatmul.mubr.bf16.gmra.mrb[68].mxu1 %v3745_v54  ;;  %v6730_v54 = vld [vmem:[#allocation31_spill] sm:$0xff] }
 0x31c   : > { %2264 = vmatprep.mubr.bf16.mxu1 %v6708_v7 }
 0x31d   : > { %2162 = vmatmul.mubr.bf16.gmra.mrb[76].mxu0 %v3747_v0 }
 0x31e   : > { %2171 = vmatprep.mubr.bf16.mxu0 %v6708_v7 }
 0x323   : > { %2265 = vmatmul.mubr.bf16.gmra.mrb[72].mxu1 %v3746_v23 }
 0x324   : > { %2274 = vmatprep.mubr.bf16.mxu1 %v6708_v7 }
 0x325   : > { %2172 = vmatmul.mubr.bf16.gmra.mrb[80].mxu0 %v3748_v13 }
 0x326   : > { %2181 = vmatprep.mubr.bf16.mxu0 %v6708_v7 }
 0x32b   : > { %2275 = vmatmul.mubr.bf16.gmra.mrb[76].mxu1 %v3747_v0 }
 0x32c   : > { %2284 = vmatprep.mubr.bf16.mxu1 %v6708_v7 }
 0x32d   : > { %2182 = vmatmul.mubr.bf16.gmra.mrb[84].mxu0 %v3749_v33 }
 0x32e   : > { %2191 = vmatprep.mubr.bf16.mxu0 %v6708_v7 }
 0x333   : > { %2285 = vmatmul.mubr.bf16.gmra.mrb[80].mxu1 %v3748_v13 }
 0x334   : > { %2294 = vmatprep.mubr.bf16.mxu1 %v6708_v7 }
 0x335   : > { %2192 = vmatmul.mubr.bf16.gmra.mrb[88].mxu0 %v3750_v16 }
 0x336   : > { %2201 = vmatprep.mubr.bf16.mxu0 %v6708_v7 }
 0x33b   : > { %2295 = vmatmul.mubr.bf16.gmra.mrb[84].mxu1 %v3749_v33 }
 0x33c   : > { %2304 = vmatprep.mubr.bf16.mxu1 %v6708_v7 }
 0x33d   : > { %2202 = vmatmul.mubr.bf16.gmra.mrb[92].mxu0 %v3751_v38 }
 0x33e   : > { %2613 = vmatprep.mubr.bf16.mxu0 %v6708_v7 }
 0x343   : > { %2305 = vmatmul.mubr.bf16.gmra.mrb[88].mxu1 %v3750_v16 }
 0x344   : > { %2314 = vmatprep.mubr.bf16.mxu1 %v6708_v7 }
 0x34b   : > { %2315 = vmatmul.mubr.bf16.gmra.mrb[92].mxu1 %v3751_v38  ;;  %v6731_v38 = vld [vmem:[#allocation26_spill] sm:$0xff] }
 0x34c   : > { %2726 = vmatprep.mubr.bf16.mxu1 %v6708_v7 }
 0x3d8   : > { %v2133_v34 = vpop.f32.mrb[64].mxu0 }
 0x3d9   : > { %v2135_v39 = vpop.f32.mrb[65].mxu0  ;;  %v2325_v63 = vadd.f32 %v2133_v34, %v6715_v14 }
 0x3da   : > { %v2137_v31 = vpop.f32.mrb[66].mxu0  ;;  %v2326_v22 = vadd.f32 %v2135_v39, %v6717_v47  ;;  %v6732_v39 = vld [vmem:[#allocation20_spill] sm:$0xff] }
 0x3db   : > { %v2329_v25 = vadd.f32 %v2137_v31, %v6716_v26  ;;  %v2139_v58 = vpop.f32.mrb[67].mxu0 }
 0x3dc   : > { %v2330_v36 = vadd.f32 %v2139_v58, %v6718_v40 }
 0x3dd   : > { %v2405_v1 = vpack.c.bf16 %v2329_v25, %v2325_v63  ;;  %v6733_v63 = vld [vmem:[#allocation41_spill] sm:$0xff]  ;;  %v6734_v25 = vld [vmem:[#allocation36_spill] sm:$0xff] }
 0x3de   : > { %v2406_v30 = vpack.c.bf16 %v2330_v36, %v2326_v22  ;;  %v6735_v22 = vld [vmem:[#allocation22_spill] sm:$0xff]  ;;  %v6736_v36 = vld [vmem:[#allocation24_spill] sm:$0xff] }
 0x3e0   : > { %v2143_v5 = vpop.f32.mrb[68].mxu0  ;;  %2581 = vmatprep.subr.bf16.mxu0 %v2406_v30  ;;  %v6737_v30 = vld [vmem:[#allocation35_spill] sm:$0xff] }
 0x3e1   : > { %v2145_v61 = vpop.f32.mrb[69].mxu0  ;;  %2582 = vmatpush1.bf16.msra.mxu0 %v2405_v1  ;;  %v2333_v41 = vadd.f32 %v2143_v5, %v6719_v9 }
 0x3e2   : > { %v2147_v35 = vpop.f32.mrb[70].mxu0  ;;  %v2334_v52 = vadd.f32 %v2145_v61, %v6721_v6  ;;  %v6738_v61 = vld [vmem:[#allocation39_spill] sm:$0xff] }
 0x3e3   : > { %v2337_v42 = vadd.f32 %v2147_v35, %v6720_v18  ;;  %v2149_v28 = vpop.f32.mrb[71].mxu0 }
 0x3e4   : > { %v2338_v46 = vadd.f32 %v2149_v28, %v6722_v3 }
 0x3e5   : > { %v2409_v19 = vpack.c.bf16 %v2337_v42, %v2333_v41 }
 0x3e6   : > { %v2410_v49 = vpack.c.bf16 %v2338_v46, %v2334_v52  ;;  %v2246_v21 = vpop.f32.mrb[64].mxu1 }
 0x3e7   : > { %v2248_v62 = vpop.f32.mrb[65].mxu1  ;;  %v2327_v44 = vadd.f32 %v2246_v21, %v6723_v10  ;;  %v6742_v10 = vld [vmem:[#allocation44_spill] sm:$0xff] }
 0x3e8   : > { %v2153_v32 = vpop.f32.mrb[72].mxu0  ;;  %2583 = vmatprep.subr.bf16.mxu0 %v2410_v49  ;;  %v2250_v57 = vpop.f32.mrb[66].mxu1  ;;  %v2328_v48 = vadd.f32 %v2248_v62, %v6727_v29  ;;  %v6739_v49 = vld [vmem:[#allocation34_spill] sm:$0xff] }
 0x3e9   : > { %v2155_v50 = vpop.f32.mrb[73].mxu0  ;;  %2584 = vmatpush1.bf16.msra.mxu0 %v2409_v19  ;;  %v2331_v45 = vadd.f32 %v2250_v57, %v6724_v59  ;;  %v2252_v56 = vpop.f32.mrb[67].mxu1  ;;  %v2341_v27 = vadd.f32 %v2153_v32, %v6725_v20  ;;  %v6740_v32 = vld [vmem:[#allocation28_spill] sm:$0xff]  ;;  %v6741_v57 = vld [vmem:[#allocation49_spill] sm:$0xff] }
 0x3ea   : > { %v2157_v17 = vpop.f32.mrb[74].mxu0  ;;  %v2332_v53 = vadd.f32 %v2252_v56, %v6728_v4  ;;  %v2342_v15 = vadd.f32 %v2155_v50, %v6729_v2  ;;  %v6744_v20 = vld [vmem:[#allocation32_spill] sm:$0xff] }
 0x3eb   : > { %v2345_v55 = vadd.f32 %v2157_v17, %v6726_v60  ;;  %v2159_v51 = vpop.f32.mrb[75].mxu0  ;;  %v2407_v8 = vpack.c.bf16 %v2331_v45, %v2327_v44  ;;  %v6743_v45 = vld [vmem:[#allocation30_spill] sm:$0xff]  ;;  %v6745_v60 = vld [vmem:[#allocation43_spill] sm:$0xff] }
 0x3ec   : > { %v2346_v11 = vadd.f32 %v2159_v51, %v6730_v54  ;;  %v2408_v24 = vpack.c.bf16 %v2332_v53, %v2328_v48  ;;  %v6746_v51 = vld [vmem:[#allocation47_spill] sm:$0xff] }
 0x3ed   : > { %v2413_v12 = vpack.c.bf16 %v2345_v55, %v2341_v27 }
 0x3ee   : > { %v2414_v23 = vpack.c.bf16 %v2346_v11, %v2342_v15  ;;  %v2256_v43 = vpop.f32.mrb[68].mxu1  ;;  %2694 = vmatprep.subr.bf16.mxu1 %v2408_v24 }
 0x3ef   : > { %v2258_v0 = vpop.f32.mrb[69].mxu1  ;;  %2695 = vmatpush1.bf16.msra.mxu1 %v2407_v8  ;;  %v2335_v34 = vadd.f32 %v2256_v43, %v6731_v38  ;;  %v6750_v38 = vld [vmem:[#allocation52_spill] sm:$0xff] }
 0x3f0   : > { %v2163_v37 = vpop.f32.mrb[76].mxu0  ;;  %2585 = vmatprep.subr.bf16.mxu0 %v2414_v23  ;;  %v2260_v33 = vpop.f32.mrb[70].mxu1  ;;  %v2336_v40 = vadd.f32 %v2258_v0, %v6735_v22  ;;  %v6747_v23 = vld [vmem:[#allocation42_spill] sm:$0xff] }
 0x3f1   : > { %v2165_v13 = vpop.f32.mrb[77].mxu0  ;;  %2586 = vmatpush1.bf16.msra.mxu0 %v2413_v12  ;;  %v2339_v31 = vadd.f32 %v2260_v33, %v6732_v39  ;;  %v2262_v14 = vpop.f32.mrb[71].mxu1  ;;  %v2349_v26 = vadd.f32 %v2163_v37, %v6733_v63  ;;  %v6748_v37 = vld [vmem:[#allocation38_spill] sm:$0xff]  ;;  %v6749_v33 = vld [vmem:[#allocation57_spill] sm:$0xff]  ;;  %v6752_v63 = vld [vmem:[#allocation40_spill] sm:$0xff] }
 0x3f2   : > { %v2167_v16 = vpop.f32.mrb[78].mxu0  ;;  %v2340_v1 = vadd.f32 %v2262_v14, %v6736_v36  ;;  %v2350_v5 = vadd.f32 %v2165_v13, %v6737_v30 }
 0x3f3   : > { %v2353_v58 = vadd.f32 %v2167_v16, %v6734_v25  ;;  %v2169_v47 = vpop.f32.mrb[79].mxu0  ;;  %v2411_v9 = vpack.c.bf16 %v2339_v31, %v2335_v34  ;;  %v6751_v31 = vld [vmem:[#allocation37_spill] sm:$0xff]  ;;  %v6753_v25 = vld [vmem:[#allocation51_spill] sm:$0xff] }
 0x3f4   : > { %v2354_v35 = vadd.f32 %v2169_v47, %v6738_v61  ;;  %v2412_v18 = vpack.c.bf16 %v2340_v1, %v2336_v40  ;;  %v6754_v47 = vld [vmem:[#allocation55_spill] sm:$0xff] }
 0x3f5   : > { %v2417_v41 = vpack.c.bf16 %v2353_v58, %v2349_v26 }
 0x3f6   : > { %v2418_v42 = vpack.c.bf16 %v2354_v35, %v2350_v5  ;;  %v2266_v28 = vpop.f32.mrb[72].mxu1  ;;  %2696 = vmatprep.subr.bf16.mxu1 %v2412_v18 }
 0x3f7   : > { %v2268_v52 = vpop.f32.mrb[73].mxu1  ;;  %2697 = vmatpush1.bf16.msra.mxu1 %v2411_v9  ;;  %v2343_v21 = vadd.f32 %v2266_v28, %v6739_v49  ;;  %v6758_v49 = vld [vmem:[#allocation60_spill] sm:$0xff] }
 0x3f8   : > { %v2173_v6 = vpop.f32.mrb[80].mxu0  ;;  %2587 = vmatprep.subr.bf16.mxu0 %v2418_v42  ;;  %v2270_v46 = vpop.f32.mrb[74].mxu1  ;;  %v2344_v56 = vadd.f32 %v2268_v52, %v6743_v45  ;;  %v6755_v42 = vld [vmem:[#allocation50_spill] sm:$0xff] }
 0x3f9   : > { %v2175_v3 = vpop.f32.mrb[81].mxu0  ;;  %2588 = vmatpush1.bf16.msra.mxu0 %v2417_v41  ;;  %v2347_v62 = vadd.f32 %v2270_v46, %v6740_v32  ;;  %v2272_v50 = vpop.f32.mrb[75].mxu1  ;;  %v2357_v17 = vadd.f32 %v2173_v6, %v6741_v57  ;;  %v6756_v6 = vld [vmem:[#allocation46_spill] sm:$0xff]  ;;  %v6757_v46 = vld [vmem:[#allocation65_spill] sm:$0xff]  ;;  %v6760_v57 = vld [vmem:[#allocation48_spill] sm:$0xff] }
 0x3fa   : > { %v2177_v19 = vpop.f32.mrb[82].mxu0  ;;  %v2348_v27 = vadd.f32 %v2272_v50, %v6744_v20  ;;  %v2358_v55 = vadd.f32 %v2175_v3, %v6745_v60 }
 0x3fb   : > { %v2361_v44 = vadd.f32 %v2177_v19, %v6742_v10  ;;  %v2179_v59 = vpop.f32.mrb[83].mxu0  ;;  %v2415_v48 = vpack.c.bf16 %v2347_v62, %v2343_v21  ;;  %v6759_v62 = vld [vmem:[#allocation45_spill] sm:$0xff]  ;;  %v6761_v10 = vld [vmem:[#allocation59_spill] sm:$0xff] }
 0x3fc   : > { %v2362_v29 = vadd.f32 %v2179_v59, %v6746_v51  ;;  %v2416_v53 = vpack.c.bf16 %v2348_v27, %v2344_v56  ;;  %v6762_v59 = vld [vmem:[#allocation63_spill] sm:$0xff] }
 0x3fd   : > { %v2421_v4 = vpack.c.bf16 %v2361_v44, %v2357_v17 }
 0x3fe   : > { %v2422_v2 = vpack.c.bf16 %v2362_v29, %v2358_v55  ;;  %v2276_v15 = vpop.f32.mrb[76].mxu1  ;;  %2698 = vmatprep.subr.bf16.mxu1 %v2416_v53 }
 0x3ff   : > { %v2278_v11 = vpop.f32.mrb[77].mxu1  ;;  %2699 = vmatpush1.bf16.msra.mxu1 %v2415_v48  ;;  %v2351_v43 = vadd.f32 %v2276_v15, %v6747_v23  ;;  %v6766_v23 = vld [vmem:[#allocation67_spill] sm:$0xff] }
 0x400   : > { %v2183_v54 = vpop.f32.mrb[84].mxu0  ;;  %2589 = vmatprep.subr.bf16.mxu0 %v2422_v2  ;;  %v2280_v12 = vpop.f32.mrb[78].mxu1  ;;  %v2352_v14 = vadd.f32 %v2278_v11, %v6751_v31  ;;  %v6763_v2 = vld [vmem:[#allocation58_spill] sm:$0xff] }
 0x401   : > { %v2185_v8 = vpop.f32.mrb[85].mxu0  ;;  %2590 = vmatpush1.bf16.msra.mxu0 %v2421_v4  ;;  %v2355_v0 = vadd.f32 %v2280_v12, %v6748_v37  ;;  %v2282_v13 = vpop.f32.mrb[79].mxu1  ;;  %v2365_v16 = vadd.f32 %v2183_v54, %v6749_v33  ;;  %v6764_v54 = vld [vmem:[#allocation54_spill] sm:$0xff]  ;;  %v6765_v12 = vld [vmem:[#allocation73_spill] sm:$0xff]  ;;  %v6768_v33 = vld [vmem:[#allocation56_spill] sm:$0xff] }
 0x402   : > { %v2187_v24 = vpop.f32.mrb[86].mxu0  ;;  %v2356_v26 = vadd.f32 %v2282_v13, %v6752_v63  ;;  %v2366_v58 = vadd.f32 %v2185_v8, %v6753_v25 }
 0x403   : > { %v2369_v34 = vadd.f32 %v2187_v24, %v6750_v38  ;;  %v2189_v39 = vpop.f32.mrb[87].mxu0  ;;  %v2419_v40 = vpack.c.bf16 %v2355_v0, %v2351_v43  ;;  %v6767_v0 = vld [vmem:[#allocation53_spill] sm:$0xff] }
 0x404   : > { %v2370_v22 = vadd.f32 %v2189_v39, %v6754_v47  ;;  %v2420_v1 = vpack.c.bf16 %v2356_v26, %v2352_v14  ;;  %v6769_v38 = vld [vmem:[#allocation69_spill] sm:$0xff]  ;;  %v6770_v39 = vld [vmem:[#allocation71_spill] sm:$0xff] }
 0x405   : > { %v2425_v36 = vpack.c.bf16 %v2369_v34, %v2365_v16  ;;  %v3752_v47 = vld [vmem:[%s6369_s10] sm:$0xff]  }
 0x406   : > { %v2426_v30 = vpack.c.bf16 %v2370_v22, %v2366_v58  ;;  %v2286_v5 = vpop.f32.mrb[80].mxu1  ;;  %2700 = vmatprep.subr.bf16.mxu1 %v2420_v1 }
 0x407   : > { %v2288_v35 = vpop.f32.mrb[81].mxu1  ;;  %2701 = vmatpush1.bf16.msra.mxu1 %v2419_v40  ;;  %v2359_v28 = vadd.f32 %v2286_v5, %v6755_v42 }
 0x408   : > { %v2193_v61 = vpop.f32.mrb[88].mxu0  ;;  %2591 = vmatprep.subr.bf16.mxu0 %v2426_v30  ;;  %v2290_v41 = vpop.f32.mrb[82].mxu1  ;;  %v2360_v50 = vadd.f32 %v2288_v35, %v6759_v62  ;;  %v6772_v30 = vld [vmem:[#allocation62_spill] sm:$0xff]  ;;  %v6773_v35 = vld [vmem:[#allocation61_spill] sm:$0xff] }
 0x409   : > { %v2195_v9 = vpop.f32.mrb[89].mxu0  ;;  %2592 = vmatpush1.bf16.msra.mxu0 %v2425_v36  ;;  %v2363_v52 = vadd.f32 %v2290_v41, %v6756_v6  ;;  %v2292_v3 = vpop.f32.mrb[83].mxu1  ;;  %v2373_v19 = vadd.f32 %v2193_v61, %v6757_v46  ;;  %v6771_v36 = vld [vmem:[#allocation66_spill] sm:$0xff]  ;;  %v6774_v41 = vld [vmem:[#allocation64_spill] sm:$0xff] }
 0x40a   : > { %v2197_v18 = vpop.f32.mrb[90].mxu0  ;;  %v2364_v17 = vadd.f32 %v2292_v3, %v6760_v57  ;;  %v2374_v44 = vadd.f32 %v2195_v9, %v6761_v10 }
 0x40b   : > { %v2377_v21 = vadd.f32 %v2197_v18, %v6758_v49  ;;  %v2199_v32 = vpop.f32.mrb[91].mxu0  ;;  %v2423_v56 = vpack.c.bf16 %v2363_v52, %v2359_v28  ;;  %v3753_v52 = vld [vmem:[%s6369_s10 + $0x8] sm:$0xff]  }
 0x40c   : > { %v2378_v45 = vadd.f32 %v2199_v32, %v6762_v59  ;;  %v2424_v27 = vpack.c.bf16 %v2364_v17, %v2360_v50  ;;  %v6777_v50 = vld [vmem:[#allocation70_spill] sm:$0xff]  ;;  %v6778_v17 = vld [vmem:[#allocation72_spill] sm:$0xff] }
 0x40d   : > { %v2429_v20 = vpack.c.bf16 %v2377_v21, %v2373_v19  ;;  %v6775_v19 = vld [vmem:[#allocation74_spill] sm:$0xff]  ;;  %v6776_v21 = vld [vmem:[#allocation68_spill] sm:$0xff] }
 0x40e   : > { %v2430_v60 = vpack.c.bf16 %v2378_v45, %v2374_v44  ;;  %v2296_v55 = vpop.f32.mrb[84].mxu1  ;;  %2702 = vmatprep.subr.bf16.mxu1 %v2424_v27  ;;  %v3754_v45 = vld [vmem:[%s6369_s10 + $0x10] sm:$0xff]   ;;  %v3757_v27 = vld [vmem:[%s6369_s10 + $0x28] sm:$0xff]  }
 0x40f   : > { %v2298_v29 = vpop.f32.mrb[85].mxu1  ;;  %2703 = vmatpush1.bf16.msra.mxu1 %v2423_v56  ;;  %v2367_v15 = vadd.f32 %v2296_v55, %v6763_v2  ;;  %v3755_v56 = vld [vmem:[%s6369_s10 + $0x18] sm:$0xff]  }
 0x410   : > { %v2203_v51 = vpop.f32.mrb[92].mxu0  ;;  %2593 = vmatprep.subr.bf16.mxu0 %v2430_v60  ;;  %v2300_v4 = vpop.f32.mrb[86].mxu1  ;;  %v2368_v13 = vadd.f32 %v2298_v29, %v6767_v0  ;;  %v3758_v60 = vld [vmem:[%s6369_s10 + $0x30] sm:$0xff]   ;;  %v3759_v55 = vld [vmem:[%s6369_s10 + $0x38] sm:$0xff]  }
 0x411   : > { %v2205_v48 = vpop.f32.mrb[93].mxu0  ;;  %2594 = vmatpush1.bf16.msra.mxu0 %v2429_v20  ;;  %v2371_v11 = vadd.f32 %v2300_v4, %v6764_v54  ;;  %v2302_v8 = vpop.f32.mrb[87].mxu1  ;;  %v2381_v24 = vadd.f32 %v2203_v51, %v6765_v12  ;;  %v3756_v20 = vld [vmem:[%s6369_s10 + $0x20] sm:$0xff]  }
 0x412   : > { %v2207_v53 = vpop.f32.mrb[94].mxu0  ;;  %v2372_v16 = vadd.f32 %v2302_v8, %v6768_v33  ;;  %v2382_v34 = vadd.f32 %v2205_v48, %v6769_v38  ;;  %v2456_v51 = vpop.permute.xlu0 %2455 }
 0x413   : > { %v2385_v43 = vadd.f32 %v2207_v53, %v6766_v23  ;;  %v2209_v37 = vpop.f32.mrb[95].mxu0  ;;  %v2427_v14 = vpack.c.bf16 %v2371_v11, %v2367_v15  ;;  %v2461_v53 = vpop.permute.xlu1 %2460 }
 0x414   : > { %v2386_v31 = vadd.f32 %v2209_v37, %v6770_v39  ;;  %v2428_v26 = vpack.c.bf16 %v2372_v16, %v2368_v13 }
 0x415   : > { %v2433_v63 = vpack.c.bf16 %v2385_v43, %v2381_v24 }
 0x416   : > { %v2434_v25 = vpack.c.bf16 %v2386_v31, %v2382_v34  ;;  %v2306_v58 = vpop.f32.mrb[88].mxu1  ;;  %2704 = vmatprep.subr.bf16.mxu1 %v2428_v26  ;;  %v5915_v43 = vpop.permute.xlu0 %2465 }
 0x417   : > { %v2308_v22 = vpop.f32.mrb[89].mxu1  ;;  %2705 = vmatpush1.bf16.msra.mxu1 %v2427_v14  ;;  %v2375_v1 = vadd.f32 %v2306_v58, %v6771_v36  ;;  %v5920_v33 = vpop.permute.xlu1 %2470 }
 0x418   : > { %2595 = vmatprep.subr.bf16.mxu0 %v2434_v25  ;;  %v2310_v40 = vpop.f32.mrb[90].mxu1  ;;  %v2376_v9 = vadd.f32 %v2308_v22, %v6773_v35 }
 0x419   : > { %2596 = vmatpush1.bf16.msra.mxu0 %v2433_v63  ;;  %v2379_v5 = vadd.f32 %v2310_v40, %v6772_v30  ;;  %v2312_v61 = vpop.f32.mrb[91].mxu1 }
 0x41a   : > { %v2380_v18 = vadd.f32 %v2312_v61, %v6774_v41 }
 0x41b   : > { %v2431_v42 = vpack.c.bf16 %v2379_v5, %v2375_v1 }
 0x41c   : > { %2614 = vmatmul.mubr.bf16.vlgmr.msra.gmra.mrb[96].mxu0 %v3752_v47  ;;  %v2432_v28 = vpack.c.bf16 %v2380_v18, %v2376_v9 }
 0x41d   : > { %2623 = vmatprep.mubr.bf16.mxu0 %v6708_v7 }
 0x41e   : > { %v2316_v6 = vpop.f32.mrb[92].mxu1  ;;  %2706 = vmatprep.subr.bf16.mxu1 %v2432_v28 }
 0x41f   : > { %v2318_v3 = vpop.f32.mrb[93].mxu1  ;;  %2707 = vmatpush1.bf16.msra.mxu1 %v2431_v42  ;;  %v2383_v49 = vadd.f32 %v2316_v6, %v6775_v19 }
 0x420   : > { %v2320_v46 = vpop.f32.mrb[94].mxu1  ;;  %v2384_v57 = vadd.f32 %v2318_v3, %v6777_v50 }
 0x421   : > { %v2387_v32 = vadd.f32 %v2320_v46, %v6776_v21  ;;  %v2322_v62 = vpop.f32.mrb[95].mxu1 }
 0x422   : > { %v2388_v10 = vadd.f32 %v2322_v62, %v6778_v17 }
 0x423   : > { %v2435_v44 = vpack.c.bf16 %v2387_v32, %v2383_v49 }
 0x424   : > { %2624 = vmatmul.mubr.bf16.gmra.mrb[100].mxu0 %v3753_v52  ;;  %v2436_v59 = vpack.c.bf16 %v2388_v10, %v2384_v57  ;;  %v2476_v57 = vpop.permute.xlu0 %2475 }
 0x425   : > { %2633 = vmatprep.mubr.bf16.mxu0 %v6708_v7 }
 0x426   : > { %2708 = vmatprep.subr.bf16.mxu1 %v2436_v59 }
 0x427   : > { %2709 = vmatpush1.bf16.msra.mxu1 %v2435_v44 }
 0x42a   : > { %2727 = vmatmul.mubr.bf16.vlgmr.msra.gmra.mrb[96].mxu1 %v3752_v47 }
 0x42b   : > { %2736 = vmatprep.mubr.bf16.mxu1 %v6708_v7 }
 0x42c   : > { %2634 = vmatmul.mubr.bf16.gmra.mrb[104].mxu0 %v3754_v45 }
 0x42d   : > { %2643 = vmatprep.mubr.bf16.mxu0 %v6708_v7 }
 0x432   : > { %2737 = vmatmul.mubr.bf16.gmra.mrb[100].mxu1 %v3753_v52 }
 0x433   : > { %2746 = vmatprep.mubr.bf16.mxu1 %v6708_v7 }
 0x434   : > { %2644 = vmatmul.mubr.bf16.gmra.mrb[108].mxu0 %v3755_v56 }
 0x435   : > { %2653 = vmatprep.mubr.bf16.mxu0 %v6708_v7 }
 0x43a   : > { %2747 = vmatmul.mubr.bf16.gmra.mrb[104].mxu1 %v3754_v45 }
 0x43b   : > { %2756 = vmatprep.mubr.bf16.mxu1 %v6708_v7 }
 0x43c   : > { %2654 = vmatmul.mubr.bf16.gmra.mrb[112].mxu0 %v3756_v20 }
 0x43d   : > { %2663 = vmatprep.mubr.bf16.mxu0 %v6708_v7 }
 0x442   : > { %2757 = vmatmul.mubr.bf16.gmra.mrb[108].mxu1 %v3755_v56 }
 0x443   : > { %2766 = vmatprep.mubr.bf16.mxu1 %v6708_v7 }
 0x444   : > { %2664 = vmatmul.mubr.bf16.gmra.mrb[116].mxu0 %v3757_v27 }
 0x445   : > { %2673 = vmatprep.mubr.bf16.mxu0 %v6708_v7 }
 0x44a   : > { %2767 = vmatmul.mubr.bf16.gmra.mrb[112].mxu1 %v3756_v20 }
 0x44b   : > { %2776 = vmatprep.mubr.bf16.mxu1 %v6708_v7 }
 0x44c   : > { %2674 = vmatmul.mubr.bf16.gmra.mrb[120].mxu0 %v3758_v60 }
 0x44d   : > { %2683 = vmatprep.mubr.bf16.mxu0 %v6708_v7 }
 0x452   : > { %2777 = vmatmul.mubr.bf16.gmra.mrb[116].mxu1 %v3757_v27 }
 0x453   : > { %2786 = vmatprep.mubr.bf16.mxu1 %v6708_v7 }
 0x454   : > { %2684 = vmatmul.mubr.bf16.gmra.mrb[124].mxu0 %v3759_v55 }
 0x455   : > { %3326 = vmatprep.mubr.bf16.mxu0 %v6708_v7 }
 0x45a   : > { %2787 = vmatmul.mubr.bf16.gmra.mrb[120].mxu1 %v3758_v60 }
 0x45b   : > { %2796 = vmatprep.mubr.bf16.mxu1 %v6708_v7 }
 0x462   : > { %2797 = vmatmul.mubr.bf16.gmra.mrb[124].mxu1 %v3759_v55 }
 0x463   : > { %3367 = vmatprep.mubr.bf16.mxu1 %v6708_v7 }
 0x4ef   : > { %v2615_v29 = vpop.f32.mrb[96].mxu0 }
 0x4f0   : > { %v5903_v48 = vadd.f32 %v2615_v29, %v2456_v51  ;;  %v2617_v4 = vpop.f32.mrb[97].mxu0 }
 0x4f1   : > { %v5905_v2 = vadd.f32 %v2617_v4, %v2456_v51  ;;  %v2619_v15 = vpop.f32.mrb[98].mxu0 }
 0x4f2   : > { %v3612_v54 = vmul.f32 -1.442695, %v5903_v48  ;;  %v5908_v11 = vadd.f32 %v2619_v15, %v2461_v53  ;;  %v2621_v8 = vpop.f32.mrb[99].mxu0 }
 0x4f3   : > { %v3613_v12 = vmul.f32 -1.442695, %v5905_v2  ;;  %v5911_v24 = vadd.f32 %v2621_v8, %v2461_v53 }
 0x4f4   : > { %3898 = vpow2.f32 %v3612_v54  ;;  %v3616_v7 = vmul.f32 -1.442695, %v5908_v11 }
 0x4f5   : > { %3900 = vpow2.f32 %v3613_v12  ;;  %v3617_v23 = vmul.f32 -1.442695, %v5911_v24 }
 0x4f6   : > { %3902 = vpow2.f32 %v3616_v7 }
 0x4f7   : > { %3904 = vpow2.f32 %v3617_v23  ;;  %v2625_v37 = vpop.f32.mrb[100].mxu0 }
 0x4f8   : > { %v5918_v0 = vadd.f32 %v2625_v37, %v5915_v43  ;;  %v2627_v13 = vpop.f32.mrb[101].mxu0 }
 0x4f9   : > { %v5923_v16 = vadd.f32 %v2627_v13, %v5915_v43  ;;  %v2629_v38 = vpop.f32.mrb[102].mxu0 }
 0x4fa   : > { %v3620_v34 = vmul.f32 -1.442695, %v5918_v0  ;;  %v5927_v39 = vadd.f32 %v2629_v38, %v5920_v33  ;;  %v2631_v31 = vpop.f32.mrb[103].mxu0 }
 0x4fb   : > { %v3621_v14 = vmul.f32 -1.442695, %v5923_v16  ;;  %v5931_v63 = vadd.f32 %v2631_v31, %v5920_v33 }
 0x4fc   : > { %3906 = vpow2.f32 %v3620_v34  ;;  %v3624_v26 = vmul.f32 -1.442695, %v5927_v39 }
 0x4fd   : > { %3908 = vpow2.f32 %v3621_v14  ;;  %v3625_v25 = vmul.f32 -1.442695, %v5931_v63  ;;  %v2728_v40 = vpop.f32.mrb[96].mxu1 }
 0x4fe   : > { %v3899_v58 = vpop.eup %3898  ;;  %3910 = vpow2.f32 %v3624_v26  ;;  %v5935_v30 = vadd.f32 %v2728_v40, %v2456_v51  ;;  %v2730_v61 = vpop.f32.mrb[97].mxu1 }
 0x4ff   : > { %v3901_v47 = vpop.eup %3900  ;;  %v2999_v22 = vadd.f32 1.0, %v3899_v58  ;;  %3912 = vpow2.f32 %v3625_v25  ;;  %v2635_v36 = vpop.f32.mrb[104].mxu0  ;;  %v5939_v41 = vadd.f32 %v2730_v61, %v2456_v51 }
 0x500   : > { %v3903_v1 = vpop.eup %3902  ;;  %v3000_v5 = vadd.f32 1.0, %v3901_v47  ;;  %v5937_v35 = vpop.f32.mrb[105].mxu0  ;;  %v3614_v6 = vmul.f32 -1.442695, %v5935_v30  ;;  %v5969_v12 = vadd.f32 %v2635_v36, %v2476_v57 }
 0x501   : > { %v3905_v9 = vpop.eup %3904  ;;  %3914 = vrcp.f32 %v2999_v22  ;;  %v3003_v18 = vadd.f32 1.0, %v3903_v1  ;;  %v2732_v42 = vpop.f32.mrb[98].mxu1  ;;  %v3615_v19 = vmul.f32 -1.442695, %v5939_v41  ;;  %v5989_v1 = vadd.f32 %v5937_v35, %v2476_v57 }
 0x502   : > { %v5941_v28 = vpop.f32.mrb[106].mxu0  ;;  %3916 = vrcp.f32 %v3000_v5  ;;  %v5944_v52 = vadd.f32 %v2732_v42, %v2461_v53  ;;  %v2734_v3 = vpop.f32.mrb[99].mxu1  ;;  %v3004_v49 = vadd.f32 1.0, %v3905_v9  ;;  %v3628_v40 = vmul.f32 -1.442695, %v5969_v12 }
 0x503   : > { %v5946_v46 = vpop.f32.mrb[107].mxu0  ;;  %3918 = vrcp.f32 %v3003_v18  ;;  %v5949_v21 = vadd.f32 %v2734_v3, %v2461_v53  ;;  %v2481_v25 = vpop.permute.xlu1 %2480 }
 0x504   : > { %3920 = vpow2.f32 %v3614_v6  ;;  %v3618_v32 = vmul.f32 -1.442695, %v5944_v52 }
 0x505   : > { %3922 = vpow2.f32 %v3615_v19  ;;  %v3619_v62 = vmul.f32 -1.442695, %v5949_v21  ;;  %v2738_v44 = vpop.f32.mrb[100].mxu1 }
 0x506   : > { %v3907_v50 = vpop.eup %3906  ;;  %3924 = vpow2.f32 %v3618_v32  ;;  %v5956_v56 = vadd.f32 %v2738_v44, %v5915_v43  ;;  %v2740_v27 = vpop.f32.mrb[101].mxu1 }
 0x507   : > { %v3909_v17 = vpop.eup %3908  ;;  %3926 = vrcp.f32 %v3004_v49  ;;  %v3007_v10 = vadd.f32 1.0, %v3907_v50  ;;  %v5953_v59 = vpop.f32.mrb[108].mxu0  ;;  %v5961_v51 = vadd.f32 %v2740_v27, %v5915_v43 }
 0x508   : > { %v3911_v45 = vpop.eup %3910  ;;  %3928 = vpow2.f32 %v3619_v62  ;;  %v3008_v20 = vadd.f32 1.0, %v3909_v17  ;;  %v5958_v60 = vpop.f32.mrb[109].mxu0  ;;  %v3622_v15 = vmul.f32 -1.442695, %v5956_v56 }
 0x509   : > { %v3913_v55 = vpop.eup %3912  ;;  %3930 = vrcp.f32 %v3007_v10  ;;  %v3011_v29 = vadd.f32 1.0, %v3911_v45  ;;  %v2742_v4 = vpop.f32.mrb[102].mxu1  ;;  %v3623_v37 = vmul.f32 -1.442695, %v5961_v51  ;;  %v3629_v45 = vmul.f32 -1.442695, %v5989_v1 }
 0x50a   : > { %v5963_v53 = vpop.f32.mrb[110].mxu0  ;;  %3932 = vrcp.f32 %v3008_v20  ;;  %v5967_v54 = vadd.f32 %v2742_v4, %v5920_v33  ;;  %v2744_v8 = vpop.f32.mrb[103].mxu1  ;;  %v3012_v43 = vadd.f32 1.0, %v3913_v55  ;;  %v6008_v20 = vadd.f32 %v5941_v28, %v2481_v25 }
 0x50b   : > { %v5971_v7 = vpop.f32.mrb[111].mxu0  ;;  %v3915_v23 = vpop.eup %3914  ;;  %3934 = vrcp.f32 %v3011_v29  ;;  %v5975_v13 = vadd.f32 %v2744_v8, %v5920_v33 }
 0x50c   : > { %v5977_v38 = vpop.eup %3916  ;;  %3936 = vpow2.f32 %v3622_v15  ;;  %v3626_v34 = vmul.f32 -1.442695, %v5967_v54  ;;  %v5982_v58 = vmul.f32 %v3915_v23, %v5903_v48  ;;  %v2486_v4 = vpop.permute.xlu0 %2485 }
 0x50d   : > { %v3919_v31 = vpop.eup %3918  ;;  %3938 = vpow2.f32 %v3623_v37  ;;  %v3627_v14 = vmul.f32 -1.442695, %v5975_v13  ;;  %v2748_v36 = vpop.f32.mrb[104].mxu1 }
 0x50e   : > { %v3921_v26 = vpop.eup %3920  ;;  %v5985_v47 = vmul.f32 %v3919_v31, %v5908_v11  ;;  %3940 = vpow2.f32 %v3626_v34  ;;  %v5995_v11 = vadd.f32 %v2748_v36, %v2476_v57  ;;  %v2750_v18 = vpop.f32.mrb[105].mxu1  ;;  %v6023_v34 = vadd.f32 %v5946_v46, %v2481_v25 }
 0x50f   : > { %v3923_v33 = vpop.eup %3922  ;;  %v3001_v22 = vadd.f32 1.0, %v3921_v26  ;;  %3942 = vrcp.f32 %v3012_v43  ;;  %v5991_v5 = vpop.f32.mrb[112].mxu0  ;;  %v5999_v19 = vadd.f32 %v2750_v18, %v2476_v57  ;;  %v3632_v43 = vmul.f32 -1.442695, %v6008_v20 }
 0x510   : > { %v3925_v61 = vpop.eup %3924  ;;  %v3002_v9 = vadd.f32 1.0, %v3923_v33  ;;  %v3256_v48 = vpack.c.bf16 %v5985_v47, %v5982_v58  ;;  %3944 = vpow2.f32 %v3627_v14  ;;  %v5997_v42 = vpop.f32.mrb[113].mxu0  ;;  %v3630_v62 = vmul.f32 -1.442695, %v5995_v11 }
 0x511   : > { %v3927_v6 = vpop.eup %3926  ;;  %3946 = vrcp.f32 %v3001_v22  ;;  %v3005_v3 = vadd.f32 1.0, %v3925_v61  ;;  %v2752_v35 = vpop.f32.mrb[106].mxu1  ;;  %v3631_v27 = vmul.f32 -1.442695, %v5999_v19 }
 0x512   : > { %v6001_v49 = vpop.f32.mrb[114].mxu0  ;;  %v3929_v32 = vpop.eup %3928  ;;  %3948 = vrcp.f32 %v3002_v9  ;;  %v6019_v23 = vadd.f32 %v2752_v35, %v2481_v25  ;;  %v3196_v61 = vmul.f32 %v3927_v6, %v5911_v24  ;;  %v6035_v9 = vadd.f32 %v5953_v59, %v2486_v4 }
 0x513   : > { %v2754_v50 = vpop.f32.mrb[107].mxu1  ;;  %v6004_v17 = vpop.f32.mrb[115].mxu0  ;;  %3950 = vrcp.f32 %v3005_v3  ;;  %v3006_v44 = vadd.f32 1.0, %v3929_v32  ;;  %v3192_v24 = vmul.f32 %v5977_v38, %v5905_v2  ;;  %v3633_v59 = vmul.f32 -1.442695, %v6023_v34 }
 0x514   : > { %v3931_v10 = vpop.eup %3930  ;;  %3952 = vpow2.f32 %v3628_v40  ;;  %v6029_v33 = vadd.f32 %v2754_v50, %v2481_v25  ;;  %v3634_v25 = vmul.f32 -1.442695, %v6019_v23 }
 0x515   : > { %v6010_v57 = vpop.eup %3932  ;;  %3954 = vrcp.f32 %v3006_v44  ;;  %v6014_v15 = vmul.f32 %v3931_v10, %v5918_v0  ;;  %v2758_v31 = vpop.f32.mrb[108].mxu1 }
 0x516   : > { %v3935_v55 = vpop.eup %3934  ;;  %3956 = vpow2.f32 %v3630_v62  ;;  %v2760_v22 = vpop.f32.mrb[109].mxu1  ;;  %v3635_v44 = vmul.f32 -1.442695, %v6029_v33  ;;  %v6055_v38 = vadd.f32 %v2758_v31, %v2486_v4 }
 0x517   : > { %v3937_v29 = vpop.eup %3936  ;;  %v6017_v8 = vmul.f32 %v3935_v55, %v5927_v39  ;;  %3958 = vpow2.f32 %v3629_v45  ;;  %v6025_v14 = vpop.f32.mrb[116].mxu0  ;;  %v3257_v55 = vpack.c.bf16 %v3196_v61, %v3192_v24 }
 0x518   : > { %v3939_v28 = vpop.eup %3938  ;;  %v3009_v37 = vadd.f32 1.0, %v3937_v29  ;;  %3960 = vpow2.f32 %v3631_v27  ;;  %v6031_v40 = vpop.f32.mrb[117].mxu0  ;;  %v3636_v27 = vmul.f32 -1.442695, %v6035_v9  ;;  %v3638_v58 = vmul.f32 -1.442695, %v6055_v38 }
 0x519   : > { %v3941_v26 = vpop.eup %3940  ;;  %v3010_v0 = vadd.f32 1.0, %v3939_v28  ;;  %v3260_v39 = vpack.c.bf16 %v6017_v8, %v6014_v15  ;;  %v6037_v18 = vpop.f32.mrb[110].mxu1  ;;  %3294 = vmatprep.subr.bf16.mxu0 %v3257_v55 }
 0x51a   : > { %v3943_v36 = vpop.eup %3942  ;;  %3962 = vrcp.f32 %v3009_v37  ;;  %v3013_v46 = vadd.f32 1.0, %v3941_v26  ;;  %v6039_v3 = vpop.f32.mrb[118].mxu0  ;;  %3295 = vmatpush1.bf16.msra.mxu0 %v3256_v48 }
 0x51b   : > { %v3945_v35 = vpop.eup %3944  ;;  %3964 = vrcp.f32 %v3010_v0  ;;  %v6042_v32 = vpop.f32.mrb[111].mxu1  ;;  %v3204_v55 = vmul.f32 %v3943_v36, %v5931_v63 }
 0x51c   : > { %v6044_v62 = vpop.f32.mrb[119].mxu0  ;;  %v3947_v50 = vpop.eup %3946  ;;  %3966 = vrcp.f32 %v3013_v46  ;;  %v3014_v6 = vadd.f32 1.0, %v3945_v35 }
 0x51d   : > { %v3949_v10 = vpop.eup %3948  ;;  %3968 = vpow2.f32 %v3632_v43  ;;  %v6051_v28 = vpop.permute.xlu1 %2490  ;;  %v3193_v37 = vmul.f32 %v3947_v50, %v5935_v30  ;;  %v6058_v43 = vadd.f32 %v5958_v60, %v2486_v4 }
 0x51e   : > { %v3951_v45 = vpop.eup %3950  ;;  %3970 = vrcp.f32 %v3014_v6  ;;  %v6060_v46 = vpop.f32.mrb[112].mxu1  ;;  %v6076_v6 = vadd.f32 %v5963_v53, %v6051_v28 }
 0x51f   : > { %v3953_v29 = vpop.eup %3952  ;;  %v3197_v2 = vmul.f32 %v3951_v45, %v5944_v52  ;;  %3972 = vpow2.f32 %v3634_v25  ;;  %v6062_v61 = vpop.f32.mrb[120].mxu0  ;;  %v6065_v52 = vadd.f32 %v2760_v22, %v2486_v4  ;;  %v3194_v22 = vmul.f32 %v3949_v10, %v5939_v41 }
 0x520   : > { %v3955_v26 = vpop.eup %3954  ;;  %v3015_v0 = vadd.f32 1.0, %v3953_v29  ;;  %3974 = vpow2.f32 %v3633_v59  ;;  %v6067_v31 = vpop.f32.mrb[113].mxu1  ;;  %v3637_v29 = vmul.f32 -1.442695, %v6058_v43 }
 0x521   : > { %v3957_v35 = vpop.eup %3956  ;;  %v3258_v24 = vpack.c.bf16 %v3197_v2, %v3193_v37  ;;  %v3198_v30 = vmul.f32 %v3955_v26, %v5949_v21  ;;  %3976 = vpow2.f32 %v3635_v44  ;;  %v6072_v60 = vpop.f32.mrb[121].mxu0  ;;  %v3639_v2 = vmul.f32 -1.442695, %v6065_v52 }
 0x522   : > { %v3959_v25 = vpop.eup %3958  ;;  %3978 = vrcp.f32 %v3015_v0  ;;  %v3017_v50 = vadd.f32 1.0, %v3957_v35  ;;  %v6078_v59 = vpop.f32.mrb[114].mxu1  ;;  %v3640_v26 = vmul.f32 -1.442695, %v6076_v6 }
 0x523   : > { %v6080_v21 = vpop.f32.mrb[122].mxu0  ;;  %v3961_v4 = vpop.eup %3960  ;;  %v3016_v44 = vadd.f32 1.0, %v3959_v25  ;;  %3980 = vpow2.f32 %v3636_v27  ;;  %v3259_v41 = vpack.c.bf16 %v3198_v30, %v3194_v22  ;;  %v3200_v27 = vmul.f32 %v6010_v57, %v5923_v16 }
 0x524   : > { %v6084_v47 = vpop.f32.mrb[115].mxu1  ;;  %v6086_v48 = vpop.f32.mrb[123].mxu0  ;;  %3982 = vrcp.f32 %v3017_v50  ;;  %v3018_v53 = vadd.f32 1.0, %v3961_v4  ;;  %v6100_v25 = vadd.f32 %v6037_v18, %v6051_v28 }
 0x525   : > { %v3963_v45 = vpop.eup %3962  ;;  %3984 = vrcp.f32 %v3016_v44  ;;  %v6094_v35 = vpop.permute.xlu0 %2495  ;;  %3335 = vmatprep.subr.bf16.mxu1 %v3259_v41  ;;  %v3261_v57 = vpack.c.bf16 %v3204_v55, %v3200_v27  ;;  %v6117_v55 = vadd.f32 %v6042_v32, %v6051_v28 }
 0x526   : > { %v3965_v37 = vpop.eup %3964  ;;  %3986 = vrcp.f32 %v3018_v53  ;;  %v3201_v63 = vmul.f32 %v3963_v45, %v5956_v56  ;;  %3336 = vmatpush1.bf16.msra.mxu1 %v3258_v24  ;;  %v6102_v16 = vpop.f32.mrb[116].mxu1  ;;  %v6121_v53 = vadd.f32 %v5991_v5, %v6094_v35  ;;  %v6141_v8 = vadd.f32 %v6060_v46, %v6094_v35 }
 0x527   : > { %v3967_v10 = vpop.eup %3966  ;;  %3988 = vpow2.f32 %v3638_v58  ;;  %v6104_v4 = vpop.f32.mrb[124].mxu0  ;;  %3296 = vmatprep.subr.bf16.mxu0 %v3261_v57  ;;  %v6153_v46 = vadd.f32 %v6067_v31, %v6094_v35 }
 0x528   : > { %v3969_v0 = vpop.eup %3968  ;;  %v3205_v36 = vmul.f32 %v3967_v10, %v5967_v54  ;;  %3990 = vpow2.f32 %v3637_v29  ;;  %v6109_v54 = vadd.f32 %v5971_v7, %v6051_v28  ;;  %v6111_v18 = vpop.f32.mrb[117].mxu1  ;;  %v3642_v10 = vmul.f32 -1.442695, %v6100_v25  ;;  %3297 = vmatpush1.bf16.msra.mxu0 %v3260_v39 }
 0x529   : > { %v3971_v30 = vpop.eup %3970  ;;  %v3019_v50 = vadd.f32 1.0, %v3969_v0  ;;  %3992 = vpow2.f32 %v3639_v2  ;;  %v6113_v58 = vpop.f32.mrb[125].mxu0  ;;  %v3202_v2 = vmul.f32 %v3965_v37, %v5961_v51  ;;  %v3644_v15 = vmul.f32 -1.442695, %v6121_v53 }
 0x52a   : > { %v3973_v22 = vpop.eup %3972  ;;  %v3262_v44 = vpack.c.bf16 %v3205_v36, %v3201_v63  ;;  %v3206_v56 = vmul.f32 %v3971_v30, %v5975_v13  ;;  %v6123_v13 = vpop.f32.mrb[118].mxu1  ;;  %v3641_v63 = vmul.f32 -1.442695, %v6109_v54  ;;  %v3643_v36 = vmul.f32 -1.442695, %v6117_v55 }
 0x52b   : > { %v3975_v45 = vpop.eup %3974  ;;  %3994 = vrcp.f32 %v3019_v50  ;;  %v3021_v24 = vadd.f32 1.0, %v3973_v22  ;;  %v6125_v7 = vpop.f32.mrb[126].mxu0  ;;  %v6145_v50 = vadd.f32 %v5997_v42, %v6094_v35 }
 0x52c   : > { %6779 = vst [vmem:[#allocation83_spill] sm:$0xff] %v6125_v7  ;;  %v3977_v29 = vpop.eup %3976  ;;  %v3020_v41 = vadd.f32 1.0, %v3975_v45  ;;  %3996 = vpow2.f32 %v3640_v26  ;;  %v6129_v27 = vpop.f32.mrb[119].mxu1  ;;  %v3263_v51 = vpack.c.bf16 %v3206_v56, %v3202_v2 }
 0x52d   : > { %v6134_v5 = vpop.f32.mrb[127].mxu0  ;;  %v3979_v32 = vpop.eup %3978  ;;  %3998 = vrcp.f32 %v3021_v24  ;;  %v3022_v28 = vadd.f32 1.0, %v3977_v29 }
 0x52e   : > { %6780 = vst [vmem:[#allocation85_spill] sm:$0xff] %v6134_v5  ;;  %v3981_v0 = vpop.eup %3980  ;;  %4000 = vrcp.f32 %v3020_v41  ;;  %3337 = vmatprep.subr.bf16.mxu1 %v3263_v51  ;;  %v6147_v57 = vpop.f32.mrb[120].mxu1  ;;  %v3645_v51 = vmul.f32 -1.442695, %v6145_v50 }
 0x52f   : > { %v3983_v37 = vpop.eup %3982  ;;  %4002 = vrcp.f32 %v3022_v28  ;;  %v3023_v26 = vadd.f32 1.0, %v3981_v0  ;;  %3338 = vmatpush1.bf16.msra.mxu1 %v3262_v44  ;;  %v2501_v56 = vpop.permute.xlu1 %2500 }
 0x530   : > { %v3985_v30 = vpop.eup %3984  ;;  %4004 = vpow2.f32 %v3642_v10  ;;  %v6149_v45 = vpop.f32.mrb[121].mxu1  ;;  %v6156_v2 = vadd.f32 %v6001_v49, %v2501_v56  ;;  %v3646_v10 = vmul.f32 -1.442695, %v6141_v8  ;;  %v6165_v31 = vadd.f32 %v6078_v59, %v2501_v56 }
 0x531   : > { %v3987_v39 = vpop.eup %3986  ;;  %4006 = vrcp.f32 %v3023_v26  ;;  %v6158_v42 = vpop.f32.mrb[122].mxu1  ;;  %v3207_v49 = vmul.f32 %v3979_v32, %v5969_v12  ;;  %v3209_v59 = vmul.f32 %v3983_v37, %v5995_v11 }
 0x532   : > { %v3989_v22 = vpop.eup %3988  ;;  %4008 = vpow2.f32 %v3641_v63  ;;  %v6161_v28 = vpop.f32.mrb[123].mxu1  ;;  %v3650_v32 = vmul.f32 -1.442695, %v6165_v31 }
 0x533   : > { %v3991_v24 = vpop.eup %3990  ;;  %v3025_v29 = vadd.f32 1.0, %v3989_v22  ;;  %4010 = vpow2.f32 %v3643_v36  ;;  %v6170_v36 = vadd.f32 %v6004_v17, %v2501_v56 }
 0x534   : > { %v3993_v44 = vpop.eup %3992  ;;  %v3024_v41 = vadd.f32 1.0, %v3991_v24  ;;  %4012 = vpow2.f32 %v3644_v15  ;;  %v3647_v24 = vmul.f32 -1.442695, %v6153_v46 }
 0x535   : > { %v3995_v0 = vpop.eup %3994  ;;  %4014 = vrcp.f32 %v3025_v29  ;;  %v3026_v63 = vadd.f32 1.0, %v3993_v44  ;;  %v3648_v29 = vmul.f32 -1.442695, %v6156_v2 }
 0x536   : > { %v3997_v35 = vpop.eup %3996  ;;  %v3211_v26 = vmul.f32 %v3995_v0, %v6008_v20  ;;  %4016 = vrcp.f32 %v3024_v41  ;;  %v3208_v20 = vmul.f32 %v3985_v30, %v5989_v1  ;;  %v6179_v41 = vpop.f32.mrb[124].mxu1  ;;  %v6186_v1 = vadd.f32 %v6084_v47, %v2501_v56 }
 0x537   : > { %v3999_v15 = vpop.eup %3998  ;;  %4018 = vrcp.f32 %v3026_v63  ;;  %v3027_v22 = vadd.f32 1.0, %v3997_v35  ;;  %v3210_v63 = vmul.f32 %v3987_v39, %v5999_v19  ;;  %v6183_v37 = vpop.f32.mrb[125].mxu1  ;;  %v3649_v47 = vmul.f32 -1.442695, %v6170_v36 }
 0x538   : > { %v4001_v44 = vpop.eup %4000  ;;  %v3264_v5 = vpack.c.bf16 %v3211_v26, %v3207_v49  ;;  %v3213_v7 = vmul.f32 %v3999_v15, %v6019_v23  ;;  %4020 = vpow2.f32 %v3646_v10  ;;  %v2506_v10 = vpop.permute.xlu0 %2505 }
 0x539   : > { %v4003_v12 = vpop.eup %4002  ;;  %v3212_v17 = vmul.f32 %v4001_v44, %v6023_v34  ;;  %4022 = vrcp.f32 %v3027_v22  ;;  %v6188_v30 = vpop.f32.mrb[126].mxu1  ;;  %v6191_v19 = vadd.f32 %v6025_v14, %v2506_v10  ;;  %v6197_v56 = vadd.f32 %v6102_v16, %v2506_v10 }
 0x53a   : > { %v4005_v0 = vpop.eup %4004  ;;  %v3266_v35 = vpack.c.bf16 %v3213_v7, %v3209_v59  ;;  %v3214_v11 = vmul.f32 %v4003_v12, %v6029_v33  ;;  %4024 = vpow2.f32 %v3645_v51  ;;  %v6193_v33 = vpop.f32.mrb[127].mxu1  ;;  %v6203_v16 = vadd.f32 %v6031_v40, %v2506_v10 }
 0x53b   : > { %v4007_v23 = vpop.eup %4006  ;;  %v3029_v49 = vadd.f32 1.0, %v4005_v0  ;;  %4026 = vpow2.f32 %v3647_v24  ;;  %v3265_v34 = vpack.c.bf16 %v3212_v17, %v3208_v20  ;;  %v3652_v59 = vmul.f32 -1.442695, %v6191_v19 }
 0x53c   : > { %v4009_v26 = vpop.eup %4008  ;;  %4028 = vpow2.f32 %v3648_v29  ;;  %v3267_v7 = vpack.c.bf16 %v3214_v11, %v3210_v63  ;;  %v3651_v29 = vmul.f32 -1.442695, %v6186_v1  ;;  %v3654_v17 = vmul.f32 -1.442695, %v6197_v56  ;;  %v2511_v63 = vpop.permute.xlu1 %2510 }
 0x53d   : > { %v4011_v39 = vpop.eup %4010  ;;  %4030 = vrcp.f32 %v3029_v49  ;;  %v3028_v51 = vadd.f32 1.0, %v4009_v26  ;;  %3298 = vmatprep.subr.bf16.mxu0 %v3265_v34  ;;  %v6208_v49 = vadd.f32 %v6111_v18, %v2506_v10  ;;  %v6214_v40 = vadd.f32 %v6123_v13, %v2511_v63 }
 0x53e   : > { %v4013_v15 = vpop.eup %4012  ;;  %v3030_v22 = vadd.f32 1.0, %v4011_v39  ;;  %4032 = vpow2.f32 %v3650_v32  ;;  %3339 = vmatprep.subr.bf16.mxu1 %v3267_v7  ;;  %3299 = vmatpush1.bf16.msra.mxu0 %v3264_v5  ;;  %v6211_v7 = vadd.f32 %v6039_v3, %v2511_v63  ;;  %v6218_v18 = vadd.f32 %v6044_v62, %v2511_v63 }
 0x53f   : > { %v4015_v24 = vpop.eup %4014  ;;  %4034 = vrcp.f32 %v3028_v51  ;;  %v3031_v14 = vadd.f32 1.0, %v4013_v15  ;;  %3340 = vmatpush1.bf16.msra.mxu1 %v3266_v35  ;;  %v3215_v35 = vmul.f32 %v4007_v23, %v6035_v9  ;;  %v3653_v9 = vmul.f32 -1.442695, %v6203_v16 }
 0x540   : > { %v4017_v44 = vpop.eup %4016  ;;  %4036 = vrcp.f32 %v3030_v22  ;;  %v3217_v22 = vmul.f32 %v4015_v24, %v6055_v38  ;;  %v3655_v13 = vmul.f32 -1.442695, %v6208_v49 }
 0x541   : > { %v4019_v12 = vpop.eup %4018  ;;  %4038 = vrcp.f32 %v3031_v14 }
 0x542   : > { %v4021_v20 = vpop.eup %4020  ;;  %4040 = vpow2.f32 %v3649_v47 }
 0x543   : > { %v4023_v5 = vpop.eup %4022  ;;  %v3033_v32 = vadd.f32 1.0, %v4021_v20  ;;  %4042 = vpow2.f32 %v3651_v29  ;;  %v3656_v29 = vmul.f32 -1.442695, %v6211_v7 }
 0x544   : > { %v4025_v0 = vpop.eup %4024  ;;  %v3219_v11 = vmul.f32 %v4023_v5, %v6076_v6  ;;  %4044 = vpow2.f32 %v3652_v59  ;;  %v3658_v59 = vmul.f32 -1.442695, %v6214_v40 }
 0x545   : > { %v4027_v34 = vpop.eup %4026  ;;  %4046 = vrcp.f32 %v3033_v32  ;;  %v3032_v26 = vadd.f32 1.0, %v4025_v0  ;;  %v2516_v0 = vpop.permute.xlu0 %2515 }
 0x546   : > { %v4029_v39 = vpop.eup %4028  ;;  %v3268_v51 = vpack.c.bf16 %v3219_v11, %v3215_v35  ;;  %v3034_v15 = vadd.f32 1.0, %v4027_v34  ;;  %4048 = vpow2.f32 %v3654_v17  ;;  %v3216_v17 = vmul.f32 %v4017_v44, %v6058_v43 }
 0x547   : > { %v4031_v6 = vpop.eup %4030  ;;  %4050 = vrcp.f32 %v3032_v26  ;;  %v3035_v23 = vadd.f32 1.0, %v4029_v39  ;;  %v6230_v35 = vadd.f32 %v6129_v27, %v2511_v63  ;;  %v6233_v43 = vadd.f32 %v6062_v61, %v2516_v0 }
 0x548   : > { %v4033_v10 = vpop.eup %4032  ;;  %v3221_v3 = vmul.f32 %v4031_v6, %v6100_v25  ;;  %4052 = vrcp.f32 %v3034_v15  ;;  %v3218_v25 = vmul.f32 %v4019_v12, %v6065_v52  ;;  %v3657_v52 = vmul.f32 -1.442695, %v6218_v18 }
 0x549   : > { %v4035_v47 = vpop.eup %4034  ;;  %4054 = vrcp.f32 %v3035_v23  ;;  %v3037_v14 = vadd.f32 1.0, %v4033_v10  ;;  %v6240_v63 = vadd.f32 %v6072_v60, %v2516_v0  ;;  %v3659_v15 = vmul.f32 -1.442695, %v6230_v35 }
 0x54a   : > { %v4037_v20 = vpop.eup %4036  ;;  %v3270_v62 = vpack.c.bf16 %v3221_v3, %v3217_v22  ;;  %v3220_v5 = vmul.f32 %v4035_v47, %v6109_v54  ;;  %4056 = vpow2.f32 %v3653_v9 }
 0x54b   : > { %v4039_v38 = vpop.eup %4038  ;;  %v3222_v24 = vmul.f32 %v4037_v20, %v6117_v55  ;;  %4058 = vrcp.f32 %v3037_v14  ;;  %v6237_v55 = vadd.f32 %v6147_v57, %v2516_v0  ;;  %v3660_v57 = vmul.f32 -1.442695, %v6233_v43 }
 0x54c   : > { %v4041_v32 = vpop.eup %4040  ;;  %4060 = vpow2.f32 %v3655_v13  ;;  %v3269_v11 = vpack.c.bf16 %v3220_v5, %v3216_v17  ;;  %v3661_v60 = vmul.f32 -1.442695, %v6240_v63  ;;  %v3223_v13 = vmul.f32 %v4039_v38, %v6121_v53 }
 0x54d   : > { %v4043_v34 = vpop.eup %4042  ;;  %v3036_v26 = vadd.f32 1.0, %v4041_v32  ;;  %4062 = vpow2.f32 %v3656_v29  ;;  %v3271_v54 = vpack.c.bf16 %v3222_v24, %v3218_v25  ;;  %v3662_v10 = vmul.f32 -1.442695, %v6237_v55 }
 0x54e   : > { %v4045_v44 = vpop.eup %4044  ;;  %v3038_v39 = vadd.f32 1.0, %v4043_v34  ;;  %4064 = vpow2.f32 %v3658_v59  ;;  %3300 = vmatprep.subr.bf16.mxu0 %v3269_v11  ;;  %v6249_v14 = vadd.f32 %v6149_v45, %v2516_v0 }
 0x54f   : > { %v4047_v12 = vpop.eup %4046  ;;  %4066 = vrcp.f32 %v3036_v26  ;;  %v3039_v27 = vadd.f32 1.0, %v4045_v44  ;;  %3341 = vmatprep.subr.bf16.mxu1 %v3271_v54  ;;  %3301 = vmatpush1.bf16.msra.mxu0 %v3268_v51  ;;  %v2521_v51 = vpop.permute.xlu1 %2520 }
 0x550   : > { %v4049_v61 = vpop.eup %4048  ;;  %4068 = vrcp.f32 %v3038_v39  ;;  %3342 = vmatpush1.bf16.msra.mxu1 %v3270_v62  ;;  %v6252_v20 = vadd.f32 %v6080_v21, %v2521_v51  ;;  %v6255_v17 = vadd.f32 %v6158_v42, %v2521_v51  ;;  %v3225_v5 = vmul.f32 %v4047_v12, %v6141_v8 }
 0x551   : > { %v4051_v9 = vpop.eup %4050  ;;  %4070 = vrcp.f32 %v3039_v27  ;;  %v3041_v6 = vadd.f32 1.0, %v4049_v61  ;;  %v6260_v38 = vadd.f32 %v6086_v48, %v2521_v51  ;;  %v3663_v42 = vmul.f32 -1.442695, %v6249_v14 }
 0x552   : > { %v4053_v23 = vpop.eup %4052  ;;  %4072 = vpow2.f32 %v3657_v52  ;;  %v3664_v8 = vmul.f32 -1.442695, %v6252_v20  ;;  %v3666_v48 = vmul.f32 -1.442695, %v6255_v17  ;;  %v6271_v27 = vadd.f32 %v6161_v28, %v2521_v51 }
 0x553   : > { %v4055_v22 = vpop.eup %4054  ;;  %4074 = vrcp.f32 %v3041_v6  ;;  %v3226_v44 = vmul.f32 %v4053_v23, %v6153_v46  ;;  %v3665_v12 = vmul.f32 -1.442695, %v6260_v38 }
 0x554   : > { %v4057_v3 = vpop.eup %4056  ;;  %v3227_v47 = vmul.f32 %v4055_v22, %v6156_v2  ;;  %4076 = vpow2.f32 %v3659_v15  ;;  %v2526_v15 = vpop.permute.xlu0 %2525  ;;  %v3667_v22 = vmul.f32 -1.442695, %v6271_v27 }
 0x555   : > { %v4059_v29 = vpop.eup %4058  ;;  %v3040_v59 = vadd.f32 1.0, %v4057_v3  ;;  %4078 = vpow2.f32 %v3660_v57  ;;  %v6274_v46 = vadd.f32 %v6104_v4, %v2526_v15  ;;  %v6277_v23 = vadd.f32 %v6179_v41, %v2526_v15 }
 0x556   : > { %v4061_v62 = vpop.eup %4060  ;;  %v3272_v25 = vpack.c.bf16 %v3227_v47, %v3223_v13  ;;  %v3229_v53 = vmul.f32 %v4059_v29, %v6165_v31  ;;  %4080 = vpow2.f32 %v3662_v10  ;;  %v3224_v31 = vmul.f32 %v4051_v9, %v6145_v50 }
 0x557   : > { %v4063_v2 = vpop.eup %4062  ;;  %4082 = vrcp.f32 %v3040_v59  ;;  %v3042_v45 = vadd.f32 1.0, %v4061_v62  ;;  %v3668_v13 = vmul.f32 -1.442695, %v6274_v46  ;;  %v3670_v29 = vmul.f32 -1.442695, %v6277_v23  ;;  %v2531_v62 = vpop.permute.xlu1 %2530 }
 0x558   : > { %v4065_v24 = vpop.eup %4064  ;;  %v3274_v32 = vpack.c.bf16 %v3229_v53, %v3225_v5  ;;  %v3043_v21 = vadd.f32 1.0, %v4063_v2  ;;  %4084 = vpow2.f32 %v3661_v60  ;;  %v6281_v60 = vadd.f32 %v6113_v58, %v2526_v15 }
 0x559   : > { %v4067_v0 = vpop.eup %4066  ;;  %4086 = vrcp.f32 %v3042_v45  ;;  %v3045_v11 = vadd.f32 1.0, %v4065_v24  ;;  %v6287_v58 = vadd.f32 %v6183_v37, %v2526_v15  ;;  %v6781_v45 = vld [vmem:[#allocation83_spill] sm:$0xff] }
 0x55a   : > { %v4069_v34 = vpop.eup %4068  ;;  %v3228_v26 = vmul.f32 %v4067_v0, %v6170_v36  ;;  %4088 = vrcp.f32 %v3043_v21  ;;  %v3669_v5 = vmul.f32 -1.442695, %v6281_v60  ;;  %v6292_v24 = vadd.f32 %v6781_v45, %v2531_v62  ;;  %v6782_v0 = vld [vmem:[#allocation85_spill] sm:$0xff] }
 0x55b   : > { %v4071_v54 = vpop.eup %4070  ;;  %v3230_v39 = vmul.f32 %v4069_v34, %v6186_v1  ;;  %4090 = vrcp.f32 %v3045_v11  ;;  %v6297_v11 = vadd.f32 %v6782_v0, %v2531_v62 }
 0x55c   : > { %v4073_v52 = vpop.eup %4072  ;;  %4092 = vpow2.f32 %v3663_v42  ;;  %v3273_v61 = vpack.c.bf16 %v3228_v26, %v3224_v31  ;;  %v3231_v53 = vmul.f32 %v4071_v54, %v6191_v19  ;;  %v6300_v19 = vadd.f32 %v6188_v30, %v2531_v62 }
 0x55d   : > { %v4075_v50 = vpop.eup %4074  ;;  %v3044_v36 = vadd.f32 1.0, %v4073_v52  ;;  %4094 = vpow2.f32 %v3664_v8  ;;  %v3275_v9 = vpack.c.bf16 %v3230_v39, %v3226_v44  ;;  %v3672_v54 = vmul.f32 -1.442695, %v6292_v24 }
 0x55e   : > { %v4077_v6 = vpop.eup %4076  ;;  %4096 = vpow2.f32 %v3666_v48  ;;  %3302 = vmatprep.subr.bf16.mxu0 %v3273_v61  ;;  %v3233_v21 = vmul.f32 %v4075_v50, %v6197_v56  ;;  %v3671_v48 = vmul.f32 -1.442695, %v6287_v58  ;;  %v6307_v30 = vadd.f32 %v6193_v33, %v2531_v62 }
 0x55f   : > { %v4079_v1 = vpop.eup %4078  ;;  %4098 = vrcp.f32 %v3044_v36  ;;  %v3046_v57 = vadd.f32 1.0, %v4077_v6  ;;  %3343 = vmatprep.subr.bf16.mxu1 %v3275_v9  ;;  %3303 = vmatpush1.bf16.msra.mxu0 %v3272_v25  ;;  %v3674_v50 = vmul.f32 -1.442695, %v6300_v19  ;;  %v3673_v15 = vmul.f32 -1.442695, %v6297_v11 }
 0x560   : > { %v4081_v28 = vpop.eup %4080  ;;  %v3047_v10 = vadd.f32 1.0, %v4079_v1  ;;  %4100 = vpow2.f32 %v3665_v12  ;;  %3344 = vmatpush1.bf16.msra.mxu1 %v3274_v32  ;;  %v3675_v33 = vmul.f32 -1.442695, %v6307_v30 }
 0x561   : > { %v4083_v4 = vpop.eup %4082  ;;  %4102 = vrcp.f32 %v3046_v57  ;;  %v3049_v3 = vadd.f32 1.0, %v4081_v28 }
 0x562   : > { %v4085_v51 = vpop.eup %4084  ;;  %4104 = vrcp.f32 %v3047_v10  ;;  %v3232_v39 = vmul.f32 %v4083_v4, %v6203_v16 }
 0x563   : > { %v4087_v41 = vpop.eup %4086  ;;  %4106 = vrcp.f32 %v3049_v3  ;;  %v3048_v47 = vadd.f32 1.0, %v4085_v51 }
 0x564   : > { %v4089_v59 = vpop.eup %4088  ;;  %4108 = vpow2.f32 %v3667_v22  ;;  %v3234_v9 = vmul.f32 %v4087_v41, %v6208_v49 }
 0x565   : > { %v4091_v25 = vpop.eup %4090  ;;  %v3235_v2 = vmul.f32 %v4089_v59, %v6211_v7  ;;  %4110 = vrcp.f32 %v3048_v47 }
 0x566   : > { %v4093_v32 = vpop.eup %4092  ;;  %v3237_v42 = vmul.f32 %v4091_v25, %v6214_v40  ;;  %4112 = vpow2.f32 %v3668_v13 }
 0x567   : > { %v4095_v37 = vpop.eup %4094  ;;  %v3276_v8 = vpack.c.bf16 %v3235_v2, %v3231_v53  ;;  %v3050_v34 = vadd.f32 1.0, %v4093_v32  ;;  %4114 = vpow2.f32 %v3670_v29 }
 0x568   : > { %v4097_v7 = vpop.eup %4096  ;;  %v3278_v31 = vpack.c.bf16 %v3237_v42, %v3233_v21  ;;  %v3051_v26 = vadd.f32 1.0, %v4095_v37  ;;  %4116 = vpow2.f32 %v3669_v5 }
 0x569   : > { %v4099_v56 = vpop.eup %4098  ;;  %4118 = vrcp.f32 %v3050_v34  ;;  %v3053_v40 = vadd.f32 1.0, %v4097_v7 }
 0x56a   : > { %v4101_v44 = vpop.eup %4100  ;;  %v3236_v52 = vmul.f32 %v4099_v56, %v6218_v18  ;;  %4120 = vrcp.f32 %v3051_v26 }
 0x56b   : > { %v4103_v12 = vpop.eup %4102  ;;  %4122 = vrcp.f32 %v3053_v40  ;;  %v3052_v61 = vadd.f32 1.0, %v4101_v44 }
 0x56c   : > { %v4105_v36 = vpop.eup %4104  ;;  %v3238_v6 = vmul.f32 %v4103_v12, %v6230_v35  ;;  %4124 = vpow2.f32 %v3671_v48  ;;  %v3277_v16 = vpack.c.bf16 %v3236_v52, %v3232_v39 }
 0x56d   : > { %v4107_v1 = vpop.eup %4106  ;;  %4126 = vrcp.f32 %v3052_v61  ;;  %v3239_v47 = vmul.f32 %v4105_v36, %v6233_v43 }
 0x56e   : > { %v4109_v18 = vpop.eup %4108  ;;  %4128 = vpow2.f32 %v3672_v54  ;;  %3304 = vmatprep.subr.bf16.mxu0 %v3277_v16  ;;  %v3279_v57 = vpack.c.bf16 %v3238_v6, %v3234_v9  ;;  %v3241_v5 = vmul.f32 %v4107_v1, %v6237_v55 }
 0x56f   : > { %v4111_v28 = vpop.eup %4110  ;;  %v3054_v10 = vadd.f32 1.0, %v4109_v18  ;;  %4130 = vpow2.f32 %v3674_v50  ;;  %3305 = vmatpush1.bf16.msra.mxu0 %v3276_v8 }
 0x570   : > { %v4113_v22 = vpop.eup %4112  ;;  %4132 = vpow2.f32 %v3673_v15  ;;  %3345 = vmatprep.subr.bf16.mxu1 %v3279_v57  ;;  %v3240_v21 = vmul.f32 %v4111_v28, %v6240_v63  ;;  %v4155_v28 = vld [vmem:[%s4374_s0 + $0x8] sm:$0xff] }
 0x571   : > { %v4115_v49 = vpop.eup %4114  ;;  %4134 = vrcp.f32 %v3054_v10  ;;  %3346 = vmatpush1.bf16.msra.mxu1 %v3278_v31  ;;  %v3055_v3 = vadd.f32 1.0, %v4113_v22  ;;  %v3379_v10 = vcombine.high %v4155_v28, %v4155_v28 }
 0x572   : > { %v4117_v35 = vpop.eup %4116  ;;  %4136 = vpow2.f32 %v3675_v33  ;;  %v3057_v13 = vadd.f32 1.0, %v4115_v49 }
 0x573   : > { %v4119_v4 = vpop.eup %4118  ;;  %v3056_v59 = vadd.f32 1.0, %v4117_v35  ;;  %4138 = vrcp.f32 %v3055_v3 }
 0x574   : > { %v4121_v51 = vpop.eup %4120  ;;  %4140 = vrcp.f32 %v3057_v13  ;;  %v3242_v31 = vmul.f32 %v4119_v4, %v6249_v14 }
 0x575   : > { %v4123_v41 = vpop.eup %4122  ;;  %v3243_v29 = vmul.f32 %v4121_v51, %v6252_v20  ;;  %4142 = vrcp.f32 %v3056_v59 }
 0x576   : > { %v4125_v62 = vpop.eup %4124  ;;  %v3245_v25 = vmul.f32 %v4123_v41, %v6255_v17 }
 0x577   : > { %v4127_v53 = vpop.eup %4126  ;;  %v3280_v2 = vpack.c.bf16 %v3243_v29, %v3239_v47  ;;  %v3058_v45 = vadd.f32 1.0, %v4125_v62 }
 0x578   : > { %v4129_v32 = vpop.eup %4128  ;;  %v3282_v42 = vpack.c.bf16 %v3245_v25, %v3241_v5  ;;  %v3244_v0 = vmul.f32 %v4127_v53, %v6260_v38 }
 0x579   : > { %v4131_v43 = vpop.eup %4130  ;;  %v3059_v20 = vadd.f32 1.0, %v4129_v32  ;;  %4144 = vrcp.f32 %v3058_v45 }
 0x57a   : > { %v4133_v37 = vpop.eup %4132  ;;  %v3061_v8 = vadd.f32 1.0, %v4131_v43  ;;  %v3281_v55 = vpack.c.bf16 %v3244_v0, %v3240_v21 }
 0x57b   : > { %v4135_v34 = vpop.eup %4134  ;;  %4146 = vrcp.f32 %v3059_v20  ;;  %v3060_v17 = vadd.f32 1.0, %v4133_v37 }
 0x57c   : > { %v4137_v7 = vpop.eup %4136  ;;  %v3246_v26 = vmul.f32 %v4135_v34, %v6271_v27  ;;  %4148 = vrcp.f32 %v3061_v8  ;;  %3306 = vmatprep.subr.bf16.mxu0 %v3281_v55 }
 0x57d   : > { %4150 = vrcp.f32 %v3060_v17  ;;  %v3062_v63 = vadd.f32 1.0, %v4137_v7  ;;  %3307 = vmatpush1.bf16.msra.mxu0 %v3280_v2  ;;  %v4139_v48 = vpop.eup %4138 }
 0x57e   : > { %v3283_v38 = vpack.c.bf16 %v3246_v26, %v3242_v31  ;;  %v4141_v56 = vpop.eup %4140  ;;  %v3247_v52 = vmul.f32 %v4139_v48, %v6274_v46 }
 0x57f   : > { %4152 = vrcp.f32 %v3062_v63  ;;  %v4143_v40 = vpop.eup %4142  ;;  %v3249_v12 = vmul.f32 %v4141_v56, %v6277_v23  ;;  %v3255_v23 = vld [vmem:[%s6371_s12] sm:$0x3] }
 0x580   : > { %3347 = vmatprep.subr.bf16.mxu1 %v3283_v38  ;;  %v3248_v50 = vmul.f32 %v4143_v40, %v6281_v60  ;;  %v3292_v60 = vpop.permute.xlu0 %3291 }
 0x581   : > { %3348 = vmatpush1.bf16.msra.mxu1 %v3282_v42 }
 0x583   : > { %v4145_v54 = vpop.eup %4144 }
 0x584   : > { %v3250_v16 = vmul.f32 %v4145_v54, %v6287_v58 }
 0x585   : > { %v4147_v44 = vpop.eup %4146 }
 0x586   : > { %v4149_v39 = vpop.eup %4148  ;;  %v3251_v14 = vmul.f32 %v4147_v44, %v6292_v24 }
 0x587   : > { %v4151_v27 = vpop.eup %4150  ;;  %v3253_v61 = vmul.f32 %v4149_v39, %v6300_v19  ;;  %v4154_v19 = vld [vmem:[%s4374_s0] sm:$0xff]  ;;  %s3561_s0 = sshll.u32 %s4349_s16, 1 }
 0x588   : > { %v3284_v15 = vpack.c.bf16 %v3251_v14, %v3247_v52  ;;  %v3252_v36 = vmul.f32 %v4151_v27, %v6297_v11  ;;  %v3378_v18 = vcombine.high %v4154_v19, %v4154_v19  ;;  %s554_s23 = sadd.s32 %s3561_s0, %s6797_s1 }
 0x589   : > { %v4153_v9 = vpop.eup %4152  ;;  %v3286_v6 = vpack.c.bf16 %v3253_v61, %v3249_v12  ;;  %s555_s25 = scalar_lea.vmem %s6373_s14, %s554_s23 }
 0x58a   : > { %v3254_v1 = vmul.f32 %v4153_v9, %v6307_v30  ;;  %v3285_v46 = vpack.c.bf16 %v3252_v36, %v3248_v50 }
 0x58c   : > { %3308 = vmatprep.subr.bf16.mxu0 %v3285_v46  ;;  %v3287_v24 = vpack.c.bf16 %v3254_v1, %v3250_v16 }
 0x58d   : > { %3309 = vmatpush1.bf16.msra.mxu0 %v3284_v15 }
 0x58e   : > { %3349 = vmatprep.subr.bf16.mxu1 %v3287_v24 }
 0x58f   : > { %3350 = vmatpush1.bf16.msra.mxu1 %v3286_v6 }
 0x590   : > { %3327 = vmatmul.mubr.bf16.vlgmr.msra.gmra.mrb[128].mxu0 %v3255_v23 }
 0x592   : > { %3368 = vmatmul.mubr.bf16.vlgmr.msra.gmra.mrb[128].mxu1 %v3255_v23 }
 0x663   : > { %v3328_v11 = vpop.f32.mrb[128].mxu0 }
 0x664   : > { %v3329_v58 = vadd.f32 %v3328_v11, %v3292_v60  ;;  %v3330_v33 = vpop.f32.mrb[129].mxu0 }
 0x665   : > { %v3369_v30 = vpop.f32.mrb[128].mxu1  ;;  %v3331_v57 = vadd.f32 %v3330_v33, %v3292_v60  ;;  %v3332_v22 = vpop.f32.mrb[130].mxu0 }
 0x666   : > { %v3382_v49 = vsub.f32 %v3329_v58, %v4154_v19  ;;  %v3370_v35 = vadd.f32 %v3369_v30, %v3292_v60  ;;  %v3371_v4 = vpop.f32.mrb[129].mxu1  ;;  %v3333_v3 = vpop.f32.mrb[131].mxu0 }
 0x667   : > { %v3383_v51 = vsub.f32 %v3331_v57, %v3378_v18  ;;  %v3372_v13 = vadd.f32 %v3371_v4, %v3292_v60  ;;  %v3373_v41 = vpop.f32.mrb[130].mxu1 }
 0x668   : > { %v3386_v47 = vmul.f32 %v3382_v49, %v3382_v49  ;;  %v3384_v29 = vsub.f32 %v3370_v35, %v4155_v28  ;;  %v3374_v59 = vpop.f32.mrb[131].mxu1 }
 0x669   : > { %v3387_v62 = vmul.f32 %v3383_v51, %v3383_v51  ;;  %v3385_v5 = vsub.f32 %v3372_v13, %v3379_v10 }
 0x66a   : > { %v3391_v25 = vsel %vm3390_vm2, %v3386_v47, 0.0  ;;  %v3388_v53 = vmul.f32 %v3384_v29, %v3384_v29 }
 0x66b   : > { %v3392_v2 = vsel %vm3390_vm2, %v3387_v62, 0.0  ;;  %v3389_v45 = vmul.f32 %v3385_v5, %v3385_v5 }
 0x66c   : > { %v3393_v32 = vadd.f32 %v3392_v2, %v3391_v25  ;;  %v3394_v21 = vsel %vm3390_vm2, %v3388_v53, 0.0 }
 0x66d   : > { %v3396_v0 = vsel %vm3390_vm2, %v3389_v45, 0.0 }
 0x66e   : > { %v3395_v42 = vadd.f32 %v3394_v21, %v3393_v32 }
 0x670   : > { %v3397_v43 = vadd.f32 %v3396_v0, %v3395_v42 }
 0x672   : > { %3398 = vadd.xlane.f32.xlu1 %v3397_v43 }
 0x6ff   : > { %v3399_v20 = vpop.xlane.xlu1 %3398 }
 0x700   : > { %v3400_v37 = vrot.slane %v3399_v20, 4 }
 0x702   : > { %v3401_v8 = vadd.f32 %v3400_v37, %v3399_v20 }
 0x704   : > { %v3402_v55 = vrot.slane %v3401_v8, 2 }
 0x706   : > { %v3403_v34 = vadd.f32 %v3402_v55, %v3401_v8 }
 0x708   : > { %v3404_v17 = vrot.slane %v3403_v34, 1 }
 0x70a   : > { %v3405_v7 = vadd.f32 %v3404_v17, %v3403_v34 }
 0x70c   : > { %3681 = vpush %v3405_v7 }
 0x73d   : > { %s3682_s26 = spop %3681 }
 0x73e   : > { %v3407_v31 = vstv %s3682_s26 }
 0x73f   : > { %3409 = vst.msk [vmem:[%s555_s25] sm:$0x1] %vm3408_vm3, %v3407_v31 }
 0x740 PF: > { %s6783_s27 = sld [smem:[#allocation8_spill]]  ;;  %s6784_s1 = sld [smem:[#allocation6_spill]] }
 0x741   : > { %s6785_s22 = sld [smem:[#allocation7_spill]]  ;;  %s6786_s23 = sld [smem:[#allocation9_spill]] }
 0x742   : > { %s6787_s24 = sld [smem:[#allocation10_spill]] }
 0x746   : > { %s34_s25 = sadd.s32 1, %s6783_s27  }
 0x747   : > { %p31_p4 = scmp.ge.s32.totalorder %s34_s25, 6  }
 0x749   :  { %33 = sbr.rel (!%p31_p4) target bundleno = 28 (0x1c), region = 110 }

</bundles_post_ra>
